<compile_context>
chip_gen: v6e
topology: v6e:2x2x1
jax: 0.10.0
libtpu: 0.0.40
codegen_flags: <defaults>
</compile_context>

<pallas_src>
import math

import jax
import jax.numpy as jnp
import numpy as np
from jax.experimental import pallas as pl
from jax.experimental.pallas import tpu as pltpu


# ----------------------------- config -----------------------------------
class GPT2Config:
    vocab_size = 128
    block_size = 16
    embed_dim = 32
    num_heads = 4
    num_layers = 2


# ------------------------- in-kernel helpers -----------------------------
def _erf_approx(x):
    # Abramowitz & Stegun 7.1.26, |err| < 1.5e-7 -> matches exact-erf GELU
    # (nn.GELU() default) at float32 precision using only exp on the EUP.
    a1, a2, a3, a4, a5 = 0.254829592, -0.284496736, 1.421413741, -1.453152027, 1.061405429
    p = 0.3275911
    sgn = jnp.where(x >= 0.0, 1.0, -1.0)
    ax = jnp.abs(x)
    t = 1.0 / (1.0 + p * ax)
    poly = ((((a5 * t + a4) * t + a3) * t + a2) * t + a1) * t
    return sgn * (1.0 - poly * jnp.exp(-ax * ax))


def _gelu(x):
    return 0.5 * x * (1.0 + _erf_approx(x * (1.0 / math.sqrt(2.0))))


def _layernorm(x, g, b):
    mu = jnp.mean(x, axis=-1, keepdims=True)
    xc = x - mu
    var = jnp.mean(xc * xc, axis=-1, keepdims=True)
    return xc * jax.lax.rsqrt(var + 1e-5) * g + b


# ------------------------- fused forward kernel ---------------------------
def gpt2_kernel(idx_ref, wte_ref, wpe_ref,
                ln1_g_ref, ln1_b_ref,
                wq_ref, bq_ref, wk_ref, bk_ref, wv_ref, bv_ref,
                wproj_ref, bproj_ref,
                ln2_g_ref, ln2_b_ref,
                fc1_w_ref, fc1_b_ref, fc2_w_ref, fc2_b_ref,
                lnf_g_ref, lnf_b_ref,
                logits_ref):
    B, T = idx_ref.shape
    V, C = wte_ref.shape
    L, H, _, Dh = wq_ref.shape
    BT = B * T
    scale = 1.0 / math.sqrt(Dh)

    # --- token + position embeddings (gather via one-hot matmul; V small) ---
    idx = idx_ref[...]
    onehot = (jax.lax.broadcasted_iota(jnp.int32, (B, T, V), 2)
              == idx[:, :, None]).astype(jnp.float32)                  # (B,T,V)
    tok = jnp.dot(onehot.reshape(BT, V), wte_ref[...],
                  preferred_element_type=jnp.float32)                  # (BT,C)
    pos = wpe_ref[0:T, :]                                              # (T,C)
    x = (tok.reshape(B, T, C) + pos[None]).reshape(BT, C)

    # causal mask (built once, shared across layers / heads)
    row = jax.lax.broadcasted_iota(jnp.int32, (B, T, T), 1)
    col = jax.lax.broadcasted_iota(jnp.int32, (B, T, T), 2)
    causal = col <= row

    for l in range(L):
        # ---------------- attention sub-block (heads stay in VMEM) --------
        h = _layernorm(x, ln1_g_ref[l], ln1_b_ref[l])                  # (BT,C)
        att = jnp.zeros((BT, C), jnp.float32)
        for hh in range(H):
            q = (jnp.dot(h, wq_ref[l, hh], preferred_element_type=jnp.float32)
                 + bq_ref[l, hh]).reshape(B, T, Dh)
            k = (jnp.dot(h, wk_ref[l, hh], preferred_element_type=jnp.float32)
                 + bk_ref[l, hh]).reshape(B, T, Dh)
            v = (jnp.dot(h, wv_ref[l, hh], preferred_element_type=jnp.float32)
                 + bv_ref[l, hh]).reshape(B, T, Dh)
            s = jnp.einsum('bqd,bkd->bqk', q, k,
                           preferred_element_type=jnp.float32) * scale
            s = jnp.where(causal, s, -1e30)
            m = jnp.max(s, axis=-1, keepdims=True)
            p = jnp.exp(s - m)
            p = p / jnp.sum(p, axis=-1, keepdims=True)
            y = jnp.einsum('bqk,bkd->bqd', p, v,
                           preferred_element_type=jnp.float32).reshape(BT, Dh)
            # per-head slice of the output projection (accumulates the concat)
            att = att + jnp.dot(y, wproj_ref[l, hh],
                                preferred_element_type=jnp.float32)
        x = x + att + bproj_ref[l]                 # residual fused in-kernel

        # ---------------- MLP sub-block ------------------------------------
        h = _layernorm(x, ln2_g_ref[l], ln2_b_ref[l])
        h = jnp.dot(h, fc1_w_ref[l],
                    preferred_element_type=jnp.float32) + fc1_b_ref[l]
        h = _gelu(h)
        x = x + (jnp.dot(h, fc2_w_ref[l],
                         preferred_element_type=jnp.float32) + fc2_b_ref[l])

    # ------------- final LN + tied head (contract against wte directly) ----
    xf = _layernorm(x, lnf_g_ref[...], lnf_b_ref[...])
    logits = jax.lax.dot_general(xf, wte_ref[...],
                                 (((1,), (1,)), ((), ())),
                                 preferred_element_type=jnp.float32)   # (BT,V)
    logits_ref[...] = logits.reshape(B, T, V).astype(logits_ref.dtype)


# --------------------------- pallas wrapper --------------------------------
def _full_spec(shape):
    n = len(shape)
    return pl.BlockSpec(shape, lambda i, _n=n: (0,) * _n)


def _pack_params(params, cfg):
    """Stack per-layer params and pre-split attention weights per head."""
    C, H, L = cfg.embed_dim, cfg.num_heads, cfg.num_layers
    Dh = C // H
    blocks = params["blocks"]

    def stack(key):
        return jnp.stack([blk[key] for blk in blocks], axis=0)

    aw = stack("attn_w")                                     # (L, C, 3C)
    ab = stack("attn_b")                                     # (L, 1, 3C)
    wq = aw[:, :, 0 * C:1 * C].reshape(L, C, H, Dh).transpose(0, 2, 1, 3)
    wk = aw[:, :, 1 * C:2 * C].reshape(L, C, H, Dh).transpose(0, 2, 1, 3)
    wv = aw[:, :, 2 * C:3 * C].reshape(L, C, H, Dh).transpose(0, 2, 1, 3)
    bq = ab[:, :, 0 * C:1 * C].reshape(L, 1, H, Dh).transpose(0, 2, 1, 3)
    bk = ab[:, :, 1 * C:2 * C].reshape(L, 1, H, Dh).transpose(0, 2, 1, 3)
    bv = ab[:, :, 2 * C:3 * C].reshape(L, 1, H, Dh).transpose(0, 2, 1, 3)
    wproj = stack("proj_w").reshape(L, H, Dh, C)             # rows hh*Dh:(hh+1)*Dh
    bproj = stack("proj_b")                                  # (L, 1, C)

    return (stack("ln1_g"), stack("ln1_b"),
            wq, bq, wk, bk, wv, bv,
            wproj, bproj,
            stack("ln2_g"), stack("ln2_b"),
            stack("fc1_w"), stack("fc1_b"), stack("fc2_w"), stack("fc2_b"))


def gpt2_forward(params, idx, cfg):
    B, T = idx.shape
    V = cfg.vocab_size
    arrays = (idx, params["wte"], params["wpe"],
              *_pack_params(params, cfg),
              params["lnf_g"], params["lnf_b"])
    logits = pl.pallas_call(
        gpt2_kernel,
        out_shape=jax.ShapeDtypeStruct((B, T, V), jnp.float32),
        grid=(1,),
        in_specs=[_full_spec(a.shape) for a in arrays],
        out_specs=_full_spec((B, T, V)),
        compiler_params=pltpu.CompilerParams(
            dimension_semantics=("arbitrary",),
            vmem_limit_bytes=64 << 20),
    )(*arrays)
    # TODO(synk): targets / cross-entropy loss branch not implemented (targets=None path).
    return logits


# --------------------------- parameter init -------------------------------
def init_params(cfg, key):
    std_lin = 0.02 * (2 * cfg.num_layers) ** (-0.5)  # scale=True path
    std_emb = 0.02
    keys = iter(jax.random.split(key, 64))

    def nrm(shape, std):
        return std * jax.random.normal(next(keys), shape, jnp.float32)

    C = cfg.embed_dim
    params = dict(
        # wte is tied to head.weight; the Linear init (applied last in torch) wins.
        wte=nrm((cfg.vocab_size, C), std_lin),
        wpe=nrm((cfg.block_size, C), std_emb),
        lnf_g=jnp.ones((1, C), jnp.float32),
        lnf_b=jnp.zeros((1, C), jnp.float32),
        blocks=[],
    )
    for _ in range(cfg.num_layers):
        params["blocks"].append(dict(
            ln1_g=jnp.ones((1, C), jnp.float32), ln1_b=jnp.zeros((1, C), jnp.float32),
            attn_w=nrm((C, 3 * C), std_lin), attn_b=jnp.zeros((1, 3 * C), jnp.float32),
            proj_w=nrm((C, C), std_lin), proj_b=jnp.zeros((1, C), jnp.float32),
            ln2_g=jnp.ones((1, C), jnp.float32), ln2_b=jnp.zeros((1, C), jnp.float32),
            fc1_w=nrm((C, 4 * C), std_lin), fc1_b=jnp.zeros((1, 4 * C), jnp.float32),
            fc2_w=nrm((4 * C, C), std_lin), fc2_b=jnp.zeros((1, C), jnp.float32),
        ))
    return params


# -------------------------- pure-JAX reference -----------------------------
def ref_forward(params, idx, cfg):
    B, T = idx.shape
    C, H = cfg.embed_dim, cfg.num_heads
    Dh = C // H
    x = params["wte"][idx] + params["wpe"][:T][None, :, :]

    def ln(x, g, b):
        mu = x.mean(-1, keepdims=True)
        var = ((x - mu) ** 2).mean(-1, keepdims=True)
        return (x - mu) * jax.lax.rsqrt(var + 1e-5) * g.reshape(-1) + b.reshape(-1)

    for blk in params["blocks"]:
        h = ln(x, blk["ln1_g"], blk["ln1_b"])
        qkv = h @ blk["attn_w"] + blk["attn_b"].reshape(-1)
        q, k, v = jnp.split(qkv, 3, axis=-1)
        q = q.reshape(B, T, H, Dh).transpose(0, 2, 1, 3)
        k = k.reshape(B, T, H, Dh).transpose(0, 2, 1, 3)
        v = v.reshape(B, T, H, Dh).transpose(0, 2, 1, 3)
        s = (q @ k.transpose(0, 1, 3, 2)) / math.sqrt(Dh)
        mask = jnp.tril(jnp.ones((T, T), bool))
        s = jnp.where(mask, s, -jnp.inf)
        p = jax.nn.softmax(s, axis=-1)
        y = (p @ v).transpose(0, 2, 1, 3).reshape(B, T, C)
        x = x + y @ blk["proj_w"] + blk["proj_b"].reshape(-1)
        h = ln(x, blk["ln2_g"], blk["ln2_b"])
        h1 = jax.nn.gelu(h @ blk["fc1_w"] + blk["fc1_b"].reshape(-1), approximate=False)
        x = x + h1 @ blk["fc2_w"] + blk["fc2_b"].reshape(-1)
    x = ln(x, params["lnf_g"], params["lnf_b"])
    return x @ params["wte"].T


# -------------------------------- main -------------------------------------
if __name__ == "__main__":
    cfg = GPT2Config()
    key = jax.random.PRNGKey(0)
    k_param, k_idx = jax.random.split(key)

    params = init_params(cfg, k_param)
    B, T = 2, 8
    idx = jax.random.randint(k_idx, (B, T), 0, cfg.vocab_size, dtype=jnp.int32)

    fwd = jax.jit(lambda p, i: gpt2_forward(p, i, cfg))
    logits = jax.block_until_ready(fwd(params, idx))
    ref = jax.block_until_ready(ref_forward(params, idx, cfg))

    assert logits.shape == (B, T, cfg.vocab_size)
    np.testing.assert_allclose(np.asarray(logits), np.asarray(ref), rtol=2e-3, atol=2e-3)
    print("KERNEL_OK")
</pallas_src>

<mosaic_0001>
module attributes {stable_mosaic.version = 11 : i64} {
  func.func @gpt2_kernel(%arg0: i32, %arg1: memref<2x8xi32, #tpu.memory_space<vmem>>, %arg2: memref<128x32xf32, #tpu.memory_space<vmem>>, %arg3: memref<16x32xf32, #tpu.memory_space<vmem>>, %arg4: memref<2x1x32xf32, #tpu.memory_space<vmem>>, %arg5: memref<2x1x32xf32, #tpu.memory_space<vmem>>, %arg6: memref<2x4x32x8xf32, #tpu.memory_space<vmem>>, %arg7: memref<2x4x1x8xf32, #tpu.memory_space<vmem>>, %arg8: memref<2x4x32x8xf32, #tpu.memory_space<vmem>>, %arg9: memref<2x4x1x8xf32, #tpu.memory_space<vmem>>, %arg10: memref<2x4x32x8xf32, #tpu.memory_space<vmem>>, %arg11: memref<2x4x1x8xf32, #tpu.memory_space<vmem>>, %arg12: memref<2x4x8x32xf32, #tpu.memory_space<vmem>>, %arg13: memref<2x1x32xf32, #tpu.memory_space<vmem>>, %arg14: memref<2x1x32xf32, #tpu.memory_space<vmem>>, %arg15: memref<2x1x32xf32, #tpu.memory_space<vmem>>, %arg16: memref<2x32x128xf32, #tpu.memory_space<vmem>>, %arg17: memref<2x1x128xf32, #tpu.memory_space<vmem>>, %arg18: memref<2x128x32xf32, #tpu.memory_space<vmem>>, %arg19: memref<2x1x32xf32, #tpu.memory_space<vmem>>, %arg20: memref<1x32xf32, #tpu.memory_space<vmem>>, %arg21: memref<1x32xf32, #tpu.memory_space<vmem>>, %arg22: memref<2x8x128xf32, #tpu.memory_space<vmem>>) attributes {dimension_semantics = [#tpu.dimension_semantics<arbitrary>], iteration_bounds = array<i64: 1>, scalar_prefetch = 0 : i64, scratch_operands = 0 : i64, tpu.core_type = #tpu.core_type<tc>, window_params = [{pipeline_mode = #tpu.pipeline_mode<synchronous>, transform_indices = @transform_0, window_bounds = array<i64: 2, 8>}, {pipeline_mode = #tpu.pipeline_mode<synchronous>, transform_indices = @transform_1, window_bounds = array<i64: 128, 32>}, {pipeline_mode = #tpu.pipeline_mode<synchronous>, transform_indices = @transform_2, window_bounds = array<i64: 16, 32>}, {pipeline_mode = #tpu.pipeline_mode<synchronous>, transform_indices = @transform_3, window_bounds = array<i64: 2, 1, 32>}, {pipeline_mode = #tpu.pipeline_mode<synchronous>, transform_indices = @transform_4, window_bounds = array<i64: 2, 1, 32>}, {pipeline_mode = #tpu.pipeline_mode<synchronous>, transform_indices = @transform_5, window_bounds = array<i64: 2, 4, 32, 8>}, {pipeline_mode = #tpu.pipeline_mode<synchronous>, transform_indices = @transform_6, window_bounds = array<i64: 2, 4, 1, 8>}, {pipeline_mode = #tpu.pipeline_mode<synchronous>, transform_indices = @transform_7, window_bounds = array<i64: 2, 4, 32, 8>}, {pipeline_mode = #tpu.pipeline_mode<synchronous>, transform_indices = @transform_8, window_bounds = array<i64: 2, 4, 1, 8>}, {pipeline_mode = #tpu.pipeline_mode<synchronous>, transform_indices = @transform_9, window_bounds = array<i64: 2, 4, 32, 8>}, {pipeline_mode = #tpu.pipeline_mode<synchronous>, transform_indices = @transform_10, window_bounds = array<i64: 2, 4, 1, 8>}, {pipeline_mode = #tpu.pipeline_mode<synchronous>, transform_indices = @transform_11, window_bounds = array<i64: 2, 4, 8, 32>}, {pipeline_mode = #tpu.pipeline_mode<synchronous>, transform_indices = @transform_12, window_bounds = array<i64: 2, 1, 32>}, {pipeline_mode = #tpu.pipeline_mode<synchronous>, transform_indices = @transform_13, window_bounds = array<i64: 2, 1, 32>}, {pipeline_mode = #tpu.pipeline_mode<synchronous>, transform_indices = @transform_14, window_bounds = array<i64: 2, 1, 32>}, {pipeline_mode = #tpu.pipeline_mode<synchronous>, transform_indices = @transform_15, window_bounds = array<i64: 2, 32, 128>}, {pipeline_mode = #tpu.pipeline_mode<synchronous>, transform_indices = @transform_16, window_bounds = array<i64: 2, 1, 128>}, {pipeline_mode = #tpu.pipeline_mode<synchronous>, transform_indices = @transform_17, window_bounds = array<i64: 2, 128, 32>}, {pipeline_mode = #tpu.pipeline_mode<synchronous>, transform_indices = @transform_18, window_bounds = array<i64: 2, 1, 32>}, {pipeline_mode = #tpu.pipeline_mode<synchronous>, transform_indices = @transform_19, window_bounds = array<i64: 1, 32>}, {pipeline_mode = #tpu.pipeline_mode<synchronous>, transform_indices = @transform_20, window_bounds = array<i64: 1, 32>}, {pipeline_mode = #tpu.pipeline_mode<synchronous>, transform_indices = @transform_21, window_bounds = array<i64: 2, 8, 128>}]} {
    %c0 = arith.constant 0 : index
    %c0_0 = arith.constant 0 : index
    %0 = vector.load %arg1[%c0, %c0_0] : memref<2x8xi32, #tpu.memory_space<vmem>>, vector<2x8xi32>
    %1 = tpu.iota {dimensions = array<i32: 2>} : vector<2x8x128xi32>
    %2 = vector.shape_cast %0 : vector<2x8xi32> to vector<2x8x1xi32>
    %3 = vector.broadcast %2 : vector<2x8x1xi32> to vector<2x8x128xi32>
    %4 = arith.cmpi eq, %1, %3 : vector<2x8x128xi32>
    %5 = arith.extui %4 : vector<2x8x128xi1> to vector<2x8x128xi32>
    %6 = arith.sitofp %5 : vector<2x8x128xi32> to vector<2x8x128xf32>
    %7 = vector.shape_cast %6 : vector<2x8x128xf32> to vector<16x128xf32>
    %c0_1 = arith.constant 0 : index
    %c0_2 = arith.constant 0 : index
    %8 = vector.load %arg2[%c0_1, %c0_2] : memref<128x32xf32, #tpu.memory_space<vmem>>, vector<128x32xf32>
    %cst = arith.constant dense<0.000000e+00> : vector<16x32xf32>
    %9 = tpu.matmul %7, %8, %cst {dimension_numbers = #tpu.dot_dimension_numbers<[1], [0], [0], [1], [0, 0, 1, 1], [], []>} : vector<16x128xf32>, vector<128x32xf32>, vector<16x32xf32> -> vector<16x32xf32>
    %c0_3 = arith.constant 0 : index
    %c0_4 = arith.constant 0 : index
    %10 = vector.load %arg3[%c0_3, %c0_4] : memref<16x32xf32, #tpu.memory_space<vmem>>, vector<8x32xf32>
    %11 = vector.shape_cast %9 : vector<16x32xf32> to vector<2x8x32xf32>
    %12 = vector.shape_cast %10 : vector<8x32xf32> to vector<1x8x32xf32>
    %13 = vector.broadcast %12 : vector<1x8x32xf32> to vector<2x8x32xf32>
    %14 = arith.addf %11, %13 : vector<2x8x32xf32>
    %15 = vector.shape_cast %14 : vector<2x8x32xf32> to vector<16x32xf32>
    %16 = tpu.iota {dimensions = array<i32: 1>} : vector<2x8x8xi32>
    %17 = tpu.iota {dimensions = array<i32: 2>} : vector<2x8x8xi32>
    %18 = arith.cmpi sle, %17, %16 : vector<2x8x8xi32>
    %c0_5 = arith.constant 0 : index
    %c0_6 = arith.constant 0 : index
    %c0_7 = arith.constant 0 : index
    %19 = vector.load %arg4[%c0_5, %c0_6, %c0_7] : memref<2x1x32xf32, #tpu.memory_space<vmem>>, vector<1x1x32xf32>
    %20 = vector.shape_cast %19 : vector<1x1x32xf32> to vector<1x32xf32>
    %c0_8 = arith.constant 0 : index
    %c0_9 = arith.constant 0 : index
    %c0_10 = arith.constant 0 : index
    %21 = vector.load %arg5[%c0_8, %c0_9, %c0_10] : memref<2x1x32xf32, #tpu.memory_space<vmem>>, vector<1x1x32xf32>
    %22 = vector.shape_cast %21 : vector<1x1x32xf32> to vector<1x32xf32>
    %cst_11 = arith.constant dense<0.000000e+00> : vector<16xf32>
    %23 = vector.multi_reduction <add>, %15, %cst_11 [1] : vector<16x32xf32> to vector<16xf32>
    %24 = vector.shape_cast %23 : vector<16xf32> to vector<16x1xf32>
    %cst_12 = arith.constant 3.200000e+01 : f32
    %25 = vector.broadcast %cst_12 : f32 to vector<16x1xf32>
    %26 = arith.divf %24, %25 : vector<16x1xf32>
    %27 = vector.broadcast %26 : vector<16x1xf32> to vector<16x32xf32>
    %28 = arith.subf %15, %27 : vector<16x32xf32>
    %29 = arith.mulf %28, %28 : vector<16x32xf32>
    %cst_13 = arith.constant dense<0.000000e+00> : vector<16xf32>
    %30 = vector.multi_reduction <add>, %29, %cst_13 [1] : vector<16x32xf32> to vector<16xf32>
    %31 = vector.shape_cast %30 : vector<16xf32> to vector<16x1xf32>
    %cst_14 = arith.constant 3.200000e+01 : f32
    %32 = vector.broadcast %cst_14 : f32 to vector<16x1xf32>
    %33 = arith.divf %31, %32 : vector<16x1xf32>
    %cst_15 = arith.constant 9.99999974E-6 : f32
    %34 = vector.broadcast %cst_15 : f32 to vector<16x1xf32>
    %35 = arith.addf %33, %34 : vector<16x1xf32>
    %36 = math.rsqrt %35 : vector<16x1xf32>
    %37 = vector.broadcast %36 : vector<16x1xf32> to vector<16x32xf32>
    %38 = arith.mulf %28, %37 : vector<16x32xf32>
    %39 = vector.broadcast %20 : vector<1x32xf32> to vector<16x32xf32>
    %40 = arith.mulf %38, %39 : vector<16x32xf32>
    %41 = vector.broadcast %22 : vector<1x32xf32> to vector<16x32xf32>
    %42 = arith.addf %40, %41 : vector<16x32xf32>
    %cst_16 = arith.constant 0.000000e+00 : f32
    %43 = vector.broadcast %cst_16 : f32 to vector<16x32xf32>
    %c0_17 = arith.constant 0 : index
    %c0_18 = arith.constant 0 : index
    %c0_19 = arith.constant 0 : index
    %c0_20 = arith.constant 0 : index
    %44 = vector.load %arg6[%c0_17, %c0_18, %c0_19, %c0_20] : memref<2x4x32x8xf32, #tpu.memory_space<vmem>>, vector<1x1x32x8xf32>
    %45 = vector.shape_cast %44 : vector<1x1x32x8xf32> to vector<32x8xf32>
    %cst_21 = arith.constant dense<0.000000e+00> : vector<16x8xf32>
    %46 = tpu.matmul %42, %45, %cst_21 {dimension_numbers = #tpu.dot_dimension_numbers<[1], [0], [0], [1], [0, 0, 1, 1], [], []>} : vector<16x32xf32>, vector<32x8xf32>, vector<16x8xf32> -> vector<16x8xf32>
    %c0_22 = arith.constant 0 : index
    %c0_23 = arith.constant 0 : index
    %c0_24 = arith.constant 0 : index
    %c0_25 = arith.constant 0 : index
    %47 = vector.load %arg7[%c0_22, %c0_23, %c0_24, %c0_25] : memref<2x4x1x8xf32, #tpu.memory_space<vmem>>, vector<1x1x1x8xf32>
    %48 = vector.shape_cast %47 : vector<1x1x1x8xf32> to vector<1x8xf32>
    %49 = vector.broadcast %48 : vector<1x8xf32> to vector<16x8xf32>
    %50 = arith.addf %46, %49 : vector<16x8xf32>
    %51 = vector.shape_cast %50 : vector<16x8xf32> to vector<2x8x8xf32>
    %c0_26 = arith.constant 0 : index
    %c0_27 = arith.constant 0 : index
    %c0_28 = arith.constant 0 : index
    %c0_29 = arith.constant 0 : index
    %52 = vector.load %arg8[%c0_26, %c0_27, %c0_28, %c0_29] : memref<2x4x32x8xf32, #tpu.memory_space<vmem>>, vector<1x1x32x8xf32>
    %53 = vector.shape_cast %52 : vector<1x1x32x8xf32> to vector<32x8xf32>
    %cst_30 = arith.constant dense<0.000000e+00> : vector<16x8xf32>
    %54 = tpu.matmul %42, %53, %cst_30 {dimension_numbers = #tpu.dot_dimension_numbers<[1], [0], [0], [1], [0, 0, 1, 1], [], []>} : vector<16x32xf32>, vector<32x8xf32>, vector<16x8xf32> -> vector<16x8xf32>
    %c0_31 = arith.constant 0 : index
    %c0_32 = arith.constant 0 : index
    %c0_33 = arith.constant 0 : index
    %c0_34 = arith.constant 0 : index
    %55 = vector.load %arg9[%c0_31, %c0_32, %c0_33, %c0_34] : memref<2x4x1x8xf32, #tpu.memory_space<vmem>>, vector<1x1x1x8xf32>
    %56 = vector.shape_cast %55 : vector<1x1x1x8xf32> to vector<1x8xf32>
    %57 = vector.broadcast %56 : vector<1x8xf32> to vector<16x8xf32>
    %58 = arith.addf %54, %57 : vector<16x8xf32>
    %59 = vector.shape_cast %58 : vector<16x8xf32> to vector<2x8x8xf32>
    %c0_35 = arith.constant 0 : index
    %c0_36 = arith.constant 0 : index
    %c0_37 = arith.constant 0 : index
    %c0_38 = arith.constant 0 : index
    %60 = vector.load %arg10[%c0_35, %c0_36, %c0_37, %c0_38] : memref<2x4x32x8xf32, #tpu.memory_space<vmem>>, vector<1x1x32x8xf32>
    %61 = vector.shape_cast %60 : vector<1x1x32x8xf32> to vector<32x8xf32>
    %cst_39 = arith.constant dense<0.000000e+00> : vector<16x8xf32>
    %62 = tpu.matmul %42, %61, %cst_39 {dimension_numbers = #tpu.dot_dimension_numbers<[1], [0], [0], [1], [0, 0, 1, 1], [], []>} : vector<16x32xf32>, vector<32x8xf32>, vector<16x8xf32> -> vector<16x8xf32>
    %c0_40 = arith.constant 0 : index
    %c0_41 = arith.constant 0 : index
    %c0_42 = arith.constant 0 : index
    %c0_43 = arith.constant 0 : index
    %63 = vector.load %arg11[%c0_40, %c0_41, %c0_42, %c0_43] : memref<2x4x1x8xf32, #tpu.memory_space<vmem>>, vector<1x1x1x8xf32>
    %64 = vector.shape_cast %63 : vector<1x1x1x8xf32> to vector<1x8xf32>
    %65 = vector.broadcast %64 : vector<1x8xf32> to vector<16x8xf32>
    %66 = arith.addf %62, %65 : vector<16x8xf32>
    %67 = vector.shape_cast %66 : vector<16x8xf32> to vector<2x8x8xf32>
    "tpu.trace_start"() <{level = 10 : i32, message = "bqd,bkd->bqk"}> : () -> ()
    %cst_44 = arith.constant dense<0.000000e+00> : vector<2x8x8xf32>
    %68 = tpu.matmul %51, %59, %cst_44 {dimension_numbers = #tpu.dot_dimension_numbers<[2], [2], [1], [1], [0, 0, 0, 1, 1, 1], [0], [0]>} : vector<2x8x8xf32>, vector<2x8x8xf32>, vector<2x8x8xf32> -> vector<2x8x8xf32>
    "tpu.trace_stop"() : () -> ()
    %cst_45 = arith.constant 0.353553385 : f32
    %69 = vector.broadcast %cst_45 : f32 to vector<2x8x8xf32>
    %70 = arith.mulf %68, %69 : vector<2x8x8xf32>
    %cst_46 = arith.constant -1.000000e+30 : f32
    %71 = vector.broadcast %cst_46 : f32 to vector<2x8x8xf32>
    %72 = arith.select %18, %70, %71 : vector<2x8x8xi1>, vector<2x8x8xf32>
    %cst_47 = arith.constant dense<0xFF800000> : vector<2x8xf32>
    %73 = vector.multi_reduction <maximumf>, %72, %cst_47 [2] : vector<2x8x8xf32> to vector<2x8xf32>
    %74 = vector.shape_cast %73 : vector<2x8xf32> to vector<2x8x1xf32>
    %75 = vector.broadcast %74 : vector<2x8x1xf32> to vector<2x8x8xf32>
    %76 = arith.subf %72, %75 : vector<2x8x8xf32>
    %77 = math.exp %76 : vector<2x8x8xf32>
    %cst_48 = arith.constant dense<0.000000e+00> : vector<2x8xf32>
    %78 = vector.multi_reduction <add>, %77, %cst_48 [2] : vector<2x8x8xf32> to vector<2x8xf32>
    %79 = vector.shape_cast %78 : vector<2x8xf32> to vector<2x8x1xf32>
    %80 = vector.broadcast %79 : vector<2x8x1xf32> to vector<2x8x8xf32>
    %81 = arith.divf %77, %80 : vector<2x8x8xf32>
    "tpu.trace_start"() <{level = 10 : i32, message = "bqk,bkd->bqd"}> : () -> ()
    %cst_49 = arith.constant dense<0.000000e+00> : vector<2x8x8xf32>
    %82 = tpu.matmul %81, %67, %cst_49 {dimension_numbers = #tpu.dot_dimension_numbers<[2], [1], [1], [2], [0, 0, 0, 1, 1, 2], [0], [0]>} : vector<2x8x8xf32>, vector<2x8x8xf32>, vector<2x8x8xf32> -> vector<2x8x8xf32>
    "tpu.trace_stop"() : () -> ()
    %83 = vector.shape_cast %82 : vector<2x8x8xf32> to vector<16x8xf32>
    %c0_50 = arith.constant 0 : index
    %c0_51 = arith.constant 0 : index
    %c0_52 = arith.constant 0 : index
    %c0_53 = arith.constant 0 : index
    %84 = vector.load %arg12[%c0_50, %c0_51, %c0_52, %c0_53] : memref<2x4x8x32xf32, #tpu.memory_space<vmem>>, vector<1x1x8x32xf32>
    %85 = vector.shape_cast %84 : vector<1x1x8x32xf32> to vector<8x32xf32>
    %cst_54 = arith.constant dense<0.000000e+00> : vector<16x32xf32>
    %86 = tpu.matmul %83, %85, %cst_54 {dimension_numbers = #tpu.dot_dimension_numbers<[1], [0], [0], [1], [0, 0, 1, 1], [], []>} : vector<16x8xf32>, vector<8x32xf32>, vector<16x32xf32> -> vector<16x32xf32>
    %87 = arith.addf %43, %86 : vector<16x32xf32>
    %c0_55 = arith.constant 0 : index
    %c1 = arith.constant 1 : index
    %c0_56 = arith.constant 0 : index
    %c0_57 = arith.constant 0 : index
    %88 = vector.load %arg6[%c0_55, %c1, %c0_56, %c0_57] : memref<2x4x32x8xf32, #tpu.memory_space<vmem>>, vector<1x1x32x8xf32>
    %89 = vector.shape_cast %88 : vector<1x1x32x8xf32> to vector<32x8xf32>
    %cst_58 = arith.constant dense<0.000000e+00> : vector<16x8xf32>
    %90 = tpu.matmul %42, %89, %cst_58 {dimension_numbers = #tpu.dot_dimension_numbers<[1], [0], [0], [1], [0, 0, 1, 1], [], []>} : vector<16x32xf32>, vector<32x8xf32>, vector<16x8xf32> -> vector<16x8xf32>
    %c0_59 = arith.constant 0 : index
    %c1_60 = arith.constant 1 : index
    %c0_61 = arith.constant 0 : index
    %c0_62 = arith.constant 0 : index
    %91 = vector.load %arg7[%c0_59, %c1_60, %c0_61, %c0_62] : memref<2x4x1x8xf32, #tpu.memory_space<vmem>>, vector<1x1x1x8xf32>
    %92 = vector.shape_cast %91 : vector<1x1x1x8xf32> to vector<1x8xf32>
    %93 = vector.broadcast %92 : vector<1x8xf32> to vector<16x8xf32>
    %94 = arith.addf %90, %93 : vector<16x8xf32>
    %95 = vector.shape_cast %94 : vector<16x8xf32> to vector<2x8x8xf32>
    %c0_63 = arith.constant 0 : index
    %c1_64 = arith.constant 1 : index
    %c0_65 = arith.constant 0 : index
    %c0_66 = arith.constant 0 : index
    %96 = vector.load %arg8[%c0_63, %c1_64, %c0_65, %c0_66] : memref<2x4x32x8xf32, #tpu.memory_space<vmem>>, vector<1x1x32x8xf32>
    %97 = vector.shape_cast %96 : vector<1x1x32x8xf32> to vector<32x8xf32>
    %cst_67 = arith.constant dense<0.000000e+00> : vector<16x8xf32>
    %98 = tpu.matmul %42, %97, %cst_67 {dimension_numbers = #tpu.dot_dimension_numbers<[1], [0], [0], [1], [0, 0, 1, 1], [], []>} : vector<16x32xf32>, vector<32x8xf32>, vector<16x8xf32> -> vector<16x8xf32>
    %c0_68 = arith.constant 0 : index
    %c1_69 = arith.constant 1 : index
    %c0_70 = arith.constant 0 : index
    %c0_71 = arith.constant 0 : index
    %99 = vector.load %arg9[%c0_68, %c1_69, %c0_70, %c0_71] : memref<2x4x1x8xf32, #tpu.memory_space<vmem>>, vector<1x1x1x8xf32>
    %100 = vector.shape_cast %99 : vector<1x1x1x8xf32> to vector<1x8xf32>
    %101 = vector.broadcast %100 : vector<1x8xf32> to vector<16x8xf32>
    %102 = arith.addf %98, %101 : vector<16x8xf32>
    %103 = vector.shape_cast %102 : vector<16x8xf32> to vector<2x8x8xf32>
    %c0_72 = arith.constant 0 : index
    %c1_73 = arith.constant 1 : index
    %c0_74 = arith.constant 0 : index
    %c0_75 = arith.constant 0 : index
    %104 = vector.load %arg10[%c0_72, %c1_73, %c0_74, %c0_75] : memref<2x4x32x8xf32, #tpu.memory_space<vmem>>, vector<1x1x32x8xf32>
    %105 = vector.shape_cast %104 : vector<1x1x32x8xf32> to vector<32x8xf32>
    %cst_76 = arith.constant dense<0.000000e+00> : vector<16x8xf32>
    %106 = tpu.matmul %42, %105, %cst_76 {dimension_numbers = #tpu.dot_dimension_numbers<[1], [0], [0], [1], [0, 0, 1, 1], [], []>} : vector<16x32xf32>, vector<32x8xf32>, vector<16x8xf32> -> vector<16x8xf32>
    %c0_77 = arith.constant 0 : index
    %c1_78 = arith.constant 1 : index
    %c0_79 = arith.constant 0 : index
    %c0_80 = arith.constant 0 : index
    %107 = vector.load %arg11[%c0_77, %c1_78, %c0_79, %c0_80] : memref<2x4x1x8xf32, #tpu.memory_space<vmem>>, vector<1x1x1x8xf32>
    %108 = vector.shape_cast %107 : vector<1x1x1x8xf32> to vector<1x8xf32>
    %109 = vector.broadcast %108 : vector<1x8xf32> to vector<16x8xf32>
    %110 = arith.addf %106, %109 : vector<16x8xf32>
    %111 = vector.shape_cast %110 : vector<16x8xf32> to vector<2x8x8xf32>
    "tpu.trace_start"() <{level = 10 : i32, message = "bqd,bkd->bqk"}> : () -> ()
    %cst_81 = arith.constant dense<0.000000e+00> : vector<2x8x8xf32>
    %112 = tpu.matmul %95, %103, %cst_81 {dimension_numbers = #tpu.dot_dimension_numbers<[2], [2], [1], [1], [0, 0, 0, 1, 1, 1], [0], [0]>} : vector<2x8x8xf32>, vector<2x8x8xf32>, vector<2x8x8xf32> -> vector<2x8x8xf32>
    "tpu.trace_stop"() : () -> ()
    %cst_82 = arith.constant 0.353553385 : f32
    %113 = vector.broadcast %cst_82 : f32 to vector<2x8x8xf32>
    %114 = arith.mulf %112, %113 : vector<2x8x8xf32>
    %cst_83 = arith.constant -1.000000e+30 : f32
    %115 = vector.broadcast %cst_83 : f32 to vector<2x8x8xf32>
    %116 = arith.select %18, %114, %115 : vector<2x8x8xi1>, vector<2x8x8xf32>
    %cst_84 = arith.constant dense<0xFF800000> : vector<2x8xf32>
    %117 = vector.multi_reduction <maximumf>, %116, %cst_84 [2] : vector<2x8x8xf32> to vector<2x8xf32>
    %118 = vector.shape_cast %117 : vector<2x8xf32> to vector<2x8x1xf32>
    %119 = vector.broadcast %118 : vector<2x8x1xf32> to vector<2x8x8xf32>
    %120 = arith.subf %116, %119 : vector<2x8x8xf32>
    %121 = math.exp %120 : vector<2x8x8xf32>
    %cst_85 = arith.constant dense<0.000000e+00> : vector<2x8xf32>
    %122 = vector.multi_reduction <add>, %121, %cst_85 [2] : vector<2x8x8xf32> to vector<2x8xf32>
    %123 = vector.shape_cast %122 : vector<2x8xf32> to vector<2x8x1xf32>
    %124 = vector.broadcast %123 : vector<2x8x1xf32> to vector<2x8x8xf32>
    %125 = arith.divf %121, %124 : vector<2x8x8xf32>
    "tpu.trace_start"() <{level = 10 : i32, message = "bqk,bkd->bqd"}> : () -> ()
    %cst_86 = arith.constant dense<0.000000e+00> : vector<2x8x8xf32>
    %126 = tpu.matmul %125, %111, %cst_86 {dimension_numbers = #tpu.dot_dimension_numbers<[2], [1], [1], [2], [0, 0, 0, 1, 1, 2], [0], [0]>} : vector<2x8x8xf32>, vector<2x8x8xf32>, vector<2x8x8xf32> -> vector<2x8x8xf32>
    "tpu.trace_stop"() : () -> ()
    %127 = vector.shape_cast %126 : vector<2x8x8xf32> to vector<16x8xf32>
    %c0_87 = arith.constant 0 : index
    %c1_88 = arith.constant 1 : index
    %c0_89 = arith.constant 0 : index
    %c0_90 = arith.constant 0 : index
    %128 = vector.load %arg12[%c0_87, %c1_88, %c0_89, %c0_90] : memref<2x4x8x32xf32, #tpu.memory_space<vmem>>, vector<1x1x8x32xf32>
    %129 = vector.shape_cast %128 : vector<1x1x8x32xf32> to vector<8x32xf32>
    %cst_91 = arith.constant dense<0.000000e+00> : vector<16x32xf32>
    %130 = tpu.matmul %127, %129, %cst_91 {dimension_numbers = #tpu.dot_dimension_numbers<[1], [0], [0], [1], [0, 0, 1, 1], [], []>} : vector<16x8xf32>, vector<8x32xf32>, vector<16x32xf32> -> vector<16x32xf32>
    %131 = arith.addf %87, %130 : vector<16x32xf32>
    %c0_92 = arith.constant 0 : index
    %c2 = arith.constant 2 : index
    %c0_93 = arith.constant 0 : index
    %c0_94 = arith.constant 0 : index
    %132 = vector.load %arg6[%c0_92, %c2, %c0_93, %c0_94] : memref<2x4x32x8xf32, #tpu.memory_space<vmem>>, vector<1x1x32x8xf32>
    %133 = vector.shape_cast %132 : vector<1x1x32x8xf32> to vector<32x8xf32>
    %cst_95 = arith.constant dense<0.000000e+00> : vector<16x8xf32>
    %134 = tpu.matmul %42, %133, %cst_95 {dimension_numbers = #tpu.dot_dimension_numbers<[1], [0], [0], [1], [0, 0, 1, 1], [], []>} : vector<16x32xf32>, vector<32x8xf32>, vector<16x8xf32> -> vector<16x8xf32>
    %c0_96 = arith.constant 0 : index
    %c2_97 = arith.constant 2 : index
    %c0_98 = arith.constant 0 : index
    %c0_99 = arith.constant 0 : index
    %135 = vector.load %arg7[%c0_96, %c2_97, %c0_98, %c0_99] : memref<2x4x1x8xf32, #tpu.memory_space<vmem>>, vector<1x1x1x8xf32>
    %136 = vector.shape_cast %135 : vector<1x1x1x8xf32> to vector<1x8xf32>
    %137 = vector.broadcast %136 : vector<1x8xf32> to vector<16x8xf32>
    %138 = arith.addf %134, %137 : vector<16x8xf32>
    %139 = vector.shape_cast %138 : vector<16x8xf32> to vector<2x8x8xf32>
    %c0_100 = arith.constant 0 : index
    %c2_101 = arith.constant 2 : index
    %c0_102 = arith.constant 0 : index
    %c0_103 = arith.constant 0 : index
    %140 = vector.load %arg8[%c0_100, %c2_101, %c0_102, %c0_103] : memref<2x4x32x8xf32, #tpu.memory_space<vmem>>, vector<1x1x32x8xf32>
    %141 = vector.shape_cast %140 : vector<1x1x32x8xf32> to vector<32x8xf32>
    %cst_104 = arith.constant dense<0.000000e+00> : vector<16x8xf32>
    %142 = tpu.matmul %42, %141, %cst_104 {dimension_numbers = #tpu.dot_dimension_numbers<[1], [0], [0], [1], [0, 0, 1, 1], [], []>} : vector<16x32xf32>, vector<32x8xf32>, vector<16x8xf32> -> vector<16x8xf32>
    %c0_105 = arith.constant 0 : index
    %c2_106 = arith.constant 2 : index
    %c0_107 = arith.constant 0 : index
    %c0_108 = arith.constant 0 : index
    %143 = vector.load %arg9[%c0_105, %c2_106, %c0_107, %c0_108] : memref<2x4x1x8xf32, #tpu.memory_space<vmem>>, vector<1x1x1x8xf32>
    %144 = vector.shape_cast %143 : vector<1x1x1x8xf32> to vector<1x8xf32>
    %145 = vector.broadcast %144 : vector<1x8xf32> to vector<16x8xf32>
    %146 = arith.addf %142, %145 : vector<16x8xf32>
    %147 = vector.shape_cast %146 : vector<16x8xf32> to vector<2x8x8xf32>
    %c0_109 = arith.constant 0 : index
    %c2_110 = arith.constant 2 : index
    %c0_111 = arith.constant 0 : index
    %c0_112 = arith.constant 0 : index
    %148 = vector.load %arg10[%c0_109, %c2_110, %c0_111, %c0_112] : memref<2x4x32x8xf32, #tpu.memory_space<vmem>>, vector<1x1x32x8xf32>
    %149 = vector.shape_cast %148 : vector<1x1x32x8xf32> to vector<32x8xf32>
    %cst_113 = arith.constant dense<0.000000e+00> : vector<16x8xf32>
    %150 = tpu.matmul %42, %149, %cst_113 {dimension_numbers = #tpu.dot_dimension_numbers<[1], [0], [0], [1], [0, 0, 1, 1], [], []>} : vector<16x32xf32>, vector<32x8xf32>, vector<16x8xf32> -> vector<16x8xf32>
    %c0_114 = arith.constant 0 : index
    %c2_115 = arith.constant 2 : index
    %c0_116 = arith.constant 0 : index
    %c0_117 = arith.constant 0 : index
    %151 = vector.load %arg11[%c0_114, %c2_115, %c0_116, %c0_117] : memref<2x4x1x8xf32, #tpu.memory_space<vmem>>, vector<1x1x1x8xf32>
    %152 = vector.shape_cast %151 : vector<1x1x1x8xf32> to vector<1x8xf32>
    %153 = vector.broadcast %152 : vector<1x8xf32> to vector<16x8xf32>
    %154 = arith.addf %150, %153 : vector<16x8xf32>
    %155 = vector.shape_cast %154 : vector<16x8xf32> to vector<2x8x8xf32>
    "tpu.trace_start"() <{level = 10 : i32, message = "bqd,bkd->bqk"}> : () -> ()
    %cst_118 = arith.constant dense<0.000000e+00> : vector<2x8x8xf32>
    %156 = tpu.matmul %139, %147, %cst_118 {dimension_numbers = #tpu.dot_dimension_numbers<[2], [2], [1], [1], [0, 0, 0, 1, 1, 1], [0], [0]>} : vector<2x8x8xf32>, vector<2x8x8xf32>, vector<2x8x8xf32> -> vector<2x8x8xf32>
    "tpu.trace_stop"() : () -> ()
    %cst_119 = arith.constant 0.353553385 : f32
    %157 = vector.broadcast %cst_119 : f32 to vector<2x8x8xf32>
    %158 = arith.mulf %156, %157 : vector<2x8x8xf32>
    %cst_120 = arith.constant -1.000000e+30 : f32
    %159 = vector.broadcast %cst_120 : f32 to vector<2x8x8xf32>
    %160 = arith.select %18, %158, %159 : vector<2x8x8xi1>, vector<2x8x8xf32>
    %cst_121 = arith.constant dense<0xFF800000> : vector<2x8xf32>
    %161 = vector.multi_reduction <maximumf>, %160, %cst_121 [2] : vector<2x8x8xf32> to vector<2x8xf32>
    %162 = vector.shape_cast %161 : vector<2x8xf32> to vector<2x8x1xf32>
    %163 = vector.broadcast %162 : vector<2x8x1xf32> to vector<2x8x8xf32>
    %164 = arith.subf %160, %163 : vector<2x8x8xf32>
    %165 = math.exp %164 : vector<2x8x8xf32>
    %cst_122 = arith.constant dense<0.000000e+00> : vector<2x8xf32>
    %166 = vector.multi_reduction <add>, %165, %cst_122 [2] : vector<2x8x8xf32> to vector<2x8xf32>
    %167 = vector.shape_cast %166 : vector<2x8xf32> to vector<2x8x1xf32>
    %168 = vector.broadcast %167 : vector<2x8x1xf32> to vector<2x8x8xf32>
    %169 = arith.divf %165, %168 : vector<2x8x8xf32>
    "tpu.trace_start"() <{level = 10 : i32, message = "bqk,bkd->bqd"}> : () -> ()
    %cst_123 = arith.constant dense<0.000000e+00> : vector<2x8x8xf32>
    %170 = tpu.matmul %169, %155, %cst_123 {dimension_numbers = #tpu.dot_dimension_numbers<[2], [1], [1], [2], [0, 0, 0, 1, 1, 2], [0], [0]>} : vector<2x8x8xf32>, vector<2x8x8xf32>, vector<2x8x8xf32> -> vector<2x8x8xf32>
    "tpu.trace_stop"() : () -> ()
    %171 = vector.shape_cast %170 : vector<2x8x8xf32> to vector<16x8xf32>
    %c0_124 = arith.constant 0 : index
    %c2_125 = arith.constant 2 : index
    %c0_126 = arith.constant 0 : index
    %c0_127 = arith.constant 0 : index
    %172 = vector.load %arg12[%c0_124, %c2_125, %c0_126, %c0_127] : memref<2x4x8x32xf32, #tpu.memory_space<vmem>>, vector<1x1x8x32xf32>
    %173 = vector.shape_cast %172 : vector<1x1x8x32xf32> to vector<8x32xf32>
    %cst_128 = arith.constant dense<0.000000e+00> : vector<16x32xf32>
    %174 = tpu.matmul %171, %173, %cst_128 {dimension_numbers = #tpu.dot_dimension_numbers<[1], [0], [0], [1], [0, 0, 1, 1], [], []>} : vector<16x8xf32>, vector<8x32xf32>, vector<16x32xf32> -> vector<16x32xf32>
    %175 = arith.addf %131, %174 : vector<16x32xf32>
    %c0_129 = arith.constant 0 : index
    %c3 = arith.constant 3 : index
    %c0_130 = arith.constant 0 : index
    %c0_131 = arith.constant 0 : index
    %176 = vector.load %arg6[%c0_129, %c3, %c0_130, %c0_131] : memref<2x4x32x8xf32, #tpu.memory_space<vmem>>, vector<1x1x32x8xf32>
    %177 = vector.shape_cast %176 : vector<1x1x32x8xf32> to vector<32x8xf32>
    %cst_132 = arith.constant dense<0.000000e+00> : vector<16x8xf32>
    %178 = tpu.matmul %42, %177, %cst_132 {dimension_numbers = #tpu.dot_dimension_numbers<[1], [0], [0], [1], [0, 0, 1, 1], [], []>} : vector<16x32xf32>, vector<32x8xf32>, vector<16x8xf32> -> vector<16x8xf32>
    %c0_133 = arith.constant 0 : index
    %c3_134 = arith.constant 3 : index
    %c0_135 = arith.constant 0 : index
    %c0_136 = arith.constant 0 : index
    %179 = vector.load %arg7[%c0_133, %c3_134, %c0_135, %c0_136] : memref<2x4x1x8xf32, #tpu.memory_space<vmem>>, vector<1x1x1x8xf32>
    %180 = vector.shape_cast %179 : vector<1x1x1x8xf32> to vector<1x8xf32>
    %181 = vector.broadcast %180 : vector<1x8xf32> to vector<16x8xf32>
    %182 = arith.addf %178, %181 : vector<16x8xf32>
    %183 = vector.shape_cast %182 : vector<16x8xf32> to vector<2x8x8xf32>
    %c0_137 = arith.constant 0 : index
    %c3_138 = arith.constant 3 : index
    %c0_139 = arith.constant 0 : index
    %c0_140 = arith.constant 0 : index
    %184 = vector.load %arg8[%c0_137, %c3_138, %c0_139, %c0_140] : memref<2x4x32x8xf32, #tpu.memory_space<vmem>>, vector<1x1x32x8xf32>
    %185 = vector.shape_cast %184 : vector<1x1x32x8xf32> to vector<32x8xf32>
    %cst_141 = arith.constant dense<0.000000e+00> : vector<16x8xf32>
    %186 = tpu.matmul %42, %185, %cst_141 {dimension_numbers = #tpu.dot_dimension_numbers<[1], [0], [0], [1], [0, 0, 1, 1], [], []>} : vector<16x32xf32>, vector<32x8xf32>, vector<16x8xf32> -> vector<16x8xf32>
    %c0_142 = arith.constant 0 : index
    %c3_143 = arith.constant 3 : index
    %c0_144 = arith.constant 0 : index
    %c0_145 = arith.constant 0 : index
    %187 = vector.load %arg9[%c0_142, %c3_143, %c0_144, %c0_145] : memref<2x4x1x8xf32, #tpu.memory_space<vmem>>, vector<1x1x1x8xf32>
    %188 = vector.shape_cast %187 : vector<1x1x1x8xf32> to vector<1x8xf32>
    %189 = vector.broadcast %188 : vector<1x8xf32> to vector<16x8xf32>
    %190 = arith.addf %186, %189 : vector<16x8xf32>
    %191 = vector.shape_cast %190 : vector<16x8xf32> to vector<2x8x8xf32>
    %c0_146 = arith.constant 0 : index
    %c3_147 = arith.constant 3 : index
    %c0_148 = arith.constant 0 : index
    %c0_149 = arith.constant 0 : index
    %192 = vector.load %arg10[%c0_146, %c3_147, %c0_148, %c0_149] : memref<2x4x32x8xf32, #tpu.memory_space<vmem>>, vector<1x1x32x8xf32>
    %193 = vector.shape_cast %192 : vector<1x1x32x8xf32> to vector<32x8xf32>
    %cst_150 = arith.constant dense<0.000000e+00> : vector<16x8xf32>
    %194 = tpu.matmul %42, %193, %cst_150 {dimension_numbers = #tpu.dot_dimension_numbers<[1], [0], [0], [1], [0, 0, 1, 1], [], []>} : vector<16x32xf32>, vector<32x8xf32>, vector<16x8xf32> -> vector<16x8xf32>
    %c0_151 = arith.constant 0 : index
    %c3_152 = arith.constant 3 : index
    %c0_153 = arith.constant 0 : index
    %c0_154 = arith.constant 0 : index
    %195 = vector.load %arg11[%c0_151, %c3_152, %c0_153, %c0_154] : memref<2x4x1x8xf32, #tpu.memory_space<vmem>>, vector<1x1x1x8xf32>
    %196 = vector.shape_cast %195 : vector<1x1x1x8xf32> to vector<1x8xf32>
    %197 = vector.broadcast %196 : vector<1x8xf32> to vector<16x8xf32>
    %198 = arith.addf %194, %197 : vector<16x8xf32>
    %199 = vector.shape_cast %198 : vector<16x8xf32> to vector<2x8x8xf32>
    "tpu.trace_start"() <{level = 10 : i32, message = "bqd,bkd->bqk"}> : () -> ()
    %cst_155 = arith.constant dense<0.000000e+00> : vector<2x8x8xf32>
    %200 = tpu.matmul %183, %191, %cst_155 {dimension_numbers = #tpu.dot_dimension_numbers<[2], [2], [1], [1], [0, 0, 0, 1, 1, 1], [0], [0]>} : vector<2x8x8xf32>, vector<2x8x8xf32>, vector<2x8x8xf32> -> vector<2x8x8xf32>
    "tpu.trace_stop"() : () -> ()
    %cst_156 = arith.constant 0.353553385 : f32
    %201 = vector.broadcast %cst_156 : f32 to vector<2x8x8xf32>
    %202 = arith.mulf %200, %201 : vector<2x8x8xf32>
    %cst_157 = arith.constant -1.000000e+30 : f32
    %203 = vector.broadcast %cst_157 : f32 to vector<2x8x8xf32>
    %204 = arith.select %18, %202, %203 : vector<2x8x8xi1>, vector<2x8x8xf32>
    %cst_158 = arith.constant dense<0xFF800000> : vector<2x8xf32>
    %205 = vector.multi_reduction <maximumf>, %204, %cst_158 [2] : vector<2x8x8xf32> to vector<2x8xf32>
    %206 = vector.shape_cast %205 : vector<2x8xf32> to vector<2x8x1xf32>
    %207 = vector.broadcast %206 : vector<2x8x1xf32> to vector<2x8x8xf32>
    %208 = arith.subf %204, %207 : vector<2x8x8xf32>
    %209 = math.exp %208 : vector<2x8x8xf32>
    %cst_159 = arith.constant dense<0.000000e+00> : vector<2x8xf32>
    %210 = vector.multi_reduction <add>, %209, %cst_159 [2] : vector<2x8x8xf32> to vector<2x8xf32>
    %211 = vector.shape_cast %210 : vector<2x8xf32> to vector<2x8x1xf32>
    %212 = vector.broadcast %211 : vector<2x8x1xf32> to vector<2x8x8xf32>
    %213 = arith.divf %209, %212 : vector<2x8x8xf32>
    "tpu.trace_start"() <{level = 10 : i32, message = "bqk,bkd->bqd"}> : () -> ()
    %cst_160 = arith.constant dense<0.000000e+00> : vector<2x8x8xf32>
    %214 = tpu.matmul %213, %199, %cst_160 {dimension_numbers = #tpu.dot_dimension_numbers<[2], [1], [1], [2], [0, 0, 0, 1, 1, 2], [0], [0]>} : vector<2x8x8xf32>, vector<2x8x8xf32>, vector<2x8x8xf32> -> vector<2x8x8xf32>
    "tpu.trace_stop"() : () -> ()
    %215 = vector.shape_cast %214 : vector<2x8x8xf32> to vector<16x8xf32>
    %c0_161 = arith.constant 0 : index
    %c3_162 = arith.constant 3 : index
    %c0_163 = arith.constant 0 : index
    %c0_164 = arith.constant 0 : index
    %216 = vector.load %arg12[%c0_161, %c3_162, %c0_163, %c0_164] : memref<2x4x8x32xf32, #tpu.memory_space<vmem>>, vector<1x1x8x32xf32>
    %217 = vector.shape_cast %216 : vector<1x1x8x32xf32> to vector<8x32xf32>
    %cst_165 = arith.constant dense<0.000000e+00> : vector<16x32xf32>
    %218 = tpu.matmul %215, %217, %cst_165 {dimension_numbers = #tpu.dot_dimension_numbers<[1], [0], [0], [1], [0, 0, 1, 1], [], []>} : vector<16x8xf32>, vector<8x32xf32>, vector<16x32xf32> -> vector<16x32xf32>
    %219 = arith.addf %175, %218 : vector<16x32xf32>
    %220 = arith.addf %15, %219 : vector<16x32xf32>
    %c0_166 = arith.constant 0 : index
    %c0_167 = arith.constant 0 : index
    %c0_168 = arith.constant 0 : index
    %221 = vector.load %arg13[%c0_166, %c0_167, %c0_168] : memref<2x1x32xf32, #tpu.memory_space<vmem>>, vector<1x1x32xf32>
    %222 = vector.shape_cast %221 : vector<1x1x32xf32> to vector<1x32xf32>
    %223 = vector.broadcast %222 : vector<1x32xf32> to vector<16x32xf32>
    %224 = arith.addf %220, %223 : vector<16x32xf32>
    %c0_169 = arith.constant 0 : index
    %c0_170 = arith.constant 0 : index
    %c0_171 = arith.constant 0 : index
    %225 = vector.load %arg14[%c0_169, %c0_170, %c0_171] : memref<2x1x32xf32, #tpu.memory_space<vmem>>, vector<1x1x32xf32>
    %226 = vector.shape_cast %225 : vector<1x1x32xf32> to vector<1x32xf32>
    %c0_172 = arith.constant 0 : index
    %c0_173 = arith.constant 0 : index
    %c0_174 = arith.constant 0 : index
    %227 = vector.load %arg15[%c0_172, %c0_173, %c0_174] : memref<2x1x32xf32, #tpu.memory_space<vmem>>, vector<1x1x32xf32>
    %228 = vector.shape_cast %227 : vector<1x1x32xf32> to vector<1x32xf32>
    %cst_175 = arith.constant dense<0.000000e+00> : vector<16xf32>
    %229 = vector.multi_reduction <add>, %224, %cst_175 [1] : vector<16x32xf32> to vector<16xf32>
    %230 = vector.shape_cast %229 : vector<16xf32> to vector<16x1xf32>
    %cst_176 = arith.constant 3.200000e+01 : f32
    %231 = vector.broadcast %cst_176 : f32 to vector<16x1xf32>
    %232 = arith.divf %230, %231 : vector<16x1xf32>
    %233 = vector.broadcast %232 : vector<16x1xf32> to vector<16x32xf32>
    %234 = arith.subf %224, %233 : vector<16x32xf32>
    %235 = arith.mulf %234, %234 : vector<16x32xf32>
    %cst_177 = arith.constant dense<0.000000e+00> : vector<16xf32>
    %236 = vector.multi_reduction <add>, %235, %cst_177 [1] : vector<16x32xf32> to vector<16xf32>
    %237 = vector.shape_cast %236 : vector<16xf32> to vector<16x1xf32>
    %cst_178 = arith.constant 3.200000e+01 : f32
    %238 = vector.broadcast %cst_178 : f32 to vector<16x1xf32>
    %239 = arith.divf %237, %238 : vector<16x1xf32>
    %cst_179 = arith.constant 9.99999974E-6 : f32
    %240 = vector.broadcast %cst_179 : f32 to vector<16x1xf32>
    %241 = arith.addf %239, %240 : vector<16x1xf32>
    %242 = math.rsqrt %241 : vector<16x1xf32>
    %243 = vector.broadcast %242 : vector<16x1xf32> to vector<16x32xf32>
    %244 = arith.mulf %234, %243 : vector<16x32xf32>
    %245 = vector.broadcast %226 : vector<1x32xf32> to vector<16x32xf32>
    %246 = arith.mulf %244, %245 : vector<16x32xf32>
    %247 = vector.broadcast %228 : vector<1x32xf32> to vector<16x32xf32>
    %248 = arith.addf %246, %247 : vector<16x32xf32>
    %c0_180 = arith.constant 0 : index
    %c0_181 = arith.constant 0 : index
    %c0_182 = arith.constant 0 : index
    %249 = vector.load %arg16[%c0_180, %c0_181, %c0_182] : memref<2x32x128xf32, #tpu.memory_space<vmem>>, vector<1x32x128xf32>
    %250 = vector.shape_cast %249 : vector<1x32x128xf32> to vector<32x128xf32>
    %cst_183 = arith.constant dense<0.000000e+00> : vector<16x128xf32>
    %251 = tpu.matmul %248, %250, %cst_183 {dimension_numbers = #tpu.dot_dimension_numbers<[1], [0], [0], [1], [0, 0, 1, 1], [], []>} : vector<16x32xf32>, vector<32x128xf32>, vector<16x128xf32> -> vector<16x128xf32>
    %c0_184 = arith.constant 0 : index
    %c0_185 = arith.constant 0 : index
    %c0_186 = arith.constant 0 : index
    %252 = vector.load %arg17[%c0_184, %c0_185, %c0_186] : memref<2x1x128xf32, #tpu.memory_space<vmem>>, vector<1x1x128xf32>
    %253 = vector.shape_cast %252 : vector<1x1x128xf32> to vector<1x128xf32>
    %254 = vector.broadcast %253 : vector<1x128xf32> to vector<16x128xf32>
    %255 = arith.addf %251, %254 : vector<16x128xf32>
    %cst_187 = arith.constant 5.000000e-01 : f32
    %256 = vector.broadcast %cst_187 : f32 to vector<16x128xf32>
    %257 = arith.mulf %256, %255 : vector<16x128xf32>
    %cst_188 = arith.constant 0.707106769 : f32
    %258 = vector.broadcast %cst_188 : f32 to vector<16x128xf32>
    %259 = arith.mulf %255, %258 : vector<16x128xf32>
    %cst_189 = arith.constant 0.000000e+00 : f32
    %260 = vector.broadcast %cst_189 : f32 to vector<16x128xf32>
    %261 = arith.cmpf oge, %259, %260 : vector<16x128xf32>
    %cst_190 = arith.constant 1.000000e+00 : f32
    %cst_191 = arith.constant -1.000000e+00 : f32
    %262 = vector.broadcast %cst_190 : f32 to vector<16x128xf32>
    %263 = vector.broadcast %cst_191 : f32 to vector<16x128xf32>
    %264 = arith.select %261, %262, %263 : vector<16x128xi1>, vector<16x128xf32>
    %265 = math.absf %259 : vector<16x128xf32>
    %cst_192 = arith.constant 0.327591091 : f32
    %266 = vector.broadcast %cst_192 : f32 to vector<16x128xf32>
    %267 = arith.mulf %266, %265 : vector<16x128xf32>
    %cst_193 = arith.constant 1.000000e+00 : f32
    %268 = vector.broadcast %cst_193 : f32 to vector<16x128xf32>
    %269 = arith.addf %268, %267 : vector<16x128xf32>
    %cst_194 = arith.constant 1.000000e+00 : f32
    %270 = vector.broadcast %cst_194 : f32 to vector<16x128xf32>
    %271 = arith.divf %270, %269 : vector<16x128xf32>
    %cst_195 = arith.constant 1.06140542 : f32
    %272 = vector.broadcast %cst_195 : f32 to vector<16x128xf32>
    %273 = arith.mulf %272, %271 : vector<16x128xf32>
    %cst_196 = arith.constant -1.45315206 : f32
    %274 = vector.broadcast %cst_196 : f32 to vector<16x128xf32>
    %275 = arith.addf %273, %274 : vector<16x128xf32>
    %276 = arith.mulf %275, %271 : vector<16x128xf32>
    %cst_197 = arith.constant 1.42141378 : f32
    %277 = vector.broadcast %cst_197 : f32 to vector<16x128xf32>
    %278 = arith.addf %276, %277 : vector<16x128xf32>
    %279 = arith.mulf %278, %271 : vector<16x128xf32>
    %cst_198 = arith.constant -0.284496725 : f32
    %280 = vector.broadcast %cst_198 : f32 to vector<16x128xf32>
    %281 = arith.addf %279, %280 : vector<16x128xf32>
    %282 = arith.mulf %281, %271 : vector<16x128xf32>
    %cst_199 = arith.constant 0.254829586 : f32
    %283 = vector.broadcast %cst_199 : f32 to vector<16x128xf32>
    %284 = arith.addf %282, %283 : vector<16x128xf32>
    %285 = arith.mulf %284, %271 : vector<16x128xf32>
    %cst_200 = arith.constant 0.000000e+00 : f32
    %286 = vector.broadcast %cst_200 : f32 to vector<16x128xf32>
    %287 = arith.subf %286, %265 : vector<16x128xf32>
    %288 = arith.mulf %287, %265 : vector<16x128xf32>
    %289 = math.exp %288 : vector<16x128xf32>
    %290 = arith.mulf %285, %289 : vector<16x128xf32>
    %cst_201 = arith.constant 1.000000e+00 : f32
    %291 = vector.broadcast %cst_201 : f32 to vector<16x128xf32>
    %292 = arith.subf %291, %290 : vector<16x128xf32>
    %293 = arith.mulf %264, %292 : vector<16x128xf32>
    %cst_202 = arith.constant 1.000000e+00 : f32
    %294 = vector.broadcast %cst_202 : f32 to vector<16x128xf32>
    %295 = arith.addf %294, %293 : vector<16x128xf32>
    %296 = arith.mulf %257, %295 : vector<16x128xf32>
    %c0_203 = arith.constant 0 : index
    %c0_204 = arith.constant 0 : index
    %c0_205 = arith.constant 0 : index
    %297 = vector.load %arg18[%c0_203, %c0_204, %c0_205] : memref<2x128x32xf32, #tpu.memory_space<vmem>>, vector<1x128x32xf32>
    %298 = vector.shape_cast %297 : vector<1x128x32xf32> to vector<128x32xf32>
    %cst_206 = arith.constant dense<0.000000e+00> : vector<16x32xf32>
    %299 = tpu.matmul %296, %298, %cst_206 {dimension_numbers = #tpu.dot_dimension_numbers<[1], [0], [0], [1], [0, 0, 1, 1], [], []>} : vector<16x128xf32>, vector<128x32xf32>, vector<16x32xf32> -> vector<16x32xf32>
    %c0_207 = arith.constant 0 : index
    %c0_208 = arith.constant 0 : index
    %c0_209 = arith.constant 0 : index
    %300 = vector.load %arg19[%c0_207, %c0_208, %c0_209] : memref<2x1x32xf32, #tpu.memory_space<vmem>>, vector<1x1x32xf32>
    %301 = vector.shape_cast %300 : vector<1x1x32xf32> to vector<1x32xf32>
    %302 = vector.broadcast %301 : vector<1x32xf32> to vector<16x32xf32>
    %303 = arith.addf %299, %302 : vector<16x32xf32>
    %304 = arith.addf %224, %303 : vector<16x32xf32>
    %c1_210 = arith.constant 1 : index
    %c0_211 = arith.constant 0 : index
    %c0_212 = arith.constant 0 : index
    %305 = vector.load %arg4[%c1_210, %c0_211, %c0_212] : memref<2x1x32xf32, #tpu.memory_space<vmem>>, vector<1x1x32xf32>
    %306 = vector.shape_cast %305 : vector<1x1x32xf32> to vector<1x32xf32>
    %c1_213 = arith.constant 1 : index
    %c0_214 = arith.constant 0 : index
    %c0_215 = arith.constant 0 : index
    %307 = vector.load %arg5[%c1_213, %c0_214, %c0_215] : memref<2x1x32xf32, #tpu.memory_space<vmem>>, vector<1x1x32xf32>
    %308 = vector.shape_cast %307 : vector<1x1x32xf32> to vector<1x32xf32>
    %cst_216 = arith.constant dense<0.000000e+00> : vector<16xf32>
    %309 = vector.multi_reduction <add>, %304, %cst_216 [1] : vector<16x32xf32> to vector<16xf32>
    %310 = vector.shape_cast %309 : vector<16xf32> to vector<16x1xf32>
    %cst_217 = arith.constant 3.200000e+01 : f32
    %311 = vector.broadcast %cst_217 : f32 to vector<16x1xf32>
    %312 = arith.divf %310, %311 : vector<16x1xf32>
    %313 = vector.broadcast %312 : vector<16x1xf32> to vector<16x32xf32>
    %314 = arith.subf %304, %313 : vector<16x32xf32>
    %315 = arith.mulf %314, %314 : vector<16x32xf32>
    %cst_218 = arith.constant dense<0.000000e+00> : vector<16xf32>
    %316 = vector.multi_reduction <add>, %315, %cst_218 [1] : vector<16x32xf32> to vector<16xf32>
    %317 = vector.shape_cast %316 : vector<16xf32> to vector<16x1xf32>
    %cst_219 = arith.constant 3.200000e+01 : f32
    %318 = vector.broadcast %cst_219 : f32 to vector<16x1xf32>
    %319 = arith.divf %317, %318 : vector<16x1xf32>
    %cst_220 = arith.constant 9.99999974E-6 : f32
    %320 = vector.broadcast %cst_220 : f32 to vector<16x1xf32>
    %321 = arith.addf %319, %320 : vector<16x1xf32>
    %322 = math.rsqrt %321 : vector<16x1xf32>
    %323 = vector.broadcast %322 : vector<16x1xf32> to vector<16x32xf32>
    %324 = arith.mulf %314, %323 : vector<16x32xf32>
    %325 = vector.broadcast %306 : vector<1x32xf32> to vector<16x32xf32>
    %326 = arith.mulf %324, %325 : vector<16x32xf32>
    %327 = vector.broadcast %308 : vector<1x32xf32> to vector<16x32xf32>
    %328 = arith.addf %326, %327 : vector<16x32xf32>
    %cst_221 = arith.constant 0.000000e+00 : f32
    %329 = vector.broadcast %cst_221 : f32 to vector<16x32xf32>
    %c1_222 = arith.constant 1 : index
    %c0_223 = arith.constant 0 : index
    %c0_224 = arith.constant 0 : index
    %c0_225 = arith.constant 0 : index
    %330 = vector.load %arg6[%c1_222, %c0_223, %c0_224, %c0_225] : memref<2x4x32x8xf32, #tpu.memory_space<vmem>>, vector<1x1x32x8xf32>
    %331 = vector.shape_cast %330 : vector<1x1x32x8xf32> to vector<32x8xf32>
    %cst_226 = arith.constant dense<0.000000e+00> : vector<16x8xf32>
    %332 = tpu.matmul %328, %331, %cst_226 {dimension_numbers = #tpu.dot_dimension_numbers<[1], [0], [0], [1], [0, 0, 1, 1], [], []>} : vector<16x32xf32>, vector<32x8xf32>, vector<16x8xf32> -> vector<16x8xf32>
    %c1_227 = arith.constant 1 : index
    %c0_228 = arith.constant 0 : index
    %c0_229 = arith.constant 0 : index
    %c0_230 = arith.constant 0 : index
    %333 = vector.load %arg7[%c1_227, %c0_228, %c0_229, %c0_230] : memref<2x4x1x8xf32, #tpu.memory_space<vmem>>, vector<1x1x1x8xf32>
    %334 = vector.shape_cast %333 : vector<1x1x1x8xf32> to vector<1x8xf32>
    %335 = vector.broadcast %334 : vector<1x8xf32> to vector<16x8xf32>
    %336 = arith.addf %332, %335 : vector<16x8xf32>
    %337 = vector.shape_cast %336 : vector<16x8xf32> to vector<2x8x8xf32>
    %c1_231 = arith.constant 1 : index
    %c0_232 = arith.constant 0 : index
    %c0_233 = arith.constant 0 : index
    %c0_234 = arith.constant 0 : index
    %338 = vector.load %arg8[%c1_231, %c0_232, %c0_233, %c0_234] : memref<2x4x32x8xf32, #tpu.memory_space<vmem>>, vector<1x1x32x8xf32>
    %339 = vector.shape_cast %338 : vector<1x1x32x8xf32> to vector<32x8xf32>
    %cst_235 = arith.constant dense<0.000000e+00> : vector<16x8xf32>
    %340 = tpu.matmul %328, %339, %cst_235 {dimension_numbers = #tpu.dot_dimension_numbers<[1], [0], [0], [1], [0, 0, 1, 1], [], []>} : vector<16x32xf32>, vector<32x8xf32>, vector<16x8xf32> -> vector<16x8xf32>
    %c1_236 = arith.constant 1 : index
    %c0_237 = arith.constant 0 : index
    %c0_238 = arith.constant 0 : index
    %c0_239 = arith.constant 0 : index
    %341 = vector.load %arg9[%c1_236, %c0_237, %c0_238, %c0_239] : memref<2x4x1x8xf32, #tpu.memory_space<vmem>>, vector<1x1x1x8xf32>
    %342 = vector.shape_cast %341 : vector<1x1x1x8xf32> to vector<1x8xf32>
    %343 = vector.broadcast %342 : vector<1x8xf32> to vector<16x8xf32>
    %344 = arith.addf %340, %343 : vector<16x8xf32>
    %345 = vector.shape_cast %344 : vector<16x8xf32> to vector<2x8x8xf32>
    %c1_240 = arith.constant 1 : index
    %c0_241 = arith.constant 0 : index
    %c0_242 = arith.constant 0 : index
    %c0_243 = arith.constant 0 : index
    %346 = vector.load %arg10[%c1_240, %c0_241, %c0_242, %c0_243] : memref<2x4x32x8xf32, #tpu.memory_space<vmem>>, vector<1x1x32x8xf32>
    %347 = vector.shape_cast %346 : vector<1x1x32x8xf32> to vector<32x8xf32>
    %cst_244 = arith.constant dense<0.000000e+00> : vector<16x8xf32>
    %348 = tpu.matmul %328, %347, %cst_244 {dimension_numbers = #tpu.dot_dimension_numbers<[1], [0], [0], [1], [0, 0, 1, 1], [], []>} : vector<16x32xf32>, vector<32x8xf32>, vector<16x8xf32> -> vector<16x8xf32>
    %c1_245 = arith.constant 1 : index
    %c0_246 = arith.constant 0 : index
    %c0_247 = arith.constant 0 : index
    %c0_248 = arith.constant 0 : index
    %349 = vector.load %arg11[%c1_245, %c0_246, %c0_247, %c0_248] : memref<2x4x1x8xf32, #tpu.memory_space<vmem>>, vector<1x1x1x8xf32>
    %350 = vector.shape_cast %349 : vector<1x1x1x8xf32> to vector<1x8xf32>
    %351 = vector.broadcast %350 : vector<1x8xf32> to vector<16x8xf32>
    %352 = arith.addf %348, %351 : vector<16x8xf32>
    %353 = vector.shape_cast %352 : vector<16x8xf32> to vector<2x8x8xf32>
    "tpu.trace_start"() <{level = 10 : i32, message = "bqd,bkd->bqk"}> : () -> ()
    %cst_249 = arith.constant dense<0.000000e+00> : vector<2x8x8xf32>
    %354 = tpu.matmul %337, %345, %cst_249 {dimension_numbers = #tpu.dot_dimension_numbers<[2], [2], [1], [1], [0, 0, 0, 1, 1, 1], [0], [0]>} : vector<2x8x8xf32>, vector<2x8x8xf32>, vector<2x8x8xf32> -> vector<2x8x8xf32>
    "tpu.trace_stop"() : () -> ()
    %cst_250 = arith.constant 0.353553385 : f32
    %355 = vector.broadcast %cst_250 : f32 to vector<2x8x8xf32>
    %356 = arith.mulf %354, %355 : vector<2x8x8xf32>
    %cst_251 = arith.constant -1.000000e+30 : f32
    %357 = vector.broadcast %cst_251 : f32 to vector<2x8x8xf32>
    %358 = arith.select %18, %356, %357 : vector<2x8x8xi1>, vector<2x8x8xf32>
    %cst_252 = arith.constant dense<0xFF800000> : vector<2x8xf32>
    %359 = vector.multi_reduction <maximumf>, %358, %cst_252 [2] : vector<2x8x8xf32> to vector<2x8xf32>
    %360 = vector.shape_cast %359 : vector<2x8xf32> to vector<2x8x1xf32>
    %361 = vector.broadcast %360 : vector<2x8x1xf32> to vector<2x8x8xf32>
    %362 = arith.subf %358, %361 : vector<2x8x8xf32>
    %363 = math.exp %362 : vector<2x8x8xf32>
    %cst_253 = arith.constant dense<0.000000e+00> : vector<2x8xf32>
    %364 = vector.multi_reduction <add>, %363, %cst_253 [2] : vector<2x8x8xf32> to vector<2x8xf32>
    %365 = vector.shape_cast %364 : vector<2x8xf32> to vector<2x8x1xf32>
    %366 = vector.broadcast %365 : vector<2x8x1xf32> to vector<2x8x8xf32>
    %367 = arith.divf %363, %366 : vector<2x8x8xf32>
    "tpu.trace_start"() <{level = 10 : i32, message = "bqk,bkd->bqd"}> : () -> ()
    %cst_254 = arith.constant dense<0.000000e+00> : vector<2x8x8xf32>
    %368 = tpu.matmul %367, %353, %cst_254 {dimension_numbers = #tpu.dot_dimension_numbers<[2], [1], [1], [2], [0, 0, 0, 1, 1, 2], [0], [0]>} : vector<2x8x8xf32>, vector<2x8x8xf32>, vector<2x8x8xf32> -> vector<2x8x8xf32>
    "tpu.trace_stop"() : () -> ()
    %369 = vector.shape_cast %368 : vector<2x8x8xf32> to vector<16x8xf32>
    %c1_255 = arith.constant 1 : index
    %c0_256 = arith.constant 0 : index
    %c0_257 = arith.constant 0 : index
    %c0_258 = arith.constant 0 : index
    %370 = vector.load %arg12[%c1_255, %c0_256, %c0_257, %c0_258] : memref<2x4x8x32xf32, #tpu.memory_space<vmem>>, vector<1x1x8x32xf32>
    %371 = vector.shape_cast %370 : vector<1x1x8x32xf32> to vector<8x32xf32>
    %cst_259 = arith.constant dense<0.000000e+00> : vector<16x32xf32>
    %372 = tpu.matmul %369, %371, %cst_259 {dimension_numbers = #tpu.dot_dimension_numbers<[1], [0], [0], [1], [0, 0, 1, 1], [], []>} : vector<16x8xf32>, vector<8x32xf32>, vector<16x32xf32> -> vector<16x32xf32>
    %373 = arith.addf %329, %372 : vector<16x32xf32>
    %c1_260 = arith.constant 1 : index
    %c1_261 = arith.constant 1 : index
    %c0_262 = arith.constant 0 : index
    %c0_263 = arith.constant 0 : index
    %374 = vector.load %arg6[%c1_260, %c1_261, %c0_262, %c0_263] : memref<2x4x32x8xf32, #tpu.memory_space<vmem>>, vector<1x1x32x8xf32>
    %375 = vector.shape_cast %374 : vector<1x1x32x8xf32> to vector<32x8xf32>
    %cst_264 = arith.constant dense<0.000000e+00> : vector<16x8xf32>
    %376 = tpu.matmul %328, %375, %cst_264 {dimension_numbers = #tpu.dot_dimension_numbers<[1], [0], [0], [1], [0, 0, 1, 1], [], []>} : vector<16x32xf32>, vector<32x8xf32>, vector<16x8xf32> -> vector<16x8xf32>
    %c1_265 = arith.constant 1 : index
    %c1_266 = arith.constant 1 : index
    %c0_267 = arith.constant 0 : index
    %c0_268 = arith.constant 0 : index
    %377 = vector.load %arg7[%c1_265, %c1_266, %c0_267, %c0_268] : memref<2x4x1x8xf32, #tpu.memory_space<vmem>>, vector<1x1x1x8xf32>
    %378 = vector.shape_cast %377 : vector<1x1x1x8xf32> to vector<1x8xf32>
    %379 = vector.broadcast %378 : vector<1x8xf32> to vector<16x8xf32>
    %380 = arith.addf %376, %379 : vector<16x8xf32>
    %381 = vector.shape_cast %380 : vector<16x8xf32> to vector<2x8x8xf32>
    %c1_269 = arith.constant 1 : index
    %c1_270 = arith.constant 1 : index
    %c0_271 = arith.constant 0 : index
    %c0_272 = arith.constant 0 : index
    %382 = vector.load %arg8[%c1_269, %c1_270, %c0_271, %c0_272] : memref<2x4x32x8xf32, #tpu.memory_space<vmem>>, vector<1x1x32x8xf32>
    %383 = vector.shape_cast %382 : vector<1x1x32x8xf32> to vector<32x8xf32>
    %cst_273 = arith.constant dense<0.000000e+00> : vector<16x8xf32>
    %384 = tpu.matmul %328, %383, %cst_273 {dimension_numbers = #tpu.dot_dimension_numbers<[1], [0], [0], [1], [0, 0, 1, 1], [], []>} : vector<16x32xf32>, vector<32x8xf32>, vector<16x8xf32> -> vector<16x8xf32>
    %c1_274 = arith.constant 1 : index
    %c1_275 = arith.constant 1 : index
    %c0_276 = arith.constant 0 : index
    %c0_277 = arith.constant 0 : index
    %385 = vector.load %arg9[%c1_274, %c1_275, %c0_276, %c0_277] : memref<2x4x1x8xf32, #tpu.memory_space<vmem>>, vector<1x1x1x8xf32>
    %386 = vector.shape_cast %385 : vector<1x1x1x8xf32> to vector<1x8xf32>
    %387 = vector.broadcast %386 : vector<1x8xf32> to vector<16x8xf32>
    %388 = arith.addf %384, %387 : vector<16x8xf32>
    %389 = vector.shape_cast %388 : vector<16x8xf32> to vector<2x8x8xf32>
    %c1_278 = arith.constant 1 : index
    %c1_279 = arith.constant 1 : index
    %c0_280 = arith.constant 0 : index
    %c0_281 = arith.constant 0 : index
    %390 = vector.load %arg10[%c1_278, %c1_279, %c0_280, %c0_281] : memref<2x4x32x8xf32, #tpu.memory_space<vmem>>, vector<1x1x32x8xf32>
    %391 = vector.shape_cast %390 : vector<1x1x32x8xf32> to vector<32x8xf32>
    %cst_282 = arith.constant dense<0.000000e+00> : vector<16x8xf32>
    %392 = tpu.matmul %328, %391, %cst_282 {dimension_numbers = #tpu.dot_dimension_numbers<[1], [0], [0], [1], [0, 0, 1, 1], [], []>} : vector<16x32xf32>, vector<32x8xf32>, vector<16x8xf32> -> vector<16x8xf32>
    %c1_283 = arith.constant 1 : index
    %c1_284 = arith.constant 1 : index
    %c0_285 = arith.constant 0 : index
    %c0_286 = arith.constant 0 : index
    %393 = vector.load %arg11[%c1_283, %c1_284, %c0_285, %c0_286] : memref<2x4x1x8xf32, #tpu.memory_space<vmem>>, vector<1x1x1x8xf32>
    %394 = vector.shape_cast %393 : vector<1x1x1x8xf32> to vector<1x8xf32>
    %395 = vector.broadcast %394 : vector<1x8xf32> to vector<16x8xf32>
    %396 = arith.addf %392, %395 : vector<16x8xf32>
    %397 = vector.shape_cast %396 : vector<16x8xf32> to vector<2x8x8xf32>
    "tpu.trace_start"() <{level = 10 : i32, message = "bqd,bkd->bqk"}> : () -> ()
    %cst_287 = arith.constant dense<0.000000e+00> : vector<2x8x8xf32>
    %398 = tpu.matmul %381, %389, %cst_287 {dimension_numbers = #tpu.dot_dimension_numbers<[2], [2], [1], [1], [0, 0, 0, 1, 1, 1], [0], [0]>} : vector<2x8x8xf32>, vector<2x8x8xf32>, vector<2x8x8xf32> -> vector<2x8x8xf32>
    "tpu.trace_stop"() : () -> ()
    %cst_288 = arith.constant 0.353553385 : f32
    %399 = vector.broadcast %cst_288 : f32 to vector<2x8x8xf32>
    %400 = arith.mulf %398, %399 : vector<2x8x8xf32>
    %cst_289 = arith.constant -1.000000e+30 : f32
    %401 = vector.broadcast %cst_289 : f32 to vector<2x8x8xf32>
    %402 = arith.select %18, %400, %401 : vector<2x8x8xi1>, vector<2x8x8xf32>
    %cst_290 = arith.constant dense<0xFF800000> : vector<2x8xf32>
    %403 = vector.multi_reduction <maximumf>, %402, %cst_290 [2] : vector<2x8x8xf32> to vector<2x8xf32>
    %404 = vector.shape_cast %403 : vector<2x8xf32> to vector<2x8x1xf32>
    %405 = vector.broadcast %404 : vector<2x8x1xf32> to vector<2x8x8xf32>
    %406 = arith.subf %402, %405 : vector<2x8x8xf32>
    %407 = math.exp %406 : vector<2x8x8xf32>
    %cst_291 = arith.constant dense<0.000000e+00> : vector<2x8xf32>
    %408 = vector.multi_reduction <add>, %407, %cst_291 [2] : vector<2x8x8xf32> to vector<2x8xf32>
    %409 = vector.shape_cast %408 : vector<2x8xf32> to vector<2x8x1xf32>
    %410 = vector.broadcast %409 : vector<2x8x1xf32> to vector<2x8x8xf32>
    %411 = arith.divf %407, %410 : vector<2x8x8xf32>
    "tpu.trace_start"() <{level = 10 : i32, message = "bqk,bkd->bqd"}> : () -> ()
    %cst_292 = arith.constant dense<0.000000e+00> : vector<2x8x8xf32>
    %412 = tpu.matmul %411, %397, %cst_292 {dimension_numbers = #tpu.dot_dimension_numbers<[2], [1], [1], [2], [0, 0, 0, 1, 1, 2], [0], [0]>} : vector<2x8x8xf32>, vector<2x8x8xf32>, vector<2x8x8xf32> -> vector<2x8x8xf32>
    "tpu.trace_stop"() : () -> ()
    %413 = vector.shape_cast %412 : vector<2x8x8xf32> to vector<16x8xf32>
    %c1_293 = arith.constant 1 : index
    %c1_294 = arith.constant 1 : index
    %c0_295 = arith.constant 0 : index
    %c0_296 = arith.constant 0 : index
    %414 = vector.load %arg12[%c1_293, %c1_294, %c0_295, %c0_296] : memref<2x4x8x32xf32, #tpu.memory_space<vmem>>, vector<1x1x8x32xf32>
    %415 = vector.shape_cast %414 : vector<1x1x8x32xf32> to vector<8x32xf32>
    %cst_297 = arith.constant dense<0.000000e+00> : vector<16x32xf32>
    %416 = tpu.matmul %413, %415, %cst_297 {dimension_numbers = #tpu.dot_dimension_numbers<[1], [0], [0], [1], [0, 0, 1, 1], [], []>} : vector<16x8xf32>, vector<8x32xf32>, vector<16x32xf32> -> vector<16x32xf32>
    %417 = arith.addf %373, %416 : vector<16x32xf32>
    %c1_298 = arith.constant 1 : index
    %c2_299 = arith.constant 2 : index
    %c0_300 = arith.constant 0 : index
    %c0_301 = arith.constant 0 : index
    %418 = vector.load %arg6[%c1_298, %c2_299, %c0_300, %c0_301] : memref<2x4x32x8xf32, #tpu.memory_space<vmem>>, vector<1x1x32x8xf32>
    %419 = vector.shape_cast %418 : vector<1x1x32x8xf32> to vector<32x8xf32>
    %cst_302 = arith.constant dense<0.000000e+00> : vector<16x8xf32>
    %420 = tpu.matmul %328, %419, %cst_302 {dimension_numbers = #tpu.dot_dimension_numbers<[1], [0], [0], [1], [0, 0, 1, 1], [], []>} : vector<16x32xf32>, vector<32x8xf32>, vector<16x8xf32> -> vector<16x8xf32>
    %c1_303 = arith.constant 1 : index
    %c2_304 = arith.constant 2 : index
    %c0_305 = arith.constant 0 : index
    %c0_306 = arith.constant 0 : index
    %421 = vector.load %arg7[%c1_303, %c2_304, %c0_305, %c0_306] : memref<2x4x1x8xf32, #tpu.memory_space<vmem>>, vector<1x1x1x8xf32>
    %422 = vector.shape_cast %421 : vector<1x1x1x8xf32> to vector<1x8xf32>
    %423 = vector.broadcast %422 : vector<1x8xf32> to vector<16x8xf32>
    %424 = arith.addf %420, %423 : vector<16x8xf32>
    %425 = vector.shape_cast %424 : vector<16x8xf32> to vector<2x8x8xf32>
    %c1_307 = arith.constant 1 : index
    %c2_308 = arith.constant 2 : index
    %c0_309 = arith.constant 0 : index
    %c0_310 = arith.constant 0 : index
    %426 = vector.load %arg8[%c1_307, %c2_308, %c0_309, %c0_310] : memref<2x4x32x8xf32, #tpu.memory_space<vmem>>, vector<1x1x32x8xf32>
    %427 = vector.shape_cast %426 : vector<1x1x32x8xf32> to vector<32x8xf32>
    %cst_311 = arith.constant dense<0.000000e+00> : vector<16x8xf32>
    %428 = tpu.matmul %328, %427, %cst_311 {dimension_numbers = #tpu.dot_dimension_numbers<[1], [0], [0], [1], [0, 0, 1, 1], [], []>} : vector<16x32xf32>, vector<32x8xf32>, vector<16x8xf32> -> vector<16x8xf32>
    %c1_312 = arith.constant 1 : index
    %c2_313 = arith.constant 2 : index
    %c0_314 = arith.constant 0 : index
    %c0_315 = arith.constant 0 : index
    %429 = vector.load %arg9[%c1_312, %c2_313, %c0_314, %c0_315] : memref<2x4x1x8xf32, #tpu.memory_space<vmem>>, vector<1x1x1x8xf32>
    %430 = vector.shape_cast %429 : vector<1x1x1x8xf32> to vector<1x8xf32>
    %431 = vector.broadcast %430 : vector<1x8xf32> to vector<16x8xf32>
    %432 = arith.addf %428, %431 : vector<16x8xf32>
    %433 = vector.shape_cast %432 : vector<16x8xf32> to vector<2x8x8xf32>
    %c1_316 = arith.constant 1 : index
    %c2_317 = arith.constant 2 : index
    %c0_318 = arith.constant 0 : index
    %c0_319 = arith.constant 0 : index
    %434 = vector.load %arg10[%c1_316, %c2_317, %c0_318, %c0_319] : memref<2x4x32x8xf32, #tpu.memory_space<vmem>>, vector<1x1x32x8xf32>
    %435 = vector.shape_cast %434 : vector<1x1x32x8xf32> to vector<32x8xf32>
    %cst_320 = arith.constant dense<0.000000e+00> : vector<16x8xf32>
    %436 = tpu.matmul %328, %435, %cst_320 {dimension_numbers = #tpu.dot_dimension_numbers<[1], [0], [0], [1], [0, 0, 1, 1], [], []>} : vector<16x32xf32>, vector<32x8xf32>, vector<16x8xf32> -> vector<16x8xf32>
    %c1_321 = arith.constant 1 : index
    %c2_322 = arith.constant 2 : index
    %c0_323 = arith.constant 0 : index
    %c0_324 = arith.constant 0 : index
    %437 = vector.load %arg11[%c1_321, %c2_322, %c0_323, %c0_324] : memref<2x4x1x8xf32, #tpu.memory_space<vmem>>, vector<1x1x1x8xf32>
    %438 = vector.shape_cast %437 : vector<1x1x1x8xf32> to vector<1x8xf32>
    %439 = vector.broadcast %438 : vector<1x8xf32> to vector<16x8xf32>
    %440 = arith.addf %436, %439 : vector<16x8xf32>
    %441 = vector.shape_cast %440 : vector<16x8xf32> to vector<2x8x8xf32>
    "tpu.trace_start"() <{level = 10 : i32, message = "bqd,bkd->bqk"}> : () -> ()
    %cst_325 = arith.constant dense<0.000000e+00> : vector<2x8x8xf32>
    %442 = tpu.matmul %425, %433, %cst_325 {dimension_numbers = #tpu.dot_dimension_numbers<[2], [2], [1], [1], [0, 0, 0, 1, 1, 1], [0], [0]>} : vector<2x8x8xf32>, vector<2x8x8xf32>, vector<2x8x8xf32> -> vector<2x8x8xf32>
    "tpu.trace_stop"() : () -> ()
    %cst_326 = arith.constant 0.353553385 : f32
    %443 = vector.broadcast %cst_326 : f32 to vector<2x8x8xf32>
    %444 = arith.mulf %442, %443 : vector<2x8x8xf32>
    %cst_327 = arith.constant -1.000000e+30 : f32
    %445 = vector.broadcast %cst_327 : f32 to vector<2x8x8xf32>
    %446 = arith.select %18, %444, %445 : vector<2x8x8xi1>, vector<2x8x8xf32>
    %cst_328 = arith.constant dense<0xFF800000> : vector<2x8xf32>
    %447 = vector.multi_reduction <maximumf>, %446, %cst_328 [2] : vector<2x8x8xf32> to vector<2x8xf32>
    %448 = vector.shape_cast %447 : vector<2x8xf32> to vector<2x8x1xf32>
    %449 = vector.broadcast %448 : vector<2x8x1xf32> to vector<2x8x8xf32>
    %450 = arith.subf %446, %449 : vector<2x8x8xf32>
    %451 = math.exp %450 : vector<2x8x8xf32>
    %cst_329 = arith.constant dense<0.000000e+00> : vector<2x8xf32>
    %452 = vector.multi_reduction <add>, %451, %cst_329 [2] : vector<2x8x8xf32> to vector<2x8xf32>
    %453 = vector.shape_cast %452 : vector<2x8xf32> to vector<2x8x1xf32>
    %454 = vector.broadcast %453 : vector<2x8x1xf32> to vector<2x8x8xf32>
    %455 = arith.divf %451, %454 : vector<2x8x8xf32>
    "tpu.trace_start"() <{level = 10 : i32, message = "bqk,bkd->bqd"}> : () -> ()
    %cst_330 = arith.constant dense<0.000000e+00> : vector<2x8x8xf32>
    %456 = tpu.matmul %455, %441, %cst_330 {dimension_numbers = #tpu.dot_dimension_numbers<[2], [1], [1], [2], [0, 0, 0, 1, 1, 2], [0], [0]>} : vector<2x8x8xf32>, vector<2x8x8xf32>, vector<2x8x8xf32> -> vector<2x8x8xf32>
    "tpu.trace_stop"() : () -> ()
    %457 = vector.shape_cast %456 : vector<2x8x8xf32> to vector<16x8xf32>
    %c1_331 = arith.constant 1 : index
    %c2_332 = arith.constant 2 : index
    %c0_333 = arith.constant 0 : index
    %c0_334 = arith.constant 0 : index
    %458 = vector.load %arg12[%c1_331, %c2_332, %c0_333, %c0_334] : memref<2x4x8x32xf32, #tpu.memory_space<vmem>>, vector<1x1x8x32xf32>
    %459 = vector.shape_cast %458 : vector<1x1x8x32xf32> to vector<8x32xf32>
    %cst_335 = arith.constant dense<0.000000e+00> : vector<16x32xf32>
    %460 = tpu.matmul %457, %459, %cst_335 {dimension_numbers = #tpu.dot_dimension_numbers<[1], [0], [0], [1], [0, 0, 1, 1], [], []>} : vector<16x8xf32>, vector<8x32xf32>, vector<16x32xf32> -> vector<16x32xf32>
    %461 = arith.addf %417, %460 : vector<16x32xf32>
    %c1_336 = arith.constant 1 : index
    %c3_337 = arith.constant 3 : index
    %c0_338 = arith.constant 0 : index
    %c0_339 = arith.constant 0 : index
    %462 = vector.load %arg6[%c1_336, %c3_337, %c0_338, %c0_339] : memref<2x4x32x8xf32, #tpu.memory_space<vmem>>, vector<1x1x32x8xf32>
    %463 = vector.shape_cast %462 : vector<1x1x32x8xf32> to vector<32x8xf32>
    %cst_340 = arith.constant dense<0.000000e+00> : vector<16x8xf32>
    %464 = tpu.matmul %328, %463, %cst_340 {dimension_numbers = #tpu.dot_dimension_numbers<[1], [0], [0], [1], [0, 0, 1, 1], [], []>} : vector<16x32xf32>, vector<32x8xf32>, vector<16x8xf32> -> vector<16x8xf32>
    %c1_341 = arith.constant 1 : index
    %c3_342 = arith.constant 3 : index
    %c0_343 = arith.constant 0 : index
    %c0_344 = arith.constant 0 : index
    %465 = vector.load %arg7[%c1_341, %c3_342, %c0_343, %c0_344] : memref<2x4x1x8xf32, #tpu.memory_space<vmem>>, vector<1x1x1x8xf32>
    %466 = vector.shape_cast %465 : vector<1x1x1x8xf32> to vector<1x8xf32>
    %467 = vector.broadcast %466 : vector<1x8xf32> to vector<16x8xf32>
    %468 = arith.addf %464, %467 : vector<16x8xf32>
    %469 = vector.shape_cast %468 : vector<16x8xf32> to vector<2x8x8xf32>
    %c1_345 = arith.constant 1 : index
    %c3_346 = arith.constant 3 : index
    %c0_347 = arith.constant 0 : index
    %c0_348 = arith.constant 0 : index
    %470 = vector.load %arg8[%c1_345, %c3_346, %c0_347, %c0_348] : memref<2x4x32x8xf32, #tpu.memory_space<vmem>>, vector<1x1x32x8xf32>
    %471 = vector.shape_cast %470 : vector<1x1x32x8xf32> to vector<32x8xf32>
    %cst_349 = arith.constant dense<0.000000e+00> : vector<16x8xf32>
    %472 = tpu.matmul %328, %471, %cst_349 {dimension_numbers = #tpu.dot_dimension_numbers<[1], [0], [0], [1], [0, 0, 1, 1], [], []>} : vector<16x32xf32>, vector<32x8xf32>, vector<16x8xf32> -> vector<16x8xf32>
    %c1_350 = arith.constant 1 : index
    %c3_351 = arith.constant 3 : index
    %c0_352 = arith.constant 0 : index
    %c0_353 = arith.constant 0 : index
    %473 = vector.load %arg9[%c1_350, %c3_351, %c0_352, %c0_353] : memref<2x4x1x8xf32, #tpu.memory_space<vmem>>, vector<1x1x1x8xf32>
    %474 = vector.shape_cast %473 : vector<1x1x1x8xf32> to vector<1x8xf32>
    %475 = vector.broadcast %474 : vector<1x8xf32> to vector<16x8xf32>
    %476 = arith.addf %472, %475 : vector<16x8xf32>
    %477 = vector.shape_cast %476 : vector<16x8xf32> to vector<2x8x8xf32>
    %c1_354 = arith.constant 1 : index
    %c3_355 = arith.constant 3 : index
    %c0_356 = arith.constant 0 : index
    %c0_357 = arith.constant 0 : index
    %478 = vector.load %arg10[%c1_354, %c3_355, %c0_356, %c0_357] : memref<2x4x32x8xf32, #tpu.memory_space<vmem>>, vector<1x1x32x8xf32>
    %479 = vector.shape_cast %478 : vector<1x1x32x8xf32> to vector<32x8xf32>
    %cst_358 = arith.constant dense<0.000000e+00> : vector<16x8xf32>
    %480 = tpu.matmul %328, %479, %cst_358 {dimension_numbers = #tpu.dot_dimension_numbers<[1], [0], [0], [1], [0, 0, 1, 1], [], []>} : vector<16x32xf32>, vector<32x8xf32>, vector<16x8xf32> -> vector<16x8xf32>
    %c1_359 = arith.constant 1 : index
    %c3_360 = arith.constant 3 : index
    %c0_361 = arith.constant 0 : index
    %c0_362 = arith.constant 0 : index
    %481 = vector.load %arg11[%c1_359, %c3_360, %c0_361, %c0_362] : memref<2x4x1x8xf32, #tpu.memory_space<vmem>>, vector<1x1x1x8xf32>
    %482 = vector.shape_cast %481 : vector<1x1x1x8xf32> to vector<1x8xf32>
    %483 = vector.broadcast %482 : vector<1x8xf32> to vector<16x8xf32>
    %484 = arith.addf %480, %483 : vector<16x8xf32>
    %485 = vector.shape_cast %484 : vector<16x8xf32> to vector<2x8x8xf32>
    "tpu.trace_start"() <{level = 10 : i32, message = "bqd,bkd->bqk"}> : () -> ()
    %cst_363 = arith.constant dense<0.000000e+00> : vector<2x8x8xf32>
    %486 = tpu.matmul %469, %477, %cst_363 {dimension_numbers = #tpu.dot_dimension_numbers<[2], [2], [1], [1], [0, 0, 0, 1, 1, 1], [0], [0]>} : vector<2x8x8xf32>, vector<2x8x8xf32>, vector<2x8x8xf32> -> vector<2x8x8xf32>
    "tpu.trace_stop"() : () -> ()
    %cst_364 = arith.constant 0.353553385 : f32
    %487 = vector.broadcast %cst_364 : f32 to vector<2x8x8xf32>
    %488 = arith.mulf %486, %487 : vector<2x8x8xf32>
    %cst_365 = arith.constant -1.000000e+30 : f32
    %489 = vector.broadcast %cst_365 : f32 to vector<2x8x8xf32>
    %490 = arith.select %18, %488, %489 : vector<2x8x8xi1>, vector<2x8x8xf32>
    %cst_366 = arith.constant dense<0xFF800000> : vector<2x8xf32>
    %491 = vector.multi_reduction <maximumf>, %490, %cst_366 [2] : vector<2x8x8xf32> to vector<2x8xf32>
    %492 = vector.shape_cast %491 : vector<2x8xf32> to vector<2x8x1xf32>
    %493 = vector.broadcast %492 : vector<2x8x1xf32> to vector<2x8x8xf32>
    %494 = arith.subf %490, %493 : vector<2x8x8xf32>
    %495 = math.exp %494 : vector<2x8x8xf32>
    %cst_367 = arith.constant dense<0.000000e+00> : vector<2x8xf32>
    %496 = vector.multi_reduction <add>, %495, %cst_367 [2] : vector<2x8x8xf32> to vector<2x8xf32>
    %497 = vector.shape_cast %496 : vector<2x8xf32> to vector<2x8x1xf32>
    %498 = vector.broadcast %497 : vector<2x8x1xf32> to vector<2x8x8xf32>
    %499 = arith.divf %495, %498 : vector<2x8x8xf32>
    "tpu.trace_start"() <{level = 10 : i32, message = "bqk,bkd->bqd"}> : () -> ()
    %cst_368 = arith.constant dense<0.000000e+00> : vector<2x8x8xf32>
    %500 = tpu.matmul %499, %485, %cst_368 {dimension_numbers = #tpu.dot_dimension_numbers<[2], [1], [1], [2], [0, 0, 0, 1, 1, 2], [0], [0]>} : vector<2x8x8xf32>, vector<2x8x8xf32>, vector<2x8x8xf32> -> vector<2x8x8xf32>
    "tpu.trace_stop"() : () -> ()
    %501 = vector.shape_cast %500 : vector<2x8x8xf32> to vector<16x8xf32>
    %c1_369 = arith.constant 1 : index
    %c3_370 = arith.constant 3 : index
    %c0_371 = arith.constant 0 : index
    %c0_372 = arith.constant 0 : index
    %502 = vector.load %arg12[%c1_369, %c3_370, %c0_371, %c0_372] : memref<2x4x8x32xf32, #tpu.memory_space<vmem>>, vector<1x1x8x32xf32>
    %503 = vector.shape_cast %502 : vector<1x1x8x32xf32> to vector<8x32xf32>
    %cst_373 = arith.constant dense<0.000000e+00> : vector<16x32xf32>
    %504 = tpu.matmul %501, %503, %cst_373 {dimension_numbers = #tpu.dot_dimension_numbers<[1], [0], [0], [1], [0, 0, 1, 1], [], []>} : vector<16x8xf32>, vector<8x32xf32>, vector<16x32xf32> -> vector<16x32xf32>
    %505 = arith.addf %461, %504 : vector<16x32xf32>
    %506 = arith.addf %304, %505 : vector<16x32xf32>
    %c1_374 = arith.constant 1 : index
    %c0_375 = arith.constant 0 : index
    %c0_376 = arith.constant 0 : index
    %507 = vector.load %arg13[%c1_374, %c0_375, %c0_376] : memref<2x1x32xf32, #tpu.memory_space<vmem>>, vector<1x1x32xf32>
    %508 = vector.shape_cast %507 : vector<1x1x32xf32> to vector<1x32xf32>
    %509 = vector.broadcast %508 : vector<1x32xf32> to vector<16x32xf32>
    %510 = arith.addf %506, %509 : vector<16x32xf32>
    %c1_377 = arith.constant 1 : index
    %c0_378 = arith.constant 0 : index
    %c0_379 = arith.constant 0 : index
    %511 = vector.load %arg14[%c1_377, %c0_378, %c0_379] : memref<2x1x32xf32, #tpu.memory_space<vmem>>, vector<1x1x32xf32>
    %512 = vector.shape_cast %511 : vector<1x1x32xf32> to vector<1x32xf32>
    %c1_380 = arith.constant 1 : index
    %c0_381 = arith.constant 0 : index
    %c0_382 = arith.constant 0 : index
    %513 = vector.load %arg15[%c1_380, %c0_381, %c0_382] : memref<2x1x32xf32, #tpu.memory_space<vmem>>, vector<1x1x32xf32>
    %514 = vector.shape_cast %513 : vector<1x1x32xf32> to vector<1x32xf32>
    %cst_383 = arith.constant dense<0.000000e+00> : vector<16xf32>
    %515 = vector.multi_reduction <add>, %510, %cst_383 [1] : vector<16x32xf32> to vector<16xf32>
    %516 = vector.shape_cast %515 : vector<16xf32> to vector<16x1xf32>
    %cst_384 = arith.constant 3.200000e+01 : f32
    %517 = vector.broadcast %cst_384 : f32 to vector<16x1xf32>
    %518 = arith.divf %516, %517 : vector<16x1xf32>
    %519 = vector.broadcast %518 : vector<16x1xf32> to vector<16x32xf32>
    %520 = arith.subf %510, %519 : vector<16x32xf32>
    %521 = arith.mulf %520, %520 : vector<16x32xf32>
    %cst_385 = arith.constant dense<0.000000e+00> : vector<16xf32>
    %522 = vector.multi_reduction <add>, %521, %cst_385 [1] : vector<16x32xf32> to vector<16xf32>
    %523 = vector.shape_cast %522 : vector<16xf32> to vector<16x1xf32>
    %cst_386 = arith.constant 3.200000e+01 : f32
    %524 = vector.broadcast %cst_386 : f32 to vector<16x1xf32>
    %525 = arith.divf %523, %524 : vector<16x1xf32>
    %cst_387 = arith.constant 9.99999974E-6 : f32
    %526 = vector.broadcast %cst_387 : f32 to vector<16x1xf32>
    %527 = arith.addf %525, %526 : vector<16x1xf32>
    %528 = math.rsqrt %527 : vector<16x1xf32>
    %529 = vector.broadcast %528 : vector<16x1xf32> to vector<16x32xf32>
    %530 = arith.mulf %520, %529 : vector<16x32xf32>
    %531 = vector.broadcast %512 : vector<1x32xf32> to vector<16x32xf32>
    %532 = arith.mulf %530, %531 : vector<16x32xf32>
    %533 = vector.broadcast %514 : vector<1x32xf32> to vector<16x32xf32>
    %534 = arith.addf %532, %533 : vector<16x32xf32>
    %c1_388 = arith.constant 1 : index
    %c0_389 = arith.constant 0 : index
    %c0_390 = arith.constant 0 : index
    %535 = vector.load %arg16[%c1_388, %c0_389, %c0_390] : memref<2x32x128xf32, #tpu.memory_space<vmem>>, vector<1x32x128xf32>
    %536 = vector.shape_cast %535 : vector<1x32x128xf32> to vector<32x128xf32>
    %cst_391 = arith.constant dense<0.000000e+00> : vector<16x128xf32>
    %537 = tpu.matmul %534, %536, %cst_391 {dimension_numbers = #tpu.dot_dimension_numbers<[1], [0], [0], [1], [0, 0, 1, 1], [], []>} : vector<16x32xf32>, vector<32x128xf32>, vector<16x128xf32> -> vector<16x128xf32>
    %c1_392 = arith.constant 1 : index
    %c0_393 = arith.constant 0 : index
    %c0_394 = arith.constant 0 : index
    %538 = vector.load %arg17[%c1_392, %c0_393, %c0_394] : memref<2x1x128xf32, #tpu.memory_space<vmem>>, vector<1x1x128xf32>
    %539 = vector.shape_cast %538 : vector<1x1x128xf32> to vector<1x128xf32>
    %540 = vector.broadcast %539 : vector<1x128xf32> to vector<16x128xf32>
    %541 = arith.addf %537, %540 : vector<16x128xf32>
    %cst_395 = arith.constant 5.000000e-01 : f32
    %542 = vector.broadcast %cst_395 : f32 to vector<16x128xf32>
    %543 = arith.mulf %542, %541 : vector<16x128xf32>
    %cst_396 = arith.constant 0.707106769 : f32
    %544 = vector.broadcast %cst_396 : f32 to vector<16x128xf32>
    %545 = arith.mulf %541, %544 : vector<16x128xf32>
    %cst_397 = arith.constant 0.000000e+00 : f32
    %546 = vector.broadcast %cst_397 : f32 to vector<16x128xf32>
    %547 = arith.cmpf oge, %545, %546 : vector<16x128xf32>
    %cst_398 = arith.constant 1.000000e+00 : f32
    %cst_399 = arith.constant -1.000000e+00 : f32
    %548 = vector.broadcast %cst_398 : f32 to vector<16x128xf32>
    %549 = vector.broadcast %cst_399 : f32 to vector<16x128xf32>
    %550 = arith.select %547, %548, %549 : vector<16x128xi1>, vector<16x128xf32>
    %551 = math.absf %545 : vector<16x128xf32>
    %cst_400 = arith.constant 0.327591091 : f32
    %552 = vector.broadcast %cst_400 : f32 to vector<16x128xf32>
    %553 = arith.mulf %552, %551 : vector<16x128xf32>
    %cst_401 = arith.constant 1.000000e+00 : f32
    %554 = vector.broadcast %cst_401 : f32 to vector<16x128xf32>
    %555 = arith.addf %554, %553 : vector<16x128xf32>
    %cst_402 = arith.constant 1.000000e+00 : f32
    %556 = vector.broadcast %cst_402 : f32 to vector<16x128xf32>
    %557 = arith.divf %556, %555 : vector<16x128xf32>
    %cst_403 = arith.constant 1.06140542 : f32
    %558 = vector.broadcast %cst_403 : f32 to vector<16x128xf32>
    %559 = arith.mulf %558, %557 : vector<16x128xf32>
    %cst_404 = arith.constant -1.45315206 : f32
    %560 = vector.broadcast %cst_404 : f32 to vector<16x128xf32>
    %561 = arith.addf %559, %560 : vector<16x128xf32>
    %562 = arith.mulf %561, %557 : vector<16x128xf32>
    %cst_405 = arith.constant 1.42141378 : f32
    %563 = vector.broadcast %cst_405 : f32 to vector<16x128xf32>
    %564 = arith.addf %562, %563 : vector<16x128xf32>
    %565 = arith.mulf %564, %557 : vector<16x128xf32>
    %cst_406 = arith.constant -0.284496725 : f32
    %566 = vector.broadcast %cst_406 : f32 to vector<16x128xf32>
    %567 = arith.addf %565, %566 : vector<16x128xf32>
    %568 = arith.mulf %567, %557 : vector<16x128xf32>
    %cst_407 = arith.constant 0.254829586 : f32
    %569 = vector.broadcast %cst_407 : f32 to vector<16x128xf32>
    %570 = arith.addf %568, %569 : vector<16x128xf32>
    %571 = arith.mulf %570, %557 : vector<16x128xf32>
    %cst_408 = arith.constant 0.000000e+00 : f32
    %572 = vector.broadcast %cst_408 : f32 to vector<16x128xf32>
    %573 = arith.subf %572, %551 : vector<16x128xf32>
    %574 = arith.mulf %573, %551 : vector<16x128xf32>
    %575 = math.exp %574 : vector<16x128xf32>
    %576 = arith.mulf %571, %575 : vector<16x128xf32>
    %cst_409 = arith.constant 1.000000e+00 : f32
    %577 = vector.broadcast %cst_409 : f32 to vector<16x128xf32>
    %578 = arith.subf %577, %576 : vector<16x128xf32>
    %579 = arith.mulf %550, %578 : vector<16x128xf32>
    %cst_410 = arith.constant 1.000000e+00 : f32
    %580 = vector.broadcast %cst_410 : f32 to vector<16x128xf32>
    %581 = arith.addf %580, %579 : vector<16x128xf32>
    %582 = arith.mulf %543, %581 : vector<16x128xf32>
    %c1_411 = arith.constant 1 : index
    %c0_412 = arith.constant 0 : index
    %c0_413 = arith.constant 0 : index
    %583 = vector.load %arg18[%c1_411, %c0_412, %c0_413] : memref<2x128x32xf32, #tpu.memory_space<vmem>>, vector<1x128x32xf32>
    %584 = vector.shape_cast %583 : vector<1x128x32xf32> to vector<128x32xf32>
    %cst_414 = arith.constant dense<0.000000e+00> : vector<16x32xf32>
    %585 = tpu.matmul %582, %584, %cst_414 {dimension_numbers = #tpu.dot_dimension_numbers<[1], [0], [0], [1], [0, 0, 1, 1], [], []>} : vector<16x128xf32>, vector<128x32xf32>, vector<16x32xf32> -> vector<16x32xf32>
    %c1_415 = arith.constant 1 : index
    %c0_416 = arith.constant 0 : index
    %c0_417 = arith.constant 0 : index
    %586 = vector.load %arg19[%c1_415, %c0_416, %c0_417] : memref<2x1x32xf32, #tpu.memory_space<vmem>>, vector<1x1x32xf32>
    %587 = vector.shape_cast %586 : vector<1x1x32xf32> to vector<1x32xf32>
    %588 = vector.broadcast %587 : vector<1x32xf32> to vector<16x32xf32>
    %589 = arith.addf %585, %588 : vector<16x32xf32>
    %590 = arith.addf %510, %589 : vector<16x32xf32>
    %c0_418 = arith.constant 0 : index
    %c0_419 = arith.constant 0 : index
    %591 = vector.load %arg20[%c0_418, %c0_419] : memref<1x32xf32, #tpu.memory_space<vmem>>, vector<1x32xf32>
    %c0_420 = arith.constant 0 : index
    %c0_421 = arith.constant 0 : index
    %592 = vector.load %arg21[%c0_420, %c0_421] : memref<1x32xf32, #tpu.memory_space<vmem>>, vector<1x32xf32>
    %cst_422 = arith.constant dense<0.000000e+00> : vector<16xf32>
    %593 = vector.multi_reduction <add>, %590, %cst_422 [1] : vector<16x32xf32> to vector<16xf32>
    %594 = vector.shape_cast %593 : vector<16xf32> to vector<16x1xf32>
    %cst_423 = arith.constant 3.200000e+01 : f32
    %595 = vector.broadcast %cst_423 : f32 to vector<16x1xf32>
    %596 = arith.divf %594, %595 : vector<16x1xf32>
    %597 = vector.broadcast %596 : vector<16x1xf32> to vector<16x32xf32>
    %598 = arith.subf %590, %597 : vector<16x32xf32>
    %599 = arith.mulf %598, %598 : vector<16x32xf32>
    %cst_424 = arith.constant dense<0.000000e+00> : vector<16xf32>
    %600 = vector.multi_reduction <add>, %599, %cst_424 [1] : vector<16x32xf32> to vector<16xf32>
    %601 = vector.shape_cast %600 : vector<16xf32> to vector<16x1xf32>
    %cst_425 = arith.constant 3.200000e+01 : f32
    %602 = vector.broadcast %cst_425 : f32 to vector<16x1xf32>
    %603 = arith.divf %601, %602 : vector<16x1xf32>
    %cst_426 = arith.constant 9.99999974E-6 : f32
    %604 = vector.broadcast %cst_426 : f32 to vector<16x1xf32>
    %605 = arith.addf %603, %604 : vector<16x1xf32>
    %606 = math.rsqrt %605 : vector<16x1xf32>
    %607 = vector.broadcast %606 : vector<16x1xf32> to vector<16x32xf32>
    %608 = arith.mulf %598, %607 : vector<16x32xf32>
    %609 = vector.broadcast %591 : vector<1x32xf32> to vector<16x32xf32>
    %610 = arith.mulf %608, %609 : vector<16x32xf32>
    %611 = vector.broadcast %592 : vector<1x32xf32> to vector<16x32xf32>
    %612 = arith.addf %610, %611 : vector<16x32xf32>
    %c0_427 = arith.constant 0 : index
    %c0_428 = arith.constant 0 : index
    %613 = vector.load %arg2[%c0_427, %c0_428] : memref<128x32xf32, #tpu.memory_space<vmem>>, vector<128x32xf32>
    %cst_429 = arith.constant dense<0.000000e+00> : vector<16x128xf32>
    %614 = tpu.matmul %612, %613, %cst_429 {dimension_numbers = #tpu.dot_dimension_numbers<[1], [1], [0], [0], [0, 0, 1, 0], [], []>} : vector<16x32xf32>, vector<128x32xf32>, vector<16x128xf32> -> vector<16x128xf32>
    %615 = vector.shape_cast %614 : vector<16x128xf32> to vector<2x8x128xf32>
    %c0_430 = arith.constant 0 : index
    %c0_431 = arith.constant 0 : index
    %c0_432 = arith.constant 0 : index
    %616 = vector.load %arg22[%c0_430, %c0_431, %c0_432] : memref<2x8x128xf32, #tpu.memory_space<vmem>>, vector<2x8x128xf32>
    tpu.vector_store %arg22[%c0_430, %c0_431, %c0_432], %615 {strides = array<i32>} : memref<2x8x128xf32, #tpu.memory_space<vmem>>, vector<2x8x128xf32>,
    return
  }
  func.func @transform_0(%arg0: i32) -> (i32, i32) {
    %c0_i32 = arith.constant 0 : i32
    %c0_i32_0 = arith.constant 0 : i32
    %c0_i32_1 = arith.constant 0 : i32
    return %c0_i32, %c0_i32_0 : i32, i32
  }
  func.func @transform_1(%arg0: i32) -> (i32, i32) {
    %c0_i32 = arith.constant 0 : i32
    %c0_i32_0 = arith.constant 0 : i32
    %c0_i32_1 = arith.constant 0 : i32
    return %c0_i32, %c0_i32_0 : i32, i32
  }
  func.func @transform_2(%arg0: i32) -> (i32, i32) {
    %c0_i32 = arith.constant 0 : i32
    %c0_i32_0 = arith.constant 0 : i32
    %c0_i32_1 = arith.constant 0 : i32
    return %c0_i32, %c0_i32_0 : i32, i32
  }
  func.func @transform_3(%arg0: i32) -> (i32, i32, i32) {
    %c0_i32 = arith.constant 0 : i32
    %c0_i32_0 = arith.constant 0 : i32
    %c0_i32_1 = arith.constant 0 : i32
    %c0_i32_2 = arith.constant 0 : i32
    return %c0_i32, %c0_i32_0, %c0_i32_1 : i32, i32, i32
  }
  func.func @transform_4(%arg0: i32) -> (i32, i32, i32) {
    %c0_i32 = arith.constant 0 : i32
    %c0_i32_0 = arith.constant 0 : i32
    %c0_i32_1 = arith.constant 0 : i32
    %c0_i32_2 = arith.constant 0 : i32
    return %c0_i32, %c0_i32_0, %c0_i32_1 : i32, i32, i32
  }
  func.func @transform_5(%arg0: i32) -> (i32, i32, i32, i32) {
    %c0_i32 = arith.constant 0 : i32
    %c0_i32_0 = arith.constant 0 : i32
    %c0_i32_1 = arith.constant 0 : i32
    %c0_i32_2 = arith.constant 0 : i32
    %c0_i32_3 = arith.constant 0 : i32
    return %c0_i32, %c0_i32_0, %c0_i32_1, %c0_i32_2 : i32, i32, i32, i32
  }
  func.func @transform_6(%arg0: i32) -> (i32, i32, i32, i32) {
    %c0_i32 = arith.constant 0 : i32
    %c0_i32_0 = arith.constant 0 : i32
    %c0_i32_1 = arith.constant 0 : i32
    %c0_i32_2 = arith.constant 0 : i32
    %c0_i32_3 = arith.constant 0 : i32
    return %c0_i32, %c0_i32_0, %c0_i32_1, %c0_i32_2 : i32, i32, i32, i32
  }
  func.func @transform_7(%arg0: i32) -> (i32, i32, i32, i32) {
    %c0_i32 = arith.constant 0 : i32
    %c0_i32_0 = arith.constant 0 : i32
    %c0_i32_1 = arith.constant 0 : i32
    %c0_i32_2 = arith.constant 0 : i32
    %c0_i32_3 = arith.constant 0 : i32
    return %c0_i32, %c0_i32_0, %c0_i32_1, %c0_i32_2 : i32, i32, i32, i32
  }
  func.func @transform_8(%arg0: i32) -> (i32, i32, i32, i32) {
    %c0_i32 = arith.constant 0 : i32
    %c0_i32_0 = arith.constant 0 : i32
    %c0_i32_1 = arith.constant 0 : i32
    %c0_i32_2 = arith.constant 0 : i32
    %c0_i32_3 = arith.constant 0 : i32
    return %c0_i32, %c0_i32_0, %c0_i32_1, %c0_i32_2 : i32, i32, i32, i32
  }
  func.func @transform_9(%arg0: i32) -> (i32, i32, i32, i32) {
    %c0_i32 = arith.constant 0 : i32
    %c0_i32_0 = arith.constant 0 : i32
    %c0_i32_1 = arith.constant 0 : i32
    %c0_i32_2 = arith.constant 0 : i32
    %c0_i32_3 = arith.constant 0 : i32
    return %c0_i32, %c0_i32_0, %c0_i32_1, %c0_i32_2 : i32, i32, i32, i32
  }
  func.func @transform_10(%arg0: i32) -> (i32, i32, i32, i32) {
    %c0_i32 = arith.constant 0 : i32
    %c0_i32_0 = arith.constant 0 : i32
    %c0_i32_1 = arith.constant 0 : i32
    %c0_i32_2 = arith.constant 0 : i32
    %c0_i32_3 = arith.constant 0 : i32
    return %c0_i32, %c0_i32_0, %c0_i32_1, %c0_i32_2 : i32, i32, i32, i32
  }
  func.func @transform_11(%arg0: i32) -> (i32, i32, i32, i32) {
    %c0_i32 = arith.constant 0 : i32
    %c0_i32_0 = arith.constant 0 : i32
    %c0_i32_1 = arith.constant 0 : i32
    %c0_i32_2 = arith.constant 0 : i32
    %c0_i32_3 = arith.constant 0 : i32
    return %c0_i32, %c0_i32_0, %c0_i32_1, %c0_i32_2 : i32, i32, i32, i32
  }
  func.func @transform_12(%arg0: i32) -> (i32, i32, i32) {
    %c0_i32 = arith.constant 0 : i32
    %c0_i32_0 = arith.constant 0 : i32
    %c0_i32_1 = arith.constant 0 : i32
    %c0_i32_2 = arith.constant 0 : i32
    return %c0_i32, %c0_i32_0, %c0_i32_1 : i32, i32, i32
  }
  func.func @transform_13(%arg0: i32) -> (i32, i32, i32) {
    %c0_i32 = arith.constant 0 : i32
    %c0_i32_0 = arith.constant 0 : i32
    %c0_i32_1 = arith.constant 0 : i32
    %c0_i32_2 = arith.constant 0 : i32
    return %c0_i32, %c0_i32_0, %c0_i32_1 : i32, i32, i32
  }
  func.func @transform_14(%arg0: i32) -> (i32, i32, i32) {
    %c0_i32 = arith.constant 0 : i32
    %c0_i32_0 = arith.constant 0 : i32
    %c0_i32_1 = arith.constant 0 : i32
    %c0_i32_2 = arith.constant 0 : i32
    return %c0_i32, %c0_i32_0, %c0_i32_1 : i32, i32, i32
  }
  func.func @transform_15(%arg0: i32) -> (i32, i32, i32) {
    %c0_i32 = arith.constant 0 : i32
    %c0_i32_0 = arith.constant 0 : i32
    %c0_i32_1 = arith.constant 0 : i32
    %c0_i32_2 = arith.constant 0 : i32
    return %c0_i32, %c0_i32_0, %c0_i32_1 : i32, i32, i32
  }
  func.func @transform_16(%arg0: i32) -> (i32, i32, i32) {
    %c0_i32 = arith.constant 0 : i32
    %c0_i32_0 = arith.constant 0 : i32
    %c0_i32_1 = arith.constant 0 : i32
    %c0_i32_2 = arith.constant 0 : i32
    return %c0_i32, %c0_i32_0, %c0_i32_1 : i32, i32, i32
  }
  func.func @transform_17(%arg0: i32) -> (i32, i32, i32) {
    %c0_i32 = arith.constant 0 : i32
    %c0_i32_0 = arith.constant 0 : i32
    %c0_i32_1 = arith.constant 0 : i32
    %c0_i32_2 = arith.constant 0 : i32
    return %c0_i32, %c0_i32_0, %c0_i32_1 : i32, i32, i32
  }
  func.func @transform_18(%arg0: i32) -> (i32, i32, i32) {
    %c0_i32 = arith.constant 0 : i32
    %c0_i32_0 = arith.constant 0 : i32
    %c0_i32_1 = arith.constant 0 : i32
    %c0_i32_2 = arith.constant 0 : i32
    return %c0_i32, %c0_i32_0, %c0_i32_1 : i32, i32, i32
  }
  func.func @transform_19(%arg0: i32) -> (i32, i32) {
    %c0_i32 = arith.constant 0 : i32
    %c0_i32_0 = arith.constant 0 : i32
    %c0_i32_1 = arith.constant 0 : i32
    return %c0_i32, %c0_i32_0 : i32, i32
  }
  func.func @transform_20(%arg0: i32) -> (i32, i32) {
    %c0_i32 = arith.constant 0 : i32
    %c0_i32_0 = arith.constant 0 : i32
    %c0_i32_1 = arith.constant 0 : i32
    return %c0_i32, %c0_i32_0 : i32, i32
  }
  func.func @transform_21(%arg0: i32) -> (i32, i32, i32) {
    %c0_i32 = arith.constant 0 : i32
    %c0_i32_0 = arith.constant 0 : i32
    %c0_i32_1 = arith.constant 0 : i32
    %c0_i32_2 = arith.constant 0 : i32
    return %c0_i32, %c0_i32_0, %c0_i32_1 : i32, i32, i32
  }
}

</mosaic_0001>

<bundles_post_ra>
// kernel: _lambda_.1
= control target key start
LH: loop header
LB: loop body
LE: loop exit
PB: predicated region body
PF: predicated region fallthrough
CT: control target
= control target key end

     0   :  { %s9133_s0 = inlined_call_operand.vmem [shape: s32[2,8], index: 0, kind: input, shape index: {}]   ;;  %s9134_s1 = inlined_call_operand.vmem [shape: f32[128,32], index: 1, kind: input, shape index: {}]   ;;  %s9135_s2 = inlined_call_operand.vmem [shape: f32[16,32], index: 2, kind: input, shape index: {}]   ;;  %s9136_s3 = inlined_call_operand.vmem [shape: f32[2,1,32], index: 3, kind: input, shape index: {}]   ;;  %s9137_s4 = inlined_call_operand.vmem [shape: f32[2,1,32], index: 4, kind: input, shape index: {}]   ;;  %s9138_s5 = inlined_call_operand.vmem [shape: f32[2,4,32,8], index: 5, kind: input, shape index: {}]   ;;  %s9139_s6 = inlined_call_operand.vmem [shape: f32[2,4,1,8], index: 6, kind: input, shape index: {}]   ;;  %s9140_s7 = inlined_call_operand.vmem [shape: f32[2,4,32,8], index: 7, kind: input, shape index: {}]   ;;  %s9141_s8 = inlined_call_operand.vmem [shape: f32[2,4,1,8], index: 8, kind: input, shape index: {}]   ;;  %s9142_s9 = inlined_call_operand.vmem [shape: f32[2,4,32,8], index: 9, kind: input, shape index: {}]   ;;  %s9143_s10 = inlined_call_operand.vmem [shape: f32[2,4,1,8], index: 10, kind: input, shape index: {}]   ;;  %s9144_s11 = inlined_call_operand.vmem [shape: f32[2,4,8,32], index: 11, kind: input, shape index: {}]   ;;  %s9145_s12 = inlined_call_operand.vmem [shape: f32[2,1,32], index: 12, kind: input, shape index: {}]   ;;  %s9146_s13 = inlined_call_operand.vmem [shape: f32[2,1,32], index: 13, kind: input, shape index: {}]   ;;  %s9147_s14 = inlined_call_operand.vmem [shape: f32[2,1,32], index: 14, kind: input, shape index: {}]   ;;  %s9148_s15 = inlined_call_operand.vmem [shape: f32[2,32,128], index: 15, kind: input, shape index: {}]   ;;  %s9149_s16 = inlined_call_operand.vmem [shape: f32[2,1,128], index: 16, kind: input, shape index: {}]   ;;  %s9150_s17 = inlined_call_operand.vmem [shape: f32[2,128,32], index: 17, kind: input, shape index: {}]   ;;  %s9151_s18 = inlined_call_operand.vmem [shape: f32[2,1,32], index: 18, kind: input, shape index: {}]   ;;  %s9152_s19 = inlined_call_operand.vmem [shape: f32[1,32], index: 19, kind: input, shape index: {}]   ;;  %s9153_s20 = inlined_call_operand.vmem [shape: f32[1,32], index: 20, kind: input, shape index: {}]   ;;  %s9154_s21 = inlined_call_operand.hbm [shape: f32[2,8,128], index: 21, kind: output, shape index: {}]  }
   0x1   :  { %9159 = sst [smem:[#allocation5_spill]] %s9133_s0 }
   0x2   :  { %9160 = sst [smem:[#allocation6_spill]] %s9134_s1 }
   0x3   :  { %9161 = sst [smem:[#allocation7_spill]] %s9135_s2 }
   0x4   :  { %9162 = sst [smem:[#allocation8_spill]] %s9136_s3 }
   0x5   :  { %9163 = sst [smem:[#allocation9_spill]] %s9137_s4 }
   0x6   :  { %9164 = sst [smem:[#allocation10_spill]] %s9138_s5 }
   0x7   :  { %v70_v0 = vlaneseq  ;;  %s9165_s26 = sld [smem:[#allocation6_spill]] }
   0x8   :  { %s9166_s30 = sld [smem:[#allocation5_spill]] }
   0x9   :  { %v7990_v3 = vshrl.u32 %v70_v0, 7 }
   0xb   :  { %v74_v6 = vsub.s32 0, %v7990_v3  ;;  %v81_v7 = vsub.s32 1, %v7990_v3 }
   0xd   :  { %v107_v1 = vld [vmem:[%s9165_s26 + $0x78] sm:$0xff]  ;;  %v106_v2 = vld [vmem:[%s9165_s26 + $0x70] sm:$0xff]  ;;  %v105_v4 = vld [vmem:[%s9165_s26 + $0x68] sm:$0xff] }
   0xe   :  { %7112 = vmatprep.subr.mxu1 %v107_v1  ;;  %v69_v5 = vld [vmem:[%s9166_s30] sm:$0x3] }
   0xf   :  { %7113 = vmatpush3.msra.mxu1 %v107_v1  ;;  %v104_v8 = vld [vmem:[%s9165_s26 + $0x60] sm:$0xff] }
  0x10   :  { %7114 = vmatprep.subr.mxu1 %v106_v2 }
  0x11   :  { %7115 = vmatpush3.msra.mxu1 %v106_v2 }
  0x12   :  { %7116 = vmatprep.subr.mxu1 %v105_v4 }
  0x13   :  { %26 = vsyncpa [#allocation3], 0  ;;  %v75_v9 = vrot.slane %v69_v5, %v74_v6  ;;  %7117 = vmatpush3.msra.mxu1 %v105_v4  ;;  %v103_v10 = vld [vmem:[%s9165_s26 + $0x58] sm:$0xff]  ;;  %v82_v11 = vrot.slane %v69_v5, %v81_v7  ;;  %v102_v12 = vld [vmem:[%s9165_s26 + $0x50] sm:$0xff]  ;;  %v8039_v23 = vand.u32 127, %v70_v0  ;;  %v7867_v25 = vmov 1.0  }
  0x14   :  { %7118 = vmatprep.subr.mxu1 %v104_v8  ;;  %v101_v13 = vld [vmem:[%s9165_s26 + $0x48] sm:$0xff]  ;;  %v100_v14 = vld [vmem:[%s9165_s26 + $0x40] sm:$0xff]  ;;  %v99_v15 = vld [vmem:[%s9165_s26 + $0x38] sm:$0xff]  ;;  %s9167_s5 = sld [smem:[#allocation7_spill]]  ;;  %vm191_vm2 = vcmask 261120   ;;  %vm7869_vm3 = vmmov 0  }
  0x15   :  { %77 = vbcast.lane.b32.xlu0 %v75_v9, 256  ;;  %7119 = vmatpush3.msra.mxu1 %v104_v8  ;;  %v98_v16 = vld [vmem:[%s9165_s26 + $0x30] sm:$0xff]  ;;  %v97_v17 = vld [vmem:[%s9165_s26 + $0x28] sm:$0xff]  ;;  %v96_v18 = vld [vmem:[%s9165_s26 + $0x20] sm:$0xff]  ;;  %s9168_s2 = sld [smem:[#allocation10_spill]]  ;;  %v7868_v9 = vmov 0.0   ;;  %vm8143_vm5 = vcmp.le.s32.totalorder %v8039_v23, %v7990_v3 }
  0x16   :  { %7120 = vmatprep.subr.mxu1 %v103_v10  ;;  %v95_v19 = vld [vmem:[%s9165_s26 + $0x18] sm:$0xff]  ;;  %v94_v20 = vld [vmem:[%s9165_s26 + $0x10] sm:$0xff]  ;;  %v93_v21 = vld [vmem:[%s9165_s26 + $0x8] sm:$0xff]  ;;  %s9169_s28 = sld [smem:[#allocation8_spill]]  ;;  %vm499_vm4 = vcmask 64512   ;;  %s7871_s27 = smov [#allocation2]  }
  0x17   :  { %7121 = vmatpush3.msra.mxu1 %v103_v10  ;;  %v92_v22 = vld [vmem:[%s9165_s26] sm:$0xff]  ;;  %v330_v44 = vld [vmem:[%s9140_s7 + $0x18] sm:$0xff]  ;;  %v329_v46 = vld [vmem:[%s9140_s7 + $0x10] sm:$0xff]  ;;  %s9170_s4 = sld [smem:[#allocation9_spill]]  ;;  %s6468_s3 = sshll.u32 %s7871_s27, 4  ;;  %s6469_s3 = int_to_ptr.vmem [resolvable:$true] %s6468_s3 }
  0x18   :  { %7122 = vmatprep.subr.mxu1 %v102_v12  ;;  %v328_v48 = vld [vmem:[%s9140_s7 + $0x8] sm:$0xff]  ;;  %v327_v50 = vld [vmem:[%s9140_s7] sm:$0xff]  ;;  %v416_v52 = vld [vmem:[%s9142_s9 + $0x18] sm:$0xff]  ;;  %p7850_p1 = scmp.lt.s32.totalorder %s6469_s3, %s6469_s3 }
  0x19   :  { %84 = vbcast.lane.b32.xlu0 %v82_v11, 256  ;;  %7123 = vmatpush3.msra.mxu1 %v102_v12  ;;  %v415_v6 = vld [vmem:[%s9142_s9 + $0x10] sm:$0xff]  ;;  %v414_v7 = vld [vmem:[%s9142_s9 + $0x8] sm:$0xff]  ;;  %v413_v8 = vld [vmem:[%s9142_s9] sm:$0xff] }
  0x1a   :  { %7124 = vmatprep.subr.mxu1 %v101_v13  ;;  %v183_v28 = vld [vmem:[%s9167_s5] sm:$0xff] }
  0x1b   :  { %7125 = vmatpush3.msra.mxu1 %v101_v13  ;;  %v238_v45 = vld [vmem:[%s9168_s2 + $0x18] sm:$0xff]  ;;  %v237_v47 = vld [vmem:[%s9168_s2 + $0x10] sm:$0xff]  ;;  %v236_v49 = vld [vmem:[%s9168_s2 + $0x8] sm:$0xff] }
  0x1c   :  { %7126 = vmatprep.subr.mxu1 %v100_v14  ;;  %7147 = vmatprep.subr.mxu0 %v238_v45  ;;  %v235_v51 = vld [vmem:[%s9168_s2] sm:$0xff] }
  0x1d   :  { %7127 = vmatpush3.msra.mxu1 %v100_v14  ;;  %7148 = vmatpush3.msra.mxu0 %v238_v45  ;;  %v6483_v60 = vld [vmem:[%s9169_s28] ss:$0 sm:$0xff] }
  0x1e   :  { %7128 = vmatprep.subr.mxu1 %v99_v15  ;;  %7149 = vmatprep.subr.mxu0 %v237_v47  ;;  %v6484_v62 = vld [vmem:[%s9170_s4] ss:$0 sm:$0xff] }
  0x1f   :  { %7129 = vmatpush3.msra.mxu1 %v99_v15  ;;  %7150 = vmatpush3.msra.mxu0 %v237_v47  ;;  %v6488_v10 = vld [vmem:[%s9141_s8] ss:$0 sm:$0xff]  ;;  %v6511_v47 = vld [vmem:[%s9140_s7 + $0x38] sm:$0xff] }
  0x20   :  { %7130 = vmatprep.subr.mxu1 %v98_v16  ;;  %7151 = vmatprep.subr.mxu0 %v236_v49  ;;  %v6485_v13 = vld [vmem:[%s9139_s6] ss:$0 sm:$0xff] }
  0x21   :  { %7131 = vmatpush3.msra.mxu1 %v98_v16  ;;  %7152 = vmatpush3.msra.mxu0 %v236_v49 }
  0x22   :  { %7132 = vmatprep.subr.mxu1 %v97_v17  ;;  %7153 = vmatprep.subr.mxu0 %v235_v51 }
  0x23   :  { %7133 = vmatpush3.msra.mxu1 %v97_v17  ;;  %7154 = vmatpush3.msra.mxu0 %v235_v51 }
  0x24   :  { %7134 = vmatprep.subr.mxu1 %v96_v18  ;;  %7180 = vmatprep.subr.mxu0 %v7868_v9 }
  0x25   :  { %7135 = vmatpush3.msra.mxu1 %v96_v18 }
  0x26   :  { %7136 = vmatprep.subr.mxu1 %v95_v19 }
  0x27   :  { %7137 = vmatpush3.msra.mxu1 %v95_v19 }
  0x28   :  { %7138 = vmatprep.subr.mxu1 %v94_v20 }
  0x29   :  { %7139 = vmatpush3.msra.mxu1 %v94_v20  ;;  %v6491_v20 = vld [vmem:[%s9143_s10] ss:$0 sm:$0xff] }
  0x2a   :  { %7140 = vmatprep.subr.mxu1 %v93_v21 }
  0x2b   :  { %7141 = vmatpush3.msra.mxu1 %v93_v21 }
  0x2c   :  { %7142 = vmatprep.subr.mxu1 %v92_v22 }
  0x2d   :  { %7143 = vmatpush3.msra.mxu1 %v92_v22 }
  0x2e   :  { %7158 = vmatprep.subr.mxu1 %v330_v44 }
  0x87   :  { %v78_v24 = vpop.permute.xlu0 %77 }
  0x88   :  { %vm86_vm0 = vcmp.eq.s32.totalorder %v8039_v23, %v78_v24 }
  0x89   :  { %7144 = vmatprep.mubr.msk.f32.mxu1 %vm86_vm0, %v7867_v25 }
  0x8b   :  { %v85_v26 = vpop.permute.xlu0 %84 }
  0x8c   :  { %vm87_vm1 = vcmp.eq.s32.totalorder %v8039_v23, %v85_v26 }
  0x8d   :  { %7145 = vmatmul.mubr.msk.f32.vlgmr.msra.gmra.mxu1 %vm87_vm1, %v7867_v25 }
  0x8e   :  { %7159 = vmatpush3.msra.mxu1 %v330_v44 }
  0x8f   :  { %7160 = vmatprep.subr.mxu1 %v329_v46 }
  0x90   :  { %7161 = vmatpush3.msra.mxu1 %v329_v46 }
  0x91   :  { %7162 = vmatprep.subr.mxu1 %v328_v48 }
  0x92   :  { %7163 = vmatpush3.msra.mxu1 %v328_v48  ;;  %v6503_v48 = vld [vmem:[%s9168_s2 + $0x38] sm:$0xff] }
  0x93   :  { %7164 = vmatprep.subr.mxu1 %v327_v50 }
  0x94   :  { %7165 = vmatpush3.msra.mxu1 %v327_v50 }
  0x95   :  { %7169 = vmatprep.subr.mxu1 %v416_v52 }
 0x14d   :  { %v7146_v27 = vpop.f32.mrf.mxu1 }
 0x14e   :  { %v8048_v31 = vadd.f32 %v7146_v27, %v183_v28 }
 0x14f   :  { %v174_v29 = vpop.f32.mrf.mxu1 }
 0x150   :  { %v8046_v30 = vadd.f32 %v183_v28, %v174_v29  ;;  %v195_v33 = vsel %vm191_vm2, %v8048_v31, 0.0 }
 0x152   :  { %v192_v32 = vsel %vm191_vm2, %v8046_v30, 0.0 }
 0x153   :  { %193 = vadd.xlane.f32.xlu1 %v192_v32 }
 0x157   :  { %196 = vadd.xlane.f32.xlu1 %v195_v33 }
 0x1dc   :  { %v194_v34 = vpop.xlane.xlu1 %193 }
 0x1dd   :  { %v199_v35 = vmul.f32 0.03125, %v194_v34 }
 0x1df   :  { %v201_v36 = vsub.f32 %v8046_v30, %v199_v35 }
 0x1e0   :  { %v197_v37 = vpop.xlane.xlu1 %196 }
 0x1e1   :  { %v200_v38 = vmul.f32 0.03125, %v197_v37  ;;  %v203_v39 = vmul.f32 %v201_v36, %v201_v36 }
 0x1e3   :  { %v202_v40 = vsub.f32 %v8048_v31, %v200_v38  ;;  %v205_v41 = vsel %vm191_vm2, %v203_v39, 0.0 }
 0x1e4   :  { %206 = vadd.xlane.f32.xlu0 %v205_v41 }
 0x1e5   :  { %v204_v42 = vmul.f32 %v202_v40, %v202_v40 }
 0x1e7   :  { %v208_v43 = vsel %vm191_vm2, %v204_v42, 0.0 }
 0x1e8   :  { %209 = vadd.xlane.f32.xlu1 %v208_v43 }
 0x26d   :  { %v207_v53 = vpop.xlane.xlu0 %206 }
 0x26e   :  { %v211_v54 = vmul.f32 0.03125, %v207_v53  ;;  %v6510_v53 = vld [vmem:[%s9140_s7 + $0x30] sm:$0xff] }
 0x270   :  { %v213_v55 = vadd.f32 1e-05, %v211_v54 }
 0x271   :  { %v210_v56 = vpop.xlane.xlu1 %209 }
 0x272   :  { %7745 = vrsqrt.f32 %v213_v55  ;;  %v212_v57 = vmul.f32 0.03125, %v210_v56  ;;  %v6509_v55 = vld [vmem:[%s9140_s7 + $0x28] sm:$0xff] }
 0x274   :  { %v214_v58 = vadd.f32 1e-05, %v212_v57  ;;  %v6502_v57 = vld [vmem:[%s9168_s2 + $0x30] sm:$0xff] }
 0x276   :  { %7747 = vrsqrt.f32 %v214_v58  ;;  %v6508_v58 = vld [vmem:[%s9140_s7 + $0x20] sm:$0xff] }
 0x27f   :  { %v7746_v59 = vpop.eup %7745 }
 0x280   :  { %v217_v61 = vmul.f32 %v7746_v59, %v201_v36  ;;  %v6501_v59 = vld [vmem:[%s9168_s2 + $0x28] sm:$0xff] }
 0x282   :  { %v225_v63 = vmul.f32 %v6483_v60, %v217_v61  ;;  %v6519_v61 = vld [vmem:[%s9142_s9 + $0x38] sm:$0xff] }
 0x283   :  { %v7748_v0 = vpop.eup %7747 }
 0x284   :  { %v8091_v1 = vadd.f32 %v6484_v62, %v225_v63  ;;  %v218_v2 = vmul.f32 %v7748_v0, %v202_v40  ;;  %v6517_v63 = vld [vmem:[%s9142_s9 + $0x28] sm:$0xff]  ;;  %v6516_v0 = vld [vmem:[%s9142_s9 + $0x20] sm:$0xff] }
 0x286   :  { %v226_v4 = vmul.f32 %v6483_v60, %v218_v2  ;;  %7155 = vmatprep.mubr.msk.f32.mxu0 %vm191_vm2, %v8091_v1  ;;  %7166 = vmatprep.mubr.msk.f32.mxu1 %vm191_vm2, %v8091_v1  ;;  %v6500_v60 = vld [vmem:[%s9168_s2 + $0x20] sm:$0xff] }
 0x288   :  { %v8097_v5 = vadd.f32 %v6484_v62, %v226_v4  ;;  %v6518_v62 = vld [vmem:[%s9142_s9 + $0x30] sm:$0xff] }
 0x28a   :  { %7156 = vmatmul.mubr.msk.f32.vlgmr.msra.gmra.mxu0 %vm191_vm2, %v8097_v5  ;;  %7167 = vmatmul.mubr.msk.f32.vlgmr.msra.gmra.mxu1 %vm191_vm2, %v8097_v5 }
 0x28b   :  { %7170 = vmatpush3.msra.mxu1 %v416_v52  ;;  %7177 = vmatprep.mubr.msk.f32.mxu1 %vm191_vm2, %v8091_v1 }
 0x28c   :  { %7171 = vmatprep.subr.mxu1 %v415_v6  ;;  %7182 = vmatprep.mubr.msk.f32.mxu0 %vm7869_vm3, %v7868_v9 }
 0x28d   :  { %7172 = vmatpush3.msra.mxu1 %v415_v6 }
 0x28e   :  { %7173 = vmatprep.subr.mxu1 %v414_v7 }
 0x28f   :  { %7174 = vmatpush3.msra.mxu1 %v414_v7 }
 0x290   :  { %7175 = vmatprep.subr.mxu1 %v413_v8 }
 0x291   :  { %7176 = vmatpush3.msra.mxu1 %v413_v8 }
 0x292   :  { %7178 = vmatmul.mubr.msk.f32.vlgmr.msra.gmra.mxu1 %vm191_vm2, %v8097_v5  ;;  %7185 = vmatprep.subr.mxu1 %v7868_v9 }
 0x293   :  { %7187 = vmatprep.mubr.msk.f32.mxu1 %vm7869_vm3, %v7868_v9 }
 0x34a   :  { %v7157_v11 = vpop.f32.mrf.mxu0  ;;  %v7168_v12 = vpop.f32.mrf.mxu1 }
 0x34b   :  { %v410_v14 = vadd.f32 %v7168_v12, %v6488_v10  ;;  %v324_v18 = vadd.f32 %v7157_v11, %v6485_v13 }
 0x34c   :  { %v404_v15 = vpop.f32.mrf.mxu1  ;;  %v318_v16 = vpop.f32.mrf.mxu0 }
 0x34d   :  { %v405_v17 = vadd.f32 %v6488_v10, %v404_v15  ;;  %7186 = vmatpush3.xpose.msk.msra.mxu1 %vm499_vm4, %v410_v14  ;;  %v319_v19 = vadd.f32 %v6485_v13, %v318_v16  ;;  %v6513_v10 = vld [vmem:[%s9141_s8 + $0x1] ss:$0 sm:$0xff] }
 0x34e   :  { %7195 = vmatprep.subr.mxu1 %v7868_v9  ;;  %v6505_v14 = vld [vmem:[%s9139_s6 + $0x1] ss:$0 sm:$0xff] }
 0x34f   :  { %7181 = vmatpush3.xpose.msk.msra.mxu0 %vm499_vm4, %v405_v17 }
 0x350   :  { %7188 = vmatmul.mubr.msk.f32.vlgmr.msra.gmra.mxu1 %vm499_vm4, %v324_v18  ;;  %7190 = vmatprep.subr.mxu0 %v7868_v9  ;;  %v6521_v18 = vld [vmem:[%s9143_s10 + $0x1] ss:$0 sm:$0xff] }
 0x351   :  { %7197 = vmatprep.mubr.msk.f32.mxu1 %vm7869_vm3, %v7868_v9 }
 0x352   :  { %v7179_v21 = vpop.f32.mrf.mxu1  ;;  %7183 = vmatmul.mubr.msk.f32.vlgmr.msra.gmra.mxu0 %vm499_vm4, %v319_v19 }
 0x353   :  { %v496_v22 = vadd.f32 %v7179_v21, %v6491_v20  ;;  %7192 = vmatprep.mubr.msk.f32.mxu0 %vm7869_vm3, %v7868_v9 }
 0x354   :  { %v490_v24 = vpop.f32.mrf.mxu1 }
 0x355   :  { %v491_v25 = vadd.f32 %v6491_v20, %v490_v24  ;;  %7196 = vmatpush3.msra.mxu1 %v496_v22 }
 0x356   :  { %7211 = vmatprep.subr.mxu1 %v6511_v47 }
 0x357   :  { %7191 = vmatpush3.msra.mxu0 %v491_v25 }
 0x358   :  { %7200 = vmatprep.subr.mxu0 %v6503_v48 }
 0x410   :  { %v648_v27 = vpop.f32.mrf.mxu1 }
 0x411   :  { %v653_v28 = vmul.f32 0.35355338, %v648_v27 }
 0x412   :  { %v572_v29 = vpop.f32.mrf.mxu0  ;;  %v7189_v32 = vpop.f32.mrf.mxu1 }
 0x413   :  { %v652_v33 = vmul.f32 0.35355338, %v572_v29  ;;  %v655_v34 = vsel %vm8143_vm5, %v653_v28, -1e+30 }
 0x414   :  { %v7184_v35 = vpop.f32.mrf.mxu0  ;;  %v659_v36 = vsel %vm499_vm4, %v655_v34, -inf }
 0x415   :  { %660 = vmax.xlane.f32.xlu1 %v659_v36  ;;  %v654_v37 = vsel %vm8143_vm5, %v652_v33, -1e+30 }
 0x416   :  { %v656_v3 = vsel %vm499_vm4, %v654_v37, -inf }
 0x419   :  { %657 = vmax.xlane.f32.xlu1 %v656_v3 }
 0x49e   :  { %v661_v23 = vpop.xlane.xlu1 %660 }
 0x49f   :  { %v663_v38 = vsub.f32 %v655_v34, %v661_v23 }
 0x4a1   :  { %v666_v39 = vmul.f32 1.442695, %v663_v38 }
 0x4a2   :  { %v658_v40 = vpop.xlane.xlu1 %657 }
 0x4a3   :  { %7749 = vpow2.f32 %v666_v39  ;;  %v662_v41 = vsub.f32 %v654_v37, %v658_v40 }
 0x4a5   :  { %v664_v42 = vmul.f32 1.442695, %v662_v41 }
 0x4a7   :  { %7751 = vpow2.f32 %v664_v42 }
 0x4b0   :  { %v7750_v43 = vpop.eup %7749 }
 0x4b1   :  { %v671_v44 = vsel %vm499_vm4, %v7750_v43, 0.0 }
 0x4b2   :  { %672 = vadd.xlane.f32.xlu1 %v671_v44 }
 0x4b4   :  { %v7752_v45 = vpop.eup %7751 }
 0x4b5   :  { %v668_v46 = vsel %vm499_vm4, %v7752_v45, 0.0 }
 0x4b6   :  { %669 = vadd.xlane.f32.xlu1 %v668_v46  ;;  %v824_v46 = vld [vmem:[%s9144_s11] sm:$0xff] }
 0x53b   :  { %v673_v49 = vpop.xlane.xlu1 %672 }
 0x53c   :  { %7753 = vrcp.f32 %v673_v49 }
 0x53f   :  { %v670_v50 = vpop.xlane.xlu1 %669 }
 0x540   :  { %7755 = vrcp.f32 %v670_v50 }
 0x549   :  { %v7754_v51 = vpop.eup %7753 }
 0x54a   :  { %v677_v52 = vmul.f32 %v7754_v51, %v7750_v43 }
 0x54c   :  { %7198 = vmatmul.mubr.msk.f32.vlgmr.msra.gmra.mxu1 %vm499_vm4, %v677_v52 }
 0x54d   :  { %v7756_v54 = vpop.eup %7755  ;;  %7212 = vmatpush3.msra.mxu1 %v6511_v47  ;;  %7219 = vmatprep.mubr.msk.f32.mxu1 %vm191_vm2, %v8091_v1 }
 0x54e   :  { %7213 = vmatprep.subr.mxu1 %v6510_v53  ;;  %v675_v56 = vmul.f32 %v7756_v54, %v7752_v45  ;;  %v6545_v54 = vld [vmem:[%s9140_s7 + $0x50] sm:$0xff] }
 0x54f   :  { %7214 = vmatpush3.msra.mxu1 %v6510_v53  ;;  %v6546_v53 = vld [vmem:[%s9140_s7 + $0x58] sm:$0xff] }
 0x550   :  { %7215 = vmatprep.subr.mxu1 %v6509_v55  ;;  %7193 = vmatmul.mubr.msk.f32.vlgmr.msra.gmra.mxu0 %vm499_vm4, %v675_v56  ;;  %v6543_v56 = vld [vmem:[%s9140_s7 + $0x40] sm:$0xff] }
 0x551   :  { %7201 = vmatpush3.msra.mxu0 %v6503_v48  ;;  %7216 = vmatpush3.msra.mxu1 %v6509_v55  ;;  %v6544_v55 = vld [vmem:[%s9140_s7 + $0x48] sm:$0xff] }
 0x552   :  { %7202 = vmatprep.subr.mxu0 %v6502_v57  ;;  %7208 = vmatprep.mubr.msk.f32.mxu0 %vm191_vm2, %v8091_v1 }
 0x553   :  { %7217 = vmatprep.subr.mxu1 %v6508_v58  ;;  %7203 = vmatpush3.msra.mxu0 %v6502_v57  ;;  %v6530_v57 = vld [vmem:[%s9144_s11 + $0x8] sm:$0xff] }
 0x554   :  { %7218 = vmatpush3.msra.mxu1 %v6508_v58  ;;  %7204 = vmatprep.subr.mxu0 %v6501_v59  ;;  %v6538_v58 = vld [vmem:[%s9168_s2 + $0x58] sm:$0xff] }
 0x555   :  { %7220 = vmatmul.mubr.msk.f32.vlgmr.msra.gmra.mxu1 %vm191_vm2, %v8097_v5  ;;  %7205 = vmatpush3.msra.mxu0 %v6501_v59 }
 0x556   :  { %7206 = vmatprep.subr.mxu0 %v6500_v60  ;;  %7233 = vmatprep.subr.mxu1 %v7868_v9 }
 0x557   :  { %7207 = vmatpush3.msra.mxu0 %v6500_v60  ;;  %7235 = vmatprep.mubr.msk.f32.mxu1 %vm7869_vm3, %v7868_v9 }
 0x558   :  { %7209 = vmatmul.mubr.msk.f32.vlgmr.msra.gmra.mxu0 %vm191_vm2, %v8097_v5  ;;  %7222 = vmatprep.subr.mxu0 %v6519_v61 }
 0x559   :  { %7223 = vmatpush3.msra.mxu0 %v6519_v61  ;;  %7230 = vmatprep.mubr.msk.f32.mxu0 %vm191_vm2, %v8091_v1 }
 0x55a   :  { %7224 = vmatprep.subr.mxu0 %v6518_v62 }
 0x55b   :  { %7225 = vmatpush3.msra.mxu0 %v6518_v62  ;;  %v6537_v62 = vld [vmem:[%s9168_s2 + $0x50] sm:$0xff] }
 0x55c   :  { %7226 = vmatprep.subr.mxu0 %v6517_v63 }
 0x55d   :  { %7227 = vmatpush3.msra.mxu0 %v6517_v63 }
 0x55e   :  { %7228 = vmatprep.subr.mxu0 %v6516_v0 }
 0x55f   :  { %7229 = vmatpush3.msra.mxu0 %v6516_v0  ;;  %v6536_v0 = vld [vmem:[%s9168_s2 + $0x48] sm:$0xff] }
 0x560   :  { %7231 = vmatmul.mubr.msk.f32.vlgmr.msra.gmra.mxu0 %vm191_vm2, %v8097_v5  ;;  %7243 = vmatprep.subr.mxu0 %v7868_v9 }
 0x561   :  { %7245 = vmatprep.mubr.msk.f32.mxu0 %vm7869_vm3, %v7868_v9 }
 0x60c   :  { %v8211_v2 = vpop.f32.mrf.mxu1 }
 0x60e   :  { %v7199_v4 = vpop.f32.mrf.mxu1 }
 0x610   :  { %v8213_v6 = vpop.f32.mrf.mxu0 }
 0x612   :  { %v7194_v7 = vpop.f32.mrf.mxu0 }
 0x613   :  { %v6553_v7 = vld [vmem:[%s9142_s9 + $0x50] sm:$0xff] }
 0x615   :  { %v7221_v8 = vpop.f32.mrf.mxu1 }
 0x616   :  { %v998_v17 = vadd.f32 %v7221_v8, %v6513_v10 }
 0x617   :  { %v992_v11 = vpop.f32.mrf.mxu1 }
 0x618   :  { %v993_v12 = vadd.f32 %v6513_v10, %v992_v11  ;;  %v7210_v13 = vpop.f32.mrf.mxu0  ;;  %v6548_v10 = vld [vmem:[%s9141_s8 + $0x2] ss:$0 sm:$0xff]  ;;  %v6552_v11 = vld [vmem:[%s9142_s9 + $0x48] sm:$0xff] }
 0x619   :  { %v910_v19 = vadd.f32 %v7210_v13, %v6505_v14  ;;  %v6551_v13 = vld [vmem:[%s9142_s9 + $0x40] sm:$0xff] }
 0x61a   :  { %7234 = vmatpush3.xpose.msk.msra.mxu1 %vm499_vm4, %v993_v12  ;;  %v904_v15 = vpop.f32.mrf.mxu0 }
 0x61b   :  { %v905_v16 = vadd.f32 %v6505_v14, %v904_v15  ;;  %7238 = vmatprep.subr.mxu1 %v7868_v9 }
 0x61d   :  { %7236 = vmatmul.mubr.msk.f32.vlgmr.msra.gmra.mxu1 %vm499_vm4, %v905_v16 }
 0x61e   :  { %7239 = vmatpush3.xpose.msk.msra.mxu1 %vm499_vm4, %v998_v17  ;;  %7240 = vmatprep.mubr.msk.f32.mxu1 %vm7869_vm3, %v7868_v9 }
 0x61f   :  { %7248 = vmatprep.subr.mxu1 %v7868_v9 }
 0x620   :  { %v7232_v20 = vpop.f32.mrf.mxu0 }
 0x621   :  { %v1086_v21 = vadd.f32 %v7232_v20, %v6521_v18  ;;  %7241 = vmatmul.mubr.msk.f32.vlgmr.msra.gmra.mxu1 %vm499_vm4, %v910_v19  ;;  %v6540_v20 = vld [vmem:[%s9139_s6 + $0x2] ss:$0 sm:$0xff] }
 0x622   :  { %v1080_v22 = vpop.f32.mrf.mxu0  ;;  %7250 = vmatprep.mubr.msk.f32.mxu1 %vm7869_vm3, %v7868_v9 }
 0x623   :  { %v1081_v24 = vadd.f32 %v6521_v18, %v1080_v22  ;;  %7249 = vmatpush3.msra.mxu1 %v1086_v21 }
 0x624   :  { %7258 = vmatprep.subr.mxu1 %v824_v46 }
 0x625   :  { %7244 = vmatpush3.msra.mxu0 %v1081_v24  ;;  %v6556_v24 = vld [vmem:[%s9143_s10 + $0x2] ss:$0 sm:$0xff] }
 0x626   :  { %7253 = vmatprep.subr.mxu0 %v6530_v57 }
 0x6dd   :  { %v1161_v25 = vpop.f32.mrf.mxu1 }
 0x6de   :  { %v1241_v27 = vmul.f32 0.35355338, %v1161_v25 }
 0x6df   :  { %v7237_v28 = vpop.f32.mrf.mxu1 }
 0x6e0   :  { %v1243_v29 = vsel %vm8143_vm5, %v1241_v27, -1e+30 }
 0x6e1   :  { %v1237_v32 = vpop.f32.mrf.mxu1  ;;  %v1245_v33 = vsel %vm499_vm4, %v1243_v29, -inf }
 0x6e2   :  { %v1242_v34 = vmul.f32 0.35355338, %v1237_v32  ;;  %1246 = vmax.xlane.f32.xlu1 %v1245_v33 }
 0x6e3   :  { %v7242_v35 = vpop.f32.mrf.mxu1 }
 0x6e4   :  { %v1244_v36 = vsel %vm8143_vm5, %v1242_v34, -1e+30 }
 0x6e5   :  { %v1248_v37 = vsel %vm499_vm4, %v1244_v36, -inf }
 0x6e6   :  { %1249 = vmax.xlane.f32.xlu1 %v1248_v37 }
 0x76b   :  { %v1247_v3 = vpop.xlane.xlu1 %1246 }
 0x76c   :  { %v1251_v23 = vsub.f32 %v1243_v29, %v1247_v3 }
 0x76e   :  { %v1253_v38 = vmul.f32 1.442695, %v1251_v23 }
 0x76f   :  { %v1250_v39 = vpop.xlane.xlu1 %1249 }
 0x770   :  { %7757 = vpow2.f32 %v1253_v38  ;;  %v1252_v40 = vsub.f32 %v1244_v36, %v1250_v39 }
 0x772   :  { %v1255_v41 = vmul.f32 1.442695, %v1252_v40 }
 0x774   :  { %7759 = vpow2.f32 %v1255_v41 }
 0x77d   :  { %v7758_v42 = vpop.eup %7757 }
 0x77e   :  { %v1257_v43 = vsel %vm499_vm4, %v7758_v42, 0.0 }
 0x77f   :  { %1258 = vadd.xlane.f32.xlu1 %v1257_v43 }
 0x781   :  { %v7760_v44 = vpop.eup %7759 }
 0x782   :  { %v1260_v45 = vsel %vm499_vm4, %v7760_v44, 0.0 }
 0x783   :  { %1261 = vadd.xlane.f32.xlu0 %v1260_v45 }
 0x808   :  { %v1259_v47 = vpop.xlane.xlu1 %1258 }
 0x809   :  { %7761 = vrcp.f32 %v1259_v47 }
 0x80c   :  { %v1262_v48 = vpop.xlane.xlu0 %1261 }
 0x80d   :  { %7763 = vrcp.f32 %v1262_v48 }
 0x816   :  { %v7762_v49 = vpop.eup %7761 }
 0x817   :  { %v1264_v50 = vmul.f32 %v7762_v49, %v7758_v42 }
 0x819   :  { %7246 = vmatmul.mubr.msk.f32.vlgmr.msra.gmra.mxu0 %vm499_vm4, %v1264_v50 }
 0x81a   :  { %v7764_v51 = vpop.eup %7763  ;;  %7254 = vmatpush3.msra.mxu0 %v6530_v57 }
 0x81b   :  { %v1266_v52 = vmul.f32 %v7764_v51, %v7760_v44  ;;  %7263 = vmatprep.subr.mxu0 %v6538_v58  ;;  %v6571_v51 = vld [vmem:[%s9168_s2 + $0x78] sm:$0xff] }
 0x81d   :  { %7251 = vmatmul.mubr.msk.f32.vlgmr.msra.gmra.mxu1 %vm499_vm4, %v1266_v52 }
 0x81e   :  { %7260 = vmatprep.mubr.msk.f32.mxu1 %vm499_vm4, %v8213_v6  ;;  %7259 = vmatpush3.msra.mxu1 %v824_v46  ;;  %v6554_v6 = vld [vmem:[%s9142_s9 + $0x58] sm:$0xff] }
 0x81f   :  { %7274 = vmatprep.subr.mxu1 %v6546_v53 }
 0x821   :  { %7261 = vmatmul.mubr.msk.f32.vlgmr.msra.gmra.mxu1 %vm499_vm4, %v8211_v2  ;;  %v6535_v2 = vld [vmem:[%s9168_s2 + $0x40] sm:$0xff] }
 0x822   :  { %7275 = vmatpush3.msra.mxu1 %v6546_v53  ;;  %7282 = vmatprep.mubr.msk.f32.mxu1 %vm191_vm2, %v8091_v1 }
 0x823   :  { %7276 = vmatprep.subr.mxu1 %v6545_v54 }
 0x824   :  { %7277 = vmatpush3.msra.mxu1 %v6545_v54 }
 0x825   :  { %7278 = vmatprep.subr.mxu1 %v6544_v55 }
 0x826   :  { %7279 = vmatpush3.msra.mxu1 %v6544_v55 }
 0x827   :  { %7280 = vmatprep.subr.mxu1 %v6543_v56 }
 0x828   :  { %7281 = vmatpush3.msra.mxu1 %v6543_v56 }
 0x829   :  { %7283 = vmatmul.mubr.msk.f32.vlgmr.msra.gmra.mxu1 %vm191_vm2, %v8097_v5  ;;  %7296 = vmatprep.subr.mxu1 %v7868_v9 }
 0x82a   :  { %7298 = vmatprep.mubr.msk.f32.mxu1 %vm7869_vm3, %v7868_v9 }
 0x8d9   :  { %v1336_v59 = vpop.f32.mrf.mxu0 }
 0x8da   :  { %7255 = vmatprep.mubr.msk.f32.mxu0 %vm499_vm4, %v1336_v59  ;;  %v6569_v59 = vld [vmem:[%s9168_s2 + $0x68] sm:$0xff] }
 0x8db   :  { %v7247_v60 = vpop.f32.mrf.mxu0 }
 0x8dc   :  { %v6568_v60 = vld [vmem:[%s9168_s2 + $0x60] sm:$0xff] }
 0x8dd   :  { %v1409_v61 = vpop.f32.mrf.mxu1 }
 0x8de   :  { %7256 = vmatmul.mubr.msk.f32.vlgmr.msra.gmra.mxu0 %vm499_vm4, %v1409_v61  ;;  %v6587_v61 = vld [vmem:[%s9142_s9 + $0x78] sm:$0xff] }
 0x8df   :  { %7264 = vmatpush3.msra.mxu0 %v6538_v58  ;;  %v7252_v63 = vpop.f32.mrf.mxu1  ;;  %7271 = vmatprep.mubr.msk.f32.mxu0 %vm191_vm2, %v8091_v1  ;;  %v6570_v58 = vld [vmem:[%s9168_s2 + $0x70] sm:$0xff] }
 0x8e0   :  { %7265 = vmatprep.subr.mxu0 %v6537_v62  ;;  %v6585_v63 = vld [vmem:[%s9142_s9 + $0x68] sm:$0xff] }
 0x8e1   :  { %7266 = vmatpush3.msra.mxu0 %v6537_v62  ;;  %v8289_v4 = vpop.f32.mrf.mxu1  ;;  %v6586_v62 = vld [vmem:[%s9142_s9 + $0x70] sm:$0xff] }
 0x8e2   :  { %7267 = vmatprep.subr.mxu0 %v6536_v0 }
 0x8e3   :  { %7268 = vmatpush3.msra.mxu0 %v6536_v0  ;;  %v8299_v8 = vpop.f32.mrf.mxu1  ;;  %v6584_v0 = vld [vmem:[%s9142_s9 + $0x60] sm:$0xff] }
 0x8e4   :  { %7269 = vmatprep.subr.mxu0 %v6535_v2 }
 0x8e5   :  { %7270 = vmatpush3.msra.mxu0 %v6535_v2  ;;  %v6565_v2 = vld [vmem:[%s9144_s11 + $0x10] sm:$0xff] }
 0x8e6   :  { %7272 = vmatmul.mubr.msk.f32.vlgmr.msra.gmra.mxu0 %vm191_vm2, %v8097_v5  ;;  %7285 = vmatprep.subr.mxu0 %v6554_v6 }
 0x8e7   :  { %7286 = vmatpush3.msra.mxu0 %v6554_v6  ;;  %7293 = vmatprep.mubr.msk.f32.mxu0 %vm191_vm2, %v8091_v1  ;;  %v6579_v6 = vld [vmem:[%s9140_s7 + $0x78] sm:$0xff] }
 0x8e8   :  { %7287 = vmatprep.subr.mxu0 %v6553_v7 }
 0x8e9   :  { %v7284_v12 = vpop.f32.mrf.mxu1  ;;  %7288 = vmatpush3.msra.mxu0 %v6553_v7 }
 0x8ea   :  { %v1750_v14 = vadd.f32 %v7284_v12, %v6548_v10  ;;  %7289 = vmatprep.subr.mxu0 %v6552_v11  ;;  %v6578_v12 = vld [vmem:[%s9140_s7 + $0x70] sm:$0xff] }
 0x8eb   :  { %v1744_v15 = vpop.f32.mrf.mxu1  ;;  %7290 = vmatpush3.msra.mxu0 %v6552_v11 }
 0x8ec   :  { %v1745_v16 = vadd.f32 %v6548_v10, %v1744_v15  ;;  %7291 = vmatprep.subr.mxu0 %v6551_v13  ;;  %v6576_v15 = vld [vmem:[%s9140_s7 + $0x60] sm:$0xff] }
 0x8ed   :  { %7292 = vmatpush3.msra.mxu0 %v6551_v13 }
 0x8ee   :  { %7294 = vmatmul.mubr.msk.f32.vlgmr.msra.gmra.mxu0 %vm191_vm2, %v8097_v5  ;;  %7297 = vmatpush3.xpose.msk.msra.mxu1 %vm499_vm4, %v1745_v16 }
 0x8ef   :  { %7301 = vmatprep.subr.mxu1 %v7868_v9  ;;  %7306 = vmatprep.subr.mxu0 %v7868_v9 }
 0x8f0   :  { %7308 = vmatprep.mubr.msk.f32.mxu0 %vm7869_vm3, %v7868_v9 }
 0x99e   :  { %v8319_v17 = vpop.f32.mrf.mxu0 }
 0x9a0   :  { %v8321_v18 = vpop.f32.mrf.mxu0 }
 0x9a6   :  { %v7273_v19 = vpop.f32.mrf.mxu0 }
 0x9a7   :  { %v1662_v25 = vadd.f32 %v7273_v19, %v6540_v20  ;;  %v6589_v19 = vld [vmem:[%s9143_s10 + $0x3] ss:$0 sm:$0xff] }
 0x9a8   :  { %v1656_v21 = vpop.f32.mrf.mxu0 }
 0x9a9   :  { %v1657_v22 = vadd.f32 %v6540_v20, %v1656_v21 }
 0x9ab   :  { %7299 = vmatmul.mubr.msk.f32.vlgmr.msra.gmra.mxu1 %vm499_vm4, %v1657_v22 }
 0x9ac   :  { %7302 = vmatpush3.xpose.msk.msra.mxu1 %vm499_vm4, %v1750_v14  ;;  %7303 = vmatprep.mubr.msk.f32.mxu1 %vm7869_vm3, %v7868_v9  ;;  %v6577_v14 = vld [vmem:[%s9140_s7 + $0x68] sm:$0xff] }
 0x9ad   :  { %7311 = vmatprep.subr.mxu1 %v7868_v9 }
 0x9ae   :  { %v7295_v27 = vpop.f32.mrf.mxu0 }
 0x9af   :  { %v1838_v28 = vadd.f32 %v7295_v27, %v6556_v24  ;;  %7304 = vmatmul.mubr.msk.f32.vlgmr.msra.gmra.mxu1 %vm499_vm4, %v1662_v25  ;;  %v1574_v25 = vadd.f32 %v8289_v4, %v8319_v17  ;;  %v1569_v27 = vadd.f32 %v8299_v8, %v8321_v18  ;;  %v6573_v4 = vld [vmem:[%s9139_s6 + $0x3] ss:$0 sm:$0xff] }
 0x9b0   :  { %v1832_v29 = vpop.f32.mrf.mxu0  ;;  %7313 = vmatprep.mubr.msk.f32.mxu1 %vm7869_vm3, %v7868_v9 }
 0x9b1   :  { %v1833_v32 = vadd.f32 %v6556_v24, %v1832_v29  ;;  %7312 = vmatpush3.msra.mxu1 %v1838_v28 }
 0x9b2   :  { %7321 = vmatprep.subr.mxu1 %v6571_v51 }
 0x9b3   :  { %7307 = vmatpush3.msra.mxu0 %v1833_v32 }
 0x9b4   :  { %7316 = vmatprep.subr.mxu0 %v6565_v2 }
 0xa6b   :  { %v1913_v33 = vpop.f32.mrf.mxu1 }
 0xa6c   :  { %v1993_v34 = vmul.f32 0.35355338, %v1913_v33 }
 0xa6d   :  { %v7300_v35 = vpop.f32.mrf.mxu1 }
 0xa6e   :  { %v1995_v36 = vsel %vm8143_vm5, %v1993_v34, -1e+30  ;;  %v6581_v34 = vld [vmem:[%s9141_s8 + $0x3] ss:$0 sm:$0xff] }
 0xa6f   :  { %v1989_v37 = vpop.f32.mrf.mxu1  ;;  %v1997_v3 = vsel %vm499_vm4, %v1995_v36, -inf }
 0xa70   :  { %v1994_v23 = vmul.f32 0.35355338, %v1989_v37  ;;  %1998 = vmax.xlane.f32.xlu1 %v1997_v3 }
 0xa71   :  { %v7305_v38 = vpop.f32.mrf.mxu1 }
 0xa72   :  { %v1996_v39 = vsel %vm8143_vm5, %v1994_v23, -1e+30 }
 0xa73   :  { %v2000_v40 = vsel %vm499_vm4, %v1996_v39, -inf }
 0xa74   :  { %2001 = vmax.xlane.f32.xlu0 %v2000_v40 }
 0xaf9   :  { %v1999_v41 = vpop.xlane.xlu1 %1998 }
 0xafa   :  { %v2003_v42 = vsub.f32 %v1995_v36, %v1999_v41 }
 0xafc   :  { %v2005_v43 = vmul.f32 1.442695, %v2003_v42 }
 0xafd   :  { %v2002_v44 = vpop.xlane.xlu0 %2001 }
 0xafe   :  { %7765 = vpow2.f32 %v2005_v43  ;;  %v2004_v45 = vsub.f32 %v1996_v39, %v2002_v44 }
 0xb00   :  { %v2007_v46 = vmul.f32 1.442695, %v2004_v45 }
 0xb02   :  { %7767 = vpow2.f32 %v2007_v46 }
 0xb0b   :  { %v7766_v47 = vpop.eup %7765 }
 0xb0c   :  { %v2009_v48 = vsel %vm499_vm4, %v7766_v47, 0.0 }
 0xb0d   :  { %2010 = vadd.xlane.f32.xlu1 %v2009_v48 }
 0xb0f   :  { %v7768_v49 = vpop.eup %7767 }
 0xb10   :  { %v2012_v50 = vsel %vm499_vm4, %v7768_v49, 0.0 }
 0xb11   :  { %2013 = vadd.xlane.f32.xlu0 %v2012_v50 }
 0xb96   :  { %v2011_v52 = vpop.xlane.xlu1 %2010 }
 0xb97   :  { %7769 = vrcp.f32 %v2011_v52 }
 0xb9a   :  { %v2014_v53 = vpop.xlane.xlu0 %2013 }
 0xb9b   :  { %7771 = vrcp.f32 %v2014_v53 }
 0xba4   :  { %v7770_v54 = vpop.eup %7769 }
 0xba5   :  { %v2016_v55 = vmul.f32 %v7770_v54, %v7766_v47 }
 0xba7   :  { %7309 = vmatmul.mubr.msk.f32.vlgmr.msra.gmra.mxu0 %vm499_vm4, %v2016_v55 }
 0xba8   :  { %v7772_v56 = vpop.eup %7771  ;;  %7317 = vmatpush3.msra.mxu0 %v6565_v2 }
 0xba9   :  { %v2018_v57 = vmul.f32 %v7772_v56, %v7768_v49  ;;  %7332 = vmatprep.subr.mxu0 %v6579_v6 }
 0xbab   :  { %7314 = vmatmul.mubr.msk.f32.vlgmr.msra.gmra.mxu1 %vm499_vm4, %v2018_v57 }
 0xbac   :  { %7322 = vmatpush3.msra.mxu1 %v6571_v51  ;;  %7329 = vmatprep.mubr.msk.f32.mxu1 %vm191_vm2, %v8091_v1 }
 0xbad   :  { %7323 = vmatprep.subr.mxu1 %v6570_v58 }
 0xbae   :  { %7324 = vmatpush3.msra.mxu1 %v6570_v58 }
 0xbaf   :  { %7325 = vmatprep.subr.mxu1 %v6569_v59 }
 0xbb0   :  { %7326 = vmatpush3.msra.mxu1 %v6569_v59 }
 0xbb1   :  { %7327 = vmatprep.subr.mxu1 %v6568_v60 }
 0xbb2   :  { %7328 = vmatpush3.msra.mxu1 %v6568_v60 }
 0xbb3   :  { %7330 = vmatmul.mubr.msk.f32.vlgmr.msra.gmra.mxu1 %vm191_vm2, %v8097_v5  ;;  %7343 = vmatprep.subr.mxu1 %v6587_v61 }
 0xbb4   :  { %7344 = vmatpush3.msra.mxu1 %v6587_v61  ;;  %7351 = vmatprep.mubr.msk.f32.mxu1 %vm191_vm2, %v8091_v1  ;;  %v6598_v61 = vld [vmem:[%s9144_s11 + $0x18] sm:$0xff] }
 0xbb5   :  { %7345 = vmatprep.subr.mxu1 %v6586_v62 }
 0xbb6   :  { %7346 = vmatpush3.msra.mxu1 %v6586_v62 }
 0xbb7   :  { %7347 = vmatprep.subr.mxu1 %v6585_v63 }
 0xbb8   :  { %7348 = vmatpush3.msra.mxu1 %v6585_v63 }
 0xbb9   :  { %7349 = vmatprep.subr.mxu1 %v6584_v0 }
 0xbba   :  { %7350 = vmatpush3.msra.mxu1 %v6584_v0 }
 0xbbb   :  { %7352 = vmatmul.mubr.msk.f32.vlgmr.msra.gmra.mxu1 %vm191_vm2, %v8097_v5  ;;  %7364 = vmatprep.subr.mxu1 %v7868_v9 }
 0xbbc   :  { %7366 = vmatprep.mubr.msk.f32.mxu1 %vm7869_vm3, %v7868_v9 }
 0xc67   :  { %v2088_v7 = vpop.f32.mrf.mxu0 }
 0xc68   :  { %7318 = vmatprep.mubr.msk.f32.mxu0 %vm499_vm4, %v2088_v7 }
 0xc69   :  { %v7310_v10 = vpop.f32.mrf.mxu0 }
 0xc6a   :  { %v6601_v10 = vld [vmem:[%s9145_s12] ss:$0 sm:$0xff] }
 0xc6b   :  { %v2161_v11 = vpop.f32.mrf.mxu1 }
 0xc6c   :  { %7319 = vmatmul.mubr.msk.f32.vlgmr.msra.gmra.mxu0 %vm499_vm4, %v2161_v11 }
 0xc6d   :  { %7333 = vmatpush3.msra.mxu0 %v6579_v6  ;;  %v7315_v13 = vpop.f32.mrf.mxu1  ;;  %7340 = vmatprep.mubr.msk.f32.mxu0 %vm191_vm2, %v8091_v1 }
 0xc6e   :  { %7334 = vmatprep.subr.mxu0 %v6578_v12 }
 0xc6f   :  { %7335 = vmatpush3.msra.mxu0 %v6578_v12 }
 0xc70   :  { %7336 = vmatprep.subr.mxu0 %v6577_v14 }
 0xc71   :  { %7337 = vmatpush3.msra.mxu0 %v6577_v14 }
 0xc72   :  { %7338 = vmatprep.subr.mxu0 %v6576_v15 }
 0xc73   :  { %7339 = vmatpush3.msra.mxu0 %v6576_v15  ;;  %v7331_v1 = vpop.f32.mrf.mxu1 }
 0xc74   :  { %7341 = vmatmul.mubr.msk.f32.vlgmr.msra.gmra.mxu0 %vm191_vm2, %v8097_v5  ;;  %7354 = vmatprep.subr.mxu0 %v7868_v9  ;;  %v2335_v18 = vadd.f32 %v7331_v1, %v6573_v4 }
 0xc75   :  { %7356 = vmatprep.mubr.msk.f32.mxu0 %vm7869_vm3, %v7868_v9  ;;  %v2329_v16 = vpop.f32.mrf.mxu1 }
 0xc76   :  { %v2330_v17 = vadd.f32 %v6573_v4, %v2329_v16 }
 0xc7b   :  { %v7353_v20 = vpop.f32.mrf.mxu1 }
 0xc7c   :  { %v2511_v21 = vadd.f32 %v7353_v20, %v6589_v19 }
 0xc7d   :  { %v2505_v22 = vpop.f32.mrf.mxu1 }
 0xc7e   :  { %v2506_v24 = vadd.f32 %v6589_v19, %v2505_v22 }
 0xc80   :  { %7365 = vmatpush3.msra.mxu1 %v2506_v24 }
 0xc81   :  { %7374 = vmatprep.subr.mxu1 %v6598_v61 }
 0xd2c   :  { %v7320_v5 = vpop.f32.mrf.mxu0 }
 0xd2d   :  { %v8413_v28 = vadd.f32 %v7320_v5, %v1574_v25 }
 0xd2e   :  { %v2239_v29 = vpop.f32.mrf.mxu0 }
 0xd2f   :  { %v8415_v32 = vadd.f32 %v2239_v29, %v1569_v27  ;;  %v2981_v29 = vld [vmem:[%s9148_s15 + $0x18] sm:$0xff] }
 0xd34   :  { %v7342_v33 = vpop.f32.mrf.mxu0 }
 0xd35   :  { %v2423_v8 = vadd.f32 %v7342_v33, %v6581_v34  ;;  %v2979_v33 = vld [vmem:[%s9148_s15 + $0x8] sm:$0xff] }
 0xd36   :  { %v2417_v35 = vpop.f32.mrf.mxu0 }
 0xd37   :  { %v2418_v36 = vadd.f32 %v6581_v34, %v2417_v35  ;;  %v2978_v34 = vld [vmem:[%s9148_s15] sm:$0xff] }
 0xd39   :  { %7355 = vmatpush3.xpose.msk.msra.mxu0 %vm499_vm4, %v2418_v36 }
 0xd3a   :  { %7359 = vmatprep.subr.mxu0 %v7868_v9 }
 0xd3c   :  { %7357 = vmatmul.mubr.msk.f32.vlgmr.msra.gmra.mxu0 %vm499_vm4, %v2330_v17 }
 0xd3d   :  { %7360 = vmatpush3.xpose.msk.msra.mxu0 %vm499_vm4, %v2423_v8  ;;  %7361 = vmatprep.mubr.msk.f32.mxu0 %vm7869_vm3, %v7868_v9 }
 0xd3e   :  { %7369 = vmatprep.subr.mxu0 %v7868_v9 }
 0xd40   :  { %7362 = vmatmul.mubr.msk.f32.vlgmr.msra.gmra.mxu0 %vm499_vm4, %v2335_v18 }
 0xd41   :  { %7370 = vmatpush3.msra.mxu0 %v2511_v21  ;;  %7371 = vmatprep.mubr.msk.f32.mxu0 %vm7869_vm3, %v7868_v9 }
 0xd42   :  { %7379 = vmatprep.subr.mxu0 %v2981_v29 }
 0xdfc   :  { %v2586_v37 = vpop.f32.mrf.mxu0 }
 0xdfd   :  { %v2666_v3 = vmul.f32 0.35355338, %v2586_v37 }
 0xdfe   :  { %v7358_v23 = vpop.f32.mrf.mxu0 }
 0xdff   :  { %v2668_v38 = vsel %vm8143_vm5, %v2666_v3, -1e+30  ;;  %v6602_v3 = vld [vmem:[%s9146_s13] ss:$0 sm:$0xff] }
 0xe00   :  { %v2662_v39 = vpop.f32.mrf.mxu0  ;;  %v2670_v40 = vsel %vm499_vm4, %v2668_v38, -inf }
 0xe01   :  { %v2667_v41 = vmul.f32 0.35355338, %v2662_v39  ;;  %2671 = vmax.xlane.f32.xlu1 %v2670_v40 }
 0xe02   :  { %v7363_v42 = vpop.f32.mrf.mxu0 }
 0xe03   :  { %v2669_v43 = vsel %vm8143_vm5, %v2667_v41, -1e+30  ;;  %v6603_v41 = vld [vmem:[%s9147_s14] ss:$0 sm:$0xff] }
 0xe04   :  { %v2673_v44 = vsel %vm499_vm4, %v2669_v43, -inf }
 0xe05   :  { %2674 = vmax.xlane.f32.xlu0 %v2673_v44 }
 0xe8a   :  { %v2672_v45 = vpop.xlane.xlu1 %2671 }
 0xe8b   :  { %v2676_v46 = vsub.f32 %v2668_v38, %v2672_v45  ;;  %v3139_v45 = vld [vmem:[%s9150_s17 + $0x78] sm:$0xff] }
 0xe8d   :  { %v2678_v47 = vmul.f32 1.442695, %v2676_v46  ;;  %v3138_v46 = vld [vmem:[%s9150_s17 + $0x70] sm:$0xff] }
 0xe8e   :  { %v2675_v48 = vpop.xlane.xlu0 %2674 }
 0xe8f   :  { %7773 = vpow2.f32 %v2678_v47  ;;  %v2677_v49 = vsub.f32 %v2669_v43, %v2675_v48  ;;  %v3137_v47 = vld [vmem:[%s9150_s17 + $0x68] sm:$0xff]  ;;  %v3136_v48 = vld [vmem:[%s9150_s17 + $0x60] sm:$0xff] }
 0xe91   :  { %v2680_v50 = vmul.f32 1.442695, %v2677_v49  ;;  %v3135_v49 = vld [vmem:[%s9150_s17 + $0x58] sm:$0xff] }
 0xe93   :  { %7775 = vpow2.f32 %v2680_v50  ;;  %v3134_v50 = vld [vmem:[%s9150_s17 + $0x50] sm:$0xff] }
 0xe9c   :  { %v7774_v51 = vpop.eup %7773 }
 0xe9d   :  { %v2682_v52 = vsel %vm499_vm4, %v7774_v51, 0.0 }
 0xe9e   :  { %2683 = vadd.xlane.f32.xlu1 %v2682_v52  ;;  %v3132_v52 = vld [vmem:[%s9150_s17 + $0x40] sm:$0xff] }
 0xea0   :  { %v7776_v53 = vpop.eup %7775 }
 0xea1   :  { %v2685_v54 = vsel %vm499_vm4, %v7776_v53, 0.0 }
 0xea2   :  { %2686 = vadd.xlane.f32.xlu0 %v2685_v54  ;;  %v3130_v54 = vld [vmem:[%s9150_s17 + $0x30] sm:$0xff] }
 0xf27   :  { %v2684_v55 = vpop.xlane.xlu1 %2683 }
 0xf28   :  { %7777 = vrcp.f32 %v2684_v55  ;;  %v3129_v55 = vld [vmem:[%s9150_s17 + $0x28] sm:$0xff] }
 0xf2b   :  { %v2687_v56 = vpop.xlane.xlu0 %2686 }
 0xf2c   :  { %7779 = vrcp.f32 %v2687_v56  ;;  %v3128_v56 = vld [vmem:[%s9150_s17 + $0x20] sm:$0xff] }
 0xf35   :  { %v7778_v57 = vpop.eup %7777 }
 0xf36   :  { %v2689_v58 = vmul.f32 %v7778_v57, %v7774_v51  ;;  %v3133_v51 = vld [vmem:[%s9150_s17 + $0x48] sm:$0xff]  ;;  %v3127_v57 = vld [vmem:[%s9150_s17 + $0x18] sm:$0xff] }
 0xf38   :  { %7367 = vmatmul.mubr.msk.f32.vlgmr.msra.gmra.mxu1 %vm499_vm4, %v2689_v58  ;;  %v3126_v58 = vld [vmem:[%s9150_s17 + $0x10] sm:$0xff] }
 0xf39   :  { %v7780_v59 = vpop.eup %7779  ;;  %7375 = vmatpush3.msra.mxu1 %v6598_v61  ;;  %v6604_v61 = vld [vmem:[%s9149_s16] ss:$0 sm:$0xff] }
 0xf3a   :  { %v2691_v60 = vmul.f32 %v7780_v59, %v7776_v53  ;;  %7390 = vmatprep.subr.mxu1 %v3139_v45  ;;  %v3131_v53 = vld [vmem:[%s9150_s17 + $0x38] sm:$0xff]  ;;  %v3125_v59 = vld [vmem:[%s9150_s17 + $0x8] sm:$0xff] }
 0xf3c   :  { %7372 = vmatmul.mubr.msk.f32.vlgmr.msra.gmra.mxu0 %vm499_vm4, %v2691_v60  ;;  %v3124_v60 = vld [vmem:[%s9150_s17] sm:$0xff] }
 0xf3d   :  { %7380 = vmatpush3.msra.mxu0 %v2981_v29 }
 0xff8   :  { %v2761_v62 = vpop.f32.mrf.mxu1 }
 0xff9   :  { %7376 = vmatprep.mubr.msk.f32.mxu1 %vm499_vm4, %v2761_v62 }
 0xffa   :  { %v7368_v63 = vpop.f32.mrf.mxu1 }
 0xffc   :  { %v2834_v0 = vpop.f32.mrf.mxu0 }
 0xffd   :  { %7377 = vmatmul.mubr.msk.f32.vlgmr.msra.gmra.mxu1 %vm499_vm4, %v2834_v0 }
 0xffe   :  { %v7373_v2 = vpop.f32.mrf.mxu0  ;;  %7391 = vmatpush3.msra.mxu1 %v3139_v45 }
 0xfff   :  { %7392 = vmatprep.subr.mxu1 %v3138_v46 }
0x1000   :  { %7393 = vmatpush3.msra.mxu1 %v3138_v46 }
0x1001   :  { %7394 = vmatprep.subr.mxu1 %v3137_v47 }
0x1002   :  { %7395 = vmatpush3.msra.mxu1 %v3137_v47 }
0x1003   :  { %7396 = vmatprep.subr.mxu1 %v3136_v48 }
0x1004   :  { %7397 = vmatpush3.msra.mxu1 %v3136_v48 }
0x1005   :  { %7398 = vmatprep.subr.mxu1 %v3135_v49 }
0x1006   :  { %7399 = vmatpush3.msra.mxu1 %v3135_v49 }
0x1007   :  { %7400 = vmatprep.subr.mxu1 %v3134_v50 }
0x1008   :  { %7401 = vmatpush3.msra.mxu1 %v3134_v50 }
0x1009   :  { %7402 = vmatprep.subr.mxu1 %v3133_v51 }
0x100a   :  { %7403 = vmatpush3.msra.mxu1 %v3133_v51 }
0x100b   :  { %7404 = vmatprep.subr.mxu1 %v3132_v52 }
0x100c   :  { %7405 = vmatpush3.msra.mxu1 %v3132_v52 }
0x100d   :  { %7406 = vmatprep.subr.mxu1 %v3131_v53 }
0x100e   :  { %7407 = vmatpush3.msra.mxu1 %v3131_v53 }
0x100f   :  { %7408 = vmatprep.subr.mxu1 %v3130_v54 }
0x1010   :  { %7409 = vmatpush3.msra.mxu1 %v3130_v54 }
0x1011   :  { %7410 = vmatprep.subr.mxu1 %v3129_v55 }
0x1012   :  { %7411 = vmatpush3.msra.mxu1 %v3129_v55 }
0x1013   :  { %7412 = vmatprep.subr.mxu1 %v3128_v56 }
0x1014   :  { %7413 = vmatpush3.msra.mxu1 %v3128_v56 }
0x1015   :  { %7414 = vmatprep.subr.mxu1 %v3127_v57 }
0x1016   :  { %7415 = vmatpush3.msra.mxu1 %v3127_v57  ;;  %v6607_v57 = vld [vmem:[%s9151_s18] ss:$0 sm:$0xff] }
0x1017   :  { %7416 = vmatprep.subr.mxu1 %v3126_v58 }
0x1018   :  { %7417 = vmatpush3.msra.mxu1 %v3126_v58 }
0x1019   :  { %7418 = vmatprep.subr.mxu1 %v3125_v59 }
0x101a   :  { %7419 = vmatpush3.msra.mxu1 %v3125_v59 }
0x101b   :  { %7420 = vmatprep.subr.mxu1 %v3124_v60 }
0x101c   :  { %7421 = vmatpush3.msra.mxu1 %v3124_v60 }
0x101d   :  { %7463 = vmatprep.subr.mxu1 %v7868_v9 }
0x10bd   :  { %v7378_v6 = vpop.f32.mrf.mxu1 }
0x10be   :  { %v2922_v7 = vadd.f32 %v7378_v6, %v8413_v28 }
0x10bf   :  { %v2912_v11 = vpop.f32.mrf.mxu1 }
0x10c0   :  { %v2924_v12 = vadd.f32 %v2922_v7, %v8048_v31  ;;  %v2921_v13 = vadd.f32 %v2912_v11, %v8415_v32  ;;  %v2980_v32 = vld [vmem:[%s9148_s15 + $0x10] sm:$0xff] }
0x10c1   :  { %7381 = vmatprep.subr.mxu0 %v2980_v32 }
0x10c2   :  { %v8454_v14 = vadd.f32 %v6601_v10, %v2924_v12  ;;  %v2923_v15 = vadd.f32 %v2921_v13, %v8046_v30  ;;  %7382 = vmatpush3.msra.mxu0 %v2980_v32 }
0x10c3   :  { %7383 = vmatprep.subr.mxu0 %v2979_v33 }
0x10c4   :  { %v8457_v1 = vadd.f32 %v6601_v10, %v2923_v15  ;;  %v2939_v16 = vsel %vm191_vm2, %v8454_v14, 0.0  ;;  %7384 = vmatpush3.msra.mxu0 %v2979_v33 }
0x10c5   :  { %2940 = vadd.xlane.f32.xlu0 %v2939_v16  ;;  %7385 = vmatprep.subr.mxu0 %v2978_v34 }
0x10c6   :  { %v2936_v19 = vsel %vm191_vm2, %v8457_v1, 0.0  ;;  %7386 = vmatpush3.msra.mxu0 %v2978_v34 }
0x10c7   :  { %2937 = vadd.xlane.f32.xlu1 %v2936_v19 }
0x114e   :  { %v2941_v20 = vpop.xlane.xlu0 %2940 }
0x114f   :  { %v2943_v21 = vmul.f32 0.03125, %v2941_v20 }
0x1150   :  { %v2938_v22 = vpop.xlane.xlu1 %2937 }
0x1151   :  { %v2945_v31 = vsub.f32 %v8454_v14, %v2943_v21  ;;  %v2942_v24 = vmul.f32 0.03125, %v2938_v22 }
0x1153   :  { %v2944_v25 = vsub.f32 %v8457_v1, %v2942_v24  ;;  %v2947_v5 = vmul.f32 %v2945_v31, %v2945_v31 }
0x1155   :  { %v2951_v30 = vsel %vm191_vm2, %v2947_v5, 0.0  ;;  %v2946_v27 = vmul.f32 %v2944_v25, %v2944_v25 }
0x1156   :  { %2952 = vadd.xlane.f32.xlu0 %v2951_v30 }
0x1157   :  { %v2948_v28 = vsel %vm191_vm2, %v2946_v27, 0.0 }
0x1158   :  { %2949 = vadd.xlane.f32.xlu1 %v2948_v28 }
0x11df   :  { %v2953_v35 = vpop.xlane.xlu0 %2952 }
0x11e0   :  { %v2955_v36 = vmul.f32 0.03125, %v2953_v35 }
0x11e1   :  { %v2950_v4 = vpop.xlane.xlu1 %2949 }
0x11e2   :  { %v2957_v17 = vadd.f32 1e-05, %v2955_v36  ;;  %v2954_v8 = vmul.f32 0.03125, %v2950_v4 }
0x11e4   :  { %7781 = vrsqrt.f32 %v2957_v17  ;;  %v2956_v18 = vadd.f32 1e-05, %v2954_v8 }
0x11e6   :  { %7783 = vrsqrt.f32 %v2956_v18 }
0x11f1   :  { %v7782_v37 = vpop.eup %7781 }
0x11f2   :  { %v2961_v23 = vmul.f32 %v7782_v37, %v2945_v31 }
0x11f3   :  { %v7784_v38 = vpop.eup %7783 }
0x11f4   :  { %v2960_v39 = vmul.f32 %v7784_v38, %v2944_v25  ;;  %v2969_v40 = vmul.f32 %v6602_v3, %v2961_v23 }
0x11f6   :  { %v2968_v42 = vmul.f32 %v6602_v3, %v2960_v39  ;;  %v2977_v44 = vadd.f32 %v6603_v41, %v2969_v40 }
0x11f8   :  { %v2976_v43 = vadd.f32 %v6603_v41, %v2968_v42 }
0x11fa   :  { %7387 = vmatprep.mubr.msk.f32.mxu0 %vm191_vm2, %v2976_v43 }
0x11fb   :  { %7388 = vmatmul.mubr.msk.f32.vlgmr.msra.gmra.mxu0 %vm191_vm2, %v2977_v44  ;;  %v7870_v44 = vmov -1.0  }
0x12bb   :  { %v7389_v62 = vpop.f32.mrf.mxu0 }
0x12bc   :  { %v3067_v63 = vadd.f32 %v7389_v62, %v6604_v61 }
0x12bd   :  { %v3061_v0 = vpop.f32.mrf.mxu0 }
0x12be   :  { %v3073_v2 = vmul.f32 0.70710677, %v3067_v63  ;;  %v3062_v6 = vadd.f32 %v6604_v61, %v3061_v0  ;;  %v3071_v54 = vmul.f32 0.5, %v3067_v63 }
0x12c0   :  { %v3079_v7 = vand.u32 2147483647, %v3073_v2  ;;  %v3072_v10 = vmul.f32 0.70710677, %v3062_v6  ;;  %vm3075_vm6 = vcmp.ge.f32.partialorder %v3073_v2, 0.0  ;;  %v3070_v52 = vmul.f32 0.5, %v3062_v6 }
0x12c1   :  { %v3077_v45 = vsel %vm3075_vm6, 1.0, %v7870_v44 }
0x12c2   :  { %v3081_v11 = vmul.f32 0.3275911, %v3079_v7  ;;  %v3078_v12 = vand.u32 2147483647, %v3072_v10  ;;  %v3107_v19 = vsub.f32 0.0, %v3079_v7  ;;  %vm3074_vm7 = vcmp.ge.f32.partialorder %v3072_v10, 0.0 }
0x12c3   :  { %v3076_v49 = vsel %vm3074_vm7, 1.0, %v7870_v44 }
0x12c4   :  { %v3083_v13 = vadd.f32 1.0, %v3081_v11  ;;  %v3080_v15 = vmul.f32 0.3275911, %v3078_v12  ;;  %v3106_v20 = vsub.f32 0.0, %v3078_v12  ;;  %v3109_v21 = vmul.f32 %v3107_v19, %v3079_v7  ;;  %v6615_v19 = vld [vmem:[%s9168_s2 + $0x98] sm:$0xff] }
0x12c5   :  { %7425 = vmatprep.subr.mxu0 %v6615_v19 }
0x12c6   :  { %7785 = vrcp.f32 %v3083_v13  ;;  %v3082_v16 = vadd.f32 1.0, %v3080_v15  ;;  %v3108_v31 = vmul.f32 %v3106_v20, %v3078_v12  ;;  %v3112_v25 = vmul.f32 1.442695, %v3109_v21  ;;  %7426 = vmatpush3.msra.mxu0 %v6615_v19  ;;  %v6614_v20 = vld [vmem:[%s9168_s2 + $0x90] sm:$0xff]  ;;  %v6613_v21 = vld [vmem:[%s9168_s2 + $0x88] sm:$0xff] }
0x12c7   :  { %7427 = vmatprep.subr.mxu0 %v6614_v20 }
0x12c8   :  { %7787 = vrcp.f32 %v3082_v16  ;;  %v3110_v27 = vmul.f32 1.442695, %v3108_v31  ;;  %7428 = vmatpush3.msra.mxu0 %v6614_v20  ;;  %v6623_v31 = vld [vmem:[%s9140_s7 + $0x98] sm:$0xff] }
0x12c9   :  { %7789 = vpow2.f32 %v3112_v25  ;;  %7429 = vmatprep.subr.mxu0 %v6613_v21 }
0x12ca   :  { %7791 = vpow2.f32 %v3110_v27  ;;  %7430 = vmatpush3.msra.mxu0 %v6613_v21 }
0x12d3   :  { %v7786_v22 = vpop.eup %7785 }
0x12d4   :  { %v3089_v24 = vmul.f32 1.0614054, %v7786_v22 }
0x12d5   :  { %v7788_v5 = vpop.eup %7787 }
0x12d6   :  { %v3091_v30 = vadd.f32 -1.4531521, %v3089_v24  ;;  %v3088_v28 = vmul.f32 1.0614054, %v7788_v5  ;;  %v7790_v38 = vpop.eup %7789 }
0x12d7   :  { %v7792_v42 = vpop.eup %7791 }
0x12d8   :  { %v3093_v29 = vmul.f32 %v7786_v22, %v3091_v30  ;;  %v3090_v32 = vadd.f32 -1.4531521, %v3088_v28 }
0x12da   :  { %v3095_v33 = vadd.f32 1.4214138, %v3093_v29  ;;  %v3092_v34 = vmul.f32 %v7788_v5, %v3090_v32  ;;  %v6610_v32 = vld [vmem:[%s9169_s28 + $0x1] ss:$0 sm:$0xff] }
0x12dc   :  { %v3097_v35 = vmul.f32 %v7786_v22, %v3095_v33  ;;  %v3094_v36 = vadd.f32 1.4214138, %v3092_v34 }
0x12de   :  { %v3099_v4 = vadd.f32 -0.28449672, %v3097_v35  ;;  %v3096_v17 = vmul.f32 %v7788_v5, %v3094_v36 }
0x12e0   :  { %v3101_v8 = vmul.f32 %v7786_v22, %v3099_v4  ;;  %v3098_v18 = vadd.f32 -0.28449672, %v3096_v17  ;;  %v6611_v4 = vld [vmem:[%s9170_s4 + $0x1] ss:$0 sm:$0xff] }
0x12e2   :  { %v3103_v37 = vadd.f32 0.2548296, %v3101_v8  ;;  %v3100_v3 = vmul.f32 %v7788_v5, %v3098_v18 }
0x12e4   :  { %v3105_v23 = vmul.f32 %v7786_v22, %v3103_v37  ;;  %v3102_v39 = vadd.f32 0.2548296, %v3100_v3  ;;  %v6612_v22 = vld [vmem:[%s9168_s2 + $0x80] sm:$0xff]  ;;  %v6622_v37 = vld [vmem:[%s9140_s7 + $0x90] sm:$0xff]  ;;  %v6621_v3 = vld [vmem:[%s9140_s7 + $0x88] sm:$0xff] }
0x12e5   :  { %7431 = vmatprep.subr.mxu0 %v6612_v22 }
0x12e6   :  { %v3115_v40 = vmul.f32 %v7790_v38, %v3105_v23  ;;  %v3104_v41 = vmul.f32 %v7788_v5, %v3102_v39  ;;  %7432 = vmatpush3.msra.mxu0 %v6612_v22  ;;  %v6620_v23 = vld [vmem:[%s9140_s7 + $0x80] sm:$0xff]  ;;  %v6631_v38 = vld [vmem:[%s9142_s9 + $0x98] sm:$0xff]  ;;  %v6630_v39 = vld [vmem:[%s9142_s9 + $0x90] sm:$0xff] }
0x12e7   :  { %7436 = vmatprep.subr.mxu0 %v6623_v31 }
0x12e8   :  { %v3117_v43 = vsub.f32 1.0, %v3115_v40  ;;  %v3114_v46 = vmul.f32 %v7792_v42, %v3104_v41  ;;  %v6629_v40 = vld [vmem:[%s9142_s9 + $0x88] sm:$0xff]  ;;  %v6628_v41 = vld [vmem:[%s9142_s9 + $0x80] sm:$0xff] }
0x12ea   :  { %v3119_v47 = vmul.f32 %v3117_v43, %v3077_v45  ;;  %v3116_v48 = vsub.f32 1.0, %v3114_v46  ;;  %v6625_v45 = vld [vmem:[%s9141_s8 + $0x4] ss:$0 sm:$0xff] }
0x12ec   :  { %v3118_v50 = vmul.f32 %v3116_v48, %v3076_v49  ;;  %v3121_v51 = vadd.f32 1.0, %v3119_v47  ;;  %v6617_v47 = vld [vmem:[%s9139_s6 + $0x4] ss:$0 sm:$0xff] }
0x12ee   :  { %v3120_v53 = vadd.f32 1.0, %v3118_v50  ;;  %v3123_v56 = vmul.f32 %v3121_v51, %v3071_v54 }
0x12f0   :  { %v3122_v55 = vmul.f32 %v3120_v53, %v3070_v52  ;;  %v6633_v53 = vld [vmem:[%s9143_s10 + $0x4] ss:$0 sm:$0xff] }
0x12f2   :  { %7422 = vmatprep.mubr.f32.mxu1 %v3122_v55 }
0x12f3   :  { %7423 = vmatmul.mubr.f32.vlgmr.msra.gmra.mxu1 %v3123_v56 }
0x12f4   :  { %7465 = vmatprep.mubr.msk.f32.mxu1 %vm7869_vm3, %v7868_v9 }
0x13b3   :  { %v7424_v58 = vpop.f32.mrf.mxu1 }
0x13b4   :  { %v3219_v59 = vadd.f32 %v7424_v58, %v6607_v57 }
0x13b5   :  { %v3213_v60 = vpop.f32.mrf.mxu1 }
0x13b6   :  { %v8547_v61 = vadd.f32 %v3219_v59, %v8454_v14  ;;  %v3214_v62 = vadd.f32 %v6607_v57, %v3213_v60 }
0x13b8   :  { %v8550_v63 = vadd.f32 %v3214_v62, %v8457_v1  ;;  %v3231_v0 = vsel %vm191_vm2, %v8547_v61, 0.0 }
0x13b9   :  { %3232 = vadd.xlane.f32.xlu0 %v3231_v0 }
0x13ba   :  { %v3228_v2 = vsel %vm191_vm2, %v8550_v63, 0.0 }
0x13bb   :  { %3229 = vadd.xlane.f32.xlu1 %v3228_v2 }
0x1442   :  { %v3233_v6 = vpop.xlane.xlu0 %3232 }
0x1443   :  { %v3235_v7 = vmul.f32 0.03125, %v3233_v6 }
0x1444   :  { %v3230_v10 = vpop.xlane.xlu1 %3229 }
0x1445   :  { %v3237_v11 = vsub.f32 %v8547_v61, %v3235_v7  ;;  %v3234_v12 = vmul.f32 0.03125, %v3230_v10 }
0x1447   :  { %v3236_v14 = vsub.f32 %v8550_v63, %v3234_v12  ;;  %v3239_v13 = vmul.f32 %v3237_v11, %v3237_v11 }
0x1449   :  { %v3243_v1 = vsel %vm191_vm2, %v3239_v13, 0.0  ;;  %v3238_v15 = vmul.f32 %v3236_v14, %v3236_v14 }
0x144a   :  { %3244 = vadd.xlane.f32.xlu0 %v3243_v1 }
0x144b   :  { %v3240_v16 = vsel %vm191_vm2, %v3238_v15, 0.0 }
0x144c   :  { %3241 = vadd.xlane.f32.xlu1 %v3240_v16 }
0x14d3   :  { %v3245_v24 = vpop.xlane.xlu0 %3244 }
0x14d4   :  { %v3247_v25 = vmul.f32 0.03125, %v3245_v24  ;;  %v6646_v24 = vld [vmem:[%s9168_s2 + $0xb8] sm:$0xff] }
0x14d5   :  { %v3242_v5 = vpop.xlane.xlu1 %3241 }
0x14d6   :  { %v3249_v30 = vadd.f32 1e-05, %v3247_v25  ;;  %v3246_v27 = vmul.f32 0.03125, %v3242_v5 }
0x14d8   :  { %7793 = vrsqrt.f32 %v3249_v30  ;;  %v3248_v28 = vadd.f32 1e-05, %v3246_v27 }
0x14da   :  { %7795 = vrsqrt.f32 %v3248_v28 }
0x14e5   :  { %v7794_v29 = vpop.eup %7793 }
0x14e6   :  { %v3253_v33 = vmul.f32 %v7794_v29, %v3237_v11  ;;  %v6653_v29 = vld [vmem:[%s9140_s7 + $0xb0] sm:$0xff] }
0x14e7   :  { %v7796_v34 = vpop.eup %7795 }
0x14e8   :  { %v3252_v35 = vmul.f32 %v7796_v34, %v3236_v14  ;;  %v3261_v36 = vmul.f32 %v6610_v32, %v3253_v33  ;;  %v6645_v33 = vld [vmem:[%s9168_s2 + $0xb0] sm:$0xff]  ;;  %v6652_v34 = vld [vmem:[%s9140_s7 + $0xa8] sm:$0xff] }
0x14ea   :  { %v3260_v17 = vmul.f32 %v6610_v32, %v3252_v35  ;;  %v8583_v18 = vadd.f32 %v6611_v4, %v3261_v36  ;;  %v6644_v35 = vld [vmem:[%s9168_s2 + $0xa8] sm:$0xff]  ;;  %v6651_v36 = vld [vmem:[%s9140_s7 + $0xa0] sm:$0xff] }
0x14ec   :  { %v8581_v8 = vadd.f32 %v6611_v4, %v3260_v17  ;;  %v6643_v4 = vld [vmem:[%s9168_s2 + $0xa0] sm:$0xff]  ;;  %v6662_v17 = vld [vmem:[%s9142_s9 + $0xb8] sm:$0xff] }
0x14ee   :  { %7433 = vmatprep.mubr.msk.f32.mxu0 %vm191_vm2, %v8581_v8 }
0x14ef   :  { %7434 = vmatmul.mubr.msk.f32.vlgmr.msra.gmra.mxu0 %vm191_vm2, %v8583_v18 }
0x14f0   :  { %7437 = vmatpush3.msra.mxu0 %v6623_v31  ;;  %7444 = vmatprep.mubr.msk.f32.mxu0 %vm191_vm2, %v8581_v8  ;;  %v6654_v31 = vld [vmem:[%s9140_s7 + $0xb8] sm:$0xff] }
0x14f1   :  { %7438 = vmatprep.subr.mxu0 %v6622_v37 }
0x14f2   :  { %7439 = vmatpush3.msra.mxu0 %v6622_v37  ;;  %v6661_v37 = vld [vmem:[%s9142_s9 + $0xb0] sm:$0xff] }
0x14f3   :  { %7440 = vmatprep.subr.mxu0 %v6621_v3 }
0x14f4   :  { %7441 = vmatpush3.msra.mxu0 %v6621_v3  ;;  %v6660_v3 = vld [vmem:[%s9142_s9 + $0xa8] sm:$0xff] }
0x14f5   :  { %7442 = vmatprep.subr.mxu0 %v6620_v23 }
0x14f6   :  { %7443 = vmatpush3.msra.mxu0 %v6620_v23  ;;  %v6659_v23 = vld [vmem:[%s9142_s9 + $0xa0] sm:$0xff] }
0x14f7   :  { %7445 = vmatmul.mubr.msk.f32.vlgmr.msra.gmra.mxu0 %vm191_vm2, %v8583_v18  ;;  %7447 = vmatprep.subr.mxu0 %v6631_v38 }
0x14f8   :  { %7448 = vmatpush3.msra.mxu0 %v6631_v38  ;;  %7455 = vmatprep.mubr.msk.f32.mxu0 %vm191_vm2, %v8581_v8 }
0x14f9   :  { %7449 = vmatprep.subr.mxu0 %v6630_v39 }
0x14fa   :  { %7450 = vmatpush3.msra.mxu0 %v6630_v39 }
0x14fb   :  { %7451 = vmatprep.subr.mxu0 %v6629_v40 }
0x14fc   :  { %7452 = vmatpush3.msra.mxu0 %v6629_v40 }
0x14fd   :  { %7453 = vmatprep.subr.mxu0 %v6628_v41 }
0x14fe   :  { %7454 = vmatpush3.msra.mxu0 %v6628_v41 }
0x14ff   :  { %7456 = vmatmul.mubr.msk.f32.vlgmr.msra.gmra.mxu0 %vm191_vm2, %v8583_v18  ;;  %7458 = vmatprep.subr.mxu0 %v7868_v9 }
0x1500   :  { %7460 = vmatprep.mubr.msk.f32.mxu0 %vm7869_vm3, %v7868_v9 }
0x15af   :  { %v7435_v42 = vpop.f32.mrf.mxu0 }
0x15b0   :  { %v3361_v51 = vadd.f32 %v7435_v42, %v6617_v47 }
0x15b1   :  { %v3355_v43 = vpop.f32.mrf.mxu0 }
0x15b2   :  { %v3356_v52 = vadd.f32 %v6617_v47, %v3355_v43  ;;  %v6648_v47 = vld [vmem:[%s9139_s6 + $0x5] ss:$0 sm:$0xff] }
0x15b7   :  { %v7446_v46 = vpop.f32.mrf.mxu0 }
0x15b8   :  { %v3449_v48 = vadd.f32 %v7446_v46, %v6625_v45 }
0x15b9   :  { %v3443_v49 = vpop.f32.mrf.mxu0 }
0x15ba   :  { %v3444_v50 = vadd.f32 %v6625_v45, %v3443_v49  ;;  %7464 = vmatpush3.xpose.msk.msra.mxu1 %vm499_vm4, %v3449_v48  ;;  %v6656_v45 = vld [vmem:[%s9141_s8 + $0x5] ss:$0 sm:$0xff] }
0x15bb   :  { %7473 = vmatprep.subr.mxu1 %v7868_v9 }
0x15bc   :  { %7459 = vmatpush3.xpose.msk.msra.mxu0 %vm499_vm4, %v3444_v50 }
0x15bd   :  { %7466 = vmatmul.mubr.msk.f32.vlgmr.msra.gmra.mxu1 %vm499_vm4, %v3361_v51  ;;  %7468 = vmatprep.subr.mxu0 %v7868_v9 }
0x15be   :  { %7475 = vmatprep.mubr.msk.f32.mxu1 %vm7869_vm3, %v7868_v9 }
0x15bf   :  { %v7457_v54 = vpop.f32.mrf.mxu0  ;;  %7461 = vmatmul.mubr.msk.f32.vlgmr.msra.gmra.mxu0 %vm499_vm4, %v3356_v52  ;;  %v6664_v52 = vld [vmem:[%s9143_s10 + $0x5] ss:$0 sm:$0xff] }
0x15c0   :  { %v3537_v55 = vadd.f32 %v7457_v54, %v6633_v53  ;;  %7470 = vmatprep.mubr.msk.f32.mxu0 %vm7869_vm3, %v7868_v9 }
0x15c1   :  { %v3531_v56 = vpop.f32.mrf.mxu0 }
0x15c2   :  { %v3532_v57 = vadd.f32 %v6633_v53, %v3531_v56  ;;  %7474 = vmatpush3.msra.mxu1 %v3537_v55 }
0x15c3   :  { %7489 = vmatprep.subr.mxu1 %v6654_v31 }
0x15c4   :  { %7469 = vmatpush3.msra.mxu0 %v3532_v57 }
0x15c5   :  { %7478 = vmatprep.subr.mxu0 %v6646_v24 }
0x167d   :  { %v3688_v58 = vpop.f32.mrf.mxu1 }
0x167e   :  { %v3693_v59 = vmul.f32 0.35355338, %v3688_v58 }
0x167f   :  { %v3612_v60 = vpop.f32.mrf.mxu0  ;;  %v7467_v62 = vpop.f32.mrf.mxu1 }
0x1680   :  { %v3692_v0 = vmul.f32 0.35355338, %v3612_v60  ;;  %v3695_v2 = vsel %vm8143_vm5, %v3693_v59, -1e+30 }
0x1681   :  { %v7462_v6 = vpop.f32.mrf.mxu0  ;;  %v3699_v7 = vsel %vm499_vm4, %v3695_v2, -inf }
0x1682   :  { %3700 = vmax.xlane.f32.xlu1 %v3699_v7  ;;  %v3694_v10 = vsel %vm8143_vm5, %v3692_v0, -1e+30 }
0x1683   :  { %v3696_v11 = vsel %vm499_vm4, %v3694_v10, -inf }
0x1684   :  { %3697 = vmax.xlane.f32.xlu0 %v3696_v11 }
0x170b   :  { %v3701_v12 = vpop.xlane.xlu1 %3700 }
0x170c   :  { %v3703_v14 = vsub.f32 %v3695_v2, %v3701_v12 }
0x170d   :  { %v3698_v13 = vpop.xlane.xlu0 %3697 }
0x170e   :  { %v3706_v1 = vmul.f32 1.442695, %v3703_v14  ;;  %v3702_v15 = vsub.f32 %v3694_v10, %v3698_v13 }
0x1710   :  { %7797 = vpow2.f32 %v3706_v1  ;;  %v3704_v16 = vmul.f32 1.442695, %v3702_v15 }
0x1712   :  { %7799 = vpow2.f32 %v3704_v16 }
0x171d   :  { %v7798_v19 = vpop.eup %7797 }
0x171e   :  { %v3711_v20 = vsel %vm499_vm4, %v7798_v19, 0.0 }
0x171f   :  { %v7800_v21 = vpop.eup %7799  ;;  %3712 = vadd.xlane.f32.xlu1 %v3711_v20 }
0x1720   :  { %v3708_v22 = vsel %vm499_vm4, %v7800_v21, 0.0 }
0x1721   :  { %3709 = vadd.xlane.f32.xlu0 %v3708_v22 }
0x17a8   :  { %v3713_v25 = vpop.xlane.xlu1 %3712 }
0x17a9   :  { %7801 = vrcp.f32 %v3713_v25 }
0x17aa   :  { %v3710_v5 = vpop.xlane.xlu0 %3709 }
0x17ab   :  { %7803 = vrcp.f32 %v3710_v5 }
0x17b6   :  { %v7802_v30 = vpop.eup %7801 }
0x17b7   :  { %v3717_v27 = vmul.f32 %v7802_v30, %v7798_v19 }
0x17b8   :  { %v7804_v28 = vpop.eup %7803 }
0x17b9   :  { %7476 = vmatmul.mubr.msk.f32.vlgmr.msra.gmra.mxu1 %vm499_vm4, %v3717_v27  ;;  %v3715_v32 = vmul.f32 %v7804_v28, %v7800_v21 }
0x17ba   :  { %7490 = vmatpush3.msra.mxu1 %v6654_v31  ;;  %7497 = vmatprep.mubr.msk.f32.mxu1 %vm191_vm2, %v8581_v8  ;;  %v6642_v31 = vld [vmem:[%s9144_s11 + $0x20] sm:$0xff] }
0x17bb   :  { %7491 = vmatprep.subr.mxu1 %v6653_v29  ;;  %7471 = vmatmul.mubr.msk.f32.vlgmr.msra.gmra.mxu0 %vm499_vm4, %v3715_v32  ;;  %v6688_v32 = vld [vmem:[%s9140_s7 + $0xd0] sm:$0xff] }
0x17bc   :  { %7479 = vmatpush3.msra.mxu0 %v6646_v24  ;;  %7492 = vmatpush3.msra.mxu1 %v6653_v29  ;;  %v6689_v29 = vld [vmem:[%s9140_s7 + $0xd8] sm:$0xff] }
0x17bd   :  { %7480 = vmatprep.subr.mxu0 %v6645_v33  ;;  %7486 = vmatprep.mubr.msk.f32.mxu0 %vm191_vm2, %v8581_v8 }
0x17be   :  { %7493 = vmatprep.subr.mxu1 %v6652_v34  ;;  %7481 = vmatpush3.msra.mxu0 %v6645_v33  ;;  %v6687_v33 = vld [vmem:[%s9140_s7 + $0xc8] sm:$0xff] }
0x17bf   :  { %7494 = vmatpush3.msra.mxu1 %v6652_v34  ;;  %7482 = vmatprep.subr.mxu0 %v6644_v35  ;;  %v6686_v34 = vld [vmem:[%s9140_s7 + $0xc0] sm:$0xff] }
0x17c0   :  { %7495 = vmatprep.subr.mxu1 %v6651_v36  ;;  %7483 = vmatpush3.msra.mxu0 %v6644_v35  ;;  %v6673_v35 = vld [vmem:[%s9144_s11 + $0x28] sm:$0xff] }
0x17c1   :  { %7496 = vmatpush3.msra.mxu1 %v6651_v36  ;;  %7484 = vmatprep.subr.mxu0 %v6643_v4  ;;  %v6681_v36 = vld [vmem:[%s9168_s2 + $0xd8] sm:$0xff] }
0x17c2   :  { %7498 = vmatmul.mubr.msk.f32.vlgmr.msra.gmra.mxu1 %vm191_vm2, %v8583_v18  ;;  %7485 = vmatpush3.msra.mxu0 %v6643_v4 }
0x17c3   :  { %7487 = vmatmul.mubr.msk.f32.vlgmr.msra.gmra.mxu0 %vm191_vm2, %v8583_v18  ;;  %7500 = vmatprep.subr.mxu0 %v6662_v17 }
0x17c4   :  { %7501 = vmatpush3.msra.mxu0 %v6662_v17  ;;  %7508 = vmatprep.mubr.msk.f32.mxu0 %vm191_vm2, %v8581_v8 }
0x17c5   :  { %7502 = vmatprep.subr.mxu0 %v6661_v37  ;;  %7511 = vmatprep.subr.mxu1 %v7868_v9 }
0x17c6   :  { %7503 = vmatpush3.msra.mxu0 %v6661_v37  ;;  %7513 = vmatprep.mubr.msk.f32.mxu1 %vm7869_vm3, %v7868_v9 }
0x17c7   :  { %7504 = vmatprep.subr.mxu0 %v6660_v3 }
0x17c8   :  { %7505 = vmatpush3.msra.mxu0 %v6660_v3  ;;  %v6680_v3 = vld [vmem:[%s9168_s2 + $0xd0] sm:$0xff] }
0x17c9   :  { %7506 = vmatprep.subr.mxu0 %v6659_v23 }
0x17ca   :  { %7507 = vmatpush3.msra.mxu0 %v6659_v23 }
0x17cb   :  { %7509 = vmatmul.mubr.msk.f32.vlgmr.msra.gmra.mxu0 %vm191_vm2, %v8583_v18  ;;  %7521 = vmatprep.subr.mxu0 %v7868_v9 }
0x17cc   :  { %7523 = vmatprep.mubr.msk.f32.mxu0 %vm7869_vm3, %v7868_v9 }
0x1879   :  { %v8704_v38 = vpop.f32.mrf.mxu1 }
0x187b   :  { %v8706_v39 = vpop.f32.mrf.mxu0  ;;  %v7477_v40 = vpop.f32.mrf.mxu1 }
0x187d   :  { %v7472_v41 = vpop.f32.mrf.mxu0 }
0x187e   :  { %v6697_v41 = vld [vmem:[%s9142_s9 + $0xd8] sm:$0xff] }
0x1882   :  { %v7499_v42 = vpop.f32.mrf.mxu1 }
0x1883   :  { %v7488_v43 = vpop.f32.mrf.mxu0  ;;  %v4039_v51 = vadd.f32 %v7499_v42, %v6656_v45  ;;  %v6696_v42 = vld [vmem:[%s9142_s9 + $0xd0] sm:$0xff] }
0x1884   :  { %v4033_v46 = vpop.f32.mrf.mxu1  ;;  %v3951_v54 = vadd.f32 %v7488_v43, %v6648_v47 }
0x1885   :  { %v4034_v48 = vadd.f32 %v6656_v45, %v4033_v46  ;;  %v3945_v49 = vpop.f32.mrf.mxu0  ;;  %v6691_v45 = vld [vmem:[%s9141_s8 + $0x6] ss:$0 sm:$0xff]  ;;  %v6695_v46 = vld [vmem:[%s9142_s9 + $0xc8] sm:$0xff] }
0x1886   :  { %v3946_v50 = vadd.f32 %v6648_v47, %v3945_v49 }
0x1887   :  { %7512 = vmatpush3.xpose.msk.msra.mxu1 %vm499_vm4, %v4034_v48  ;;  %v6694_v48 = vld [vmem:[%s9142_s9 + $0xc0] sm:$0xff] }
0x1888   :  { %7516 = vmatprep.subr.mxu1 %v7868_v9 }
0x188a   :  { %7514 = vmatmul.mubr.msk.f32.vlgmr.msra.gmra.mxu1 %vm499_vm4, %v3946_v50 }
0x188b   :  { %7517 = vmatpush3.xpose.msk.msra.mxu1 %vm499_vm4, %v4039_v51  ;;  %v7510_v53 = vpop.f32.mrf.mxu0  ;;  %7518 = vmatprep.mubr.msk.f32.mxu1 %vm7869_vm3, %v7868_v9 }
0x188c   :  { %v4127_v55 = vadd.f32 %v7510_v53, %v6664_v52  ;;  %7526 = vmatprep.subr.mxu1 %v7868_v9 }
0x188d   :  { %v4121_v56 = vpop.f32.mrf.mxu0 }
0x188e   :  { %v4122_v57 = vadd.f32 %v6664_v52, %v4121_v56  ;;  %7519 = vmatmul.mubr.msk.f32.vlgmr.msra.gmra.mxu1 %vm499_vm4, %v3951_v54 }
0x188f   :  { %7527 = vmatpush3.msra.mxu1 %v4127_v55  ;;  %7528 = vmatprep.mubr.msk.f32.mxu1 %vm7869_vm3, %v7868_v9  ;;  %v6683_v55 = vld [vmem:[%s9139_s6 + $0x6] ss:$0 sm:$0xff] }
0x1890   :  { %7522 = vmatpush3.msra.mxu0 %v4122_v57  ;;  %7536 = vmatprep.subr.mxu1 %v6642_v31 }
0x1891   :  { %7531 = vmatprep.subr.mxu0 %v6673_v35 }
0x194a   :  { %v4202_v58 = vpop.f32.mrf.mxu1 }
0x194b   :  { %v4282_v59 = vmul.f32 0.35355338, %v4202_v58  ;;  %v6699_v58 = vld [vmem:[%s9143_s10 + $0x6] ss:$0 sm:$0xff] }
0x194c   :  { %v7515_v60 = vpop.f32.mrf.mxu1 }
0x194d   :  { %v4284_v62 = vsel %vm8143_vm5, %v4282_v59, -1e+30 }
0x194e   :  { %v4278_v0 = vpop.f32.mrf.mxu1  ;;  %v4286_v2 = vsel %vm499_vm4, %v4284_v62, -inf }
0x194f   :  { %v4283_v6 = vmul.f32 0.35355338, %v4278_v0  ;;  %4287 = vmax.xlane.f32.xlu1 %v4286_v2 }
0x1950   :  { %v7520_v7 = vpop.f32.mrf.mxu1 }
0x1951   :  { %v4285_v10 = vsel %vm8143_vm5, %v4283_v6, -1e+30 }
0x1952   :  { %v4289_v11 = vsel %vm499_vm4, %v4285_v10, -inf }
0x1953   :  { %4290 = vmax.xlane.f32.xlu0 %v4289_v11 }
0x19d8   :  { %v4288_v12 = vpop.xlane.xlu1 %4287 }
0x19d9   :  { %v4292_v14 = vsub.f32 %v4284_v62, %v4288_v12 }
0x19db   :  { %v4294_v13 = vmul.f32 1.442695, %v4292_v14 }
0x19dc   :  { %v4291_v1 = vpop.xlane.xlu0 %4290 }
0x19dd   :  { %7805 = vpow2.f32 %v4294_v13  ;;  %v4293_v15 = vsub.f32 %v4285_v10, %v4291_v1 }
0x19df   :  { %v4296_v16 = vmul.f32 1.442695, %v4293_v15 }
0x19e1   :  { %7807 = vpow2.f32 %v4296_v16 }
0x19ea   :  { %v7806_v19 = vpop.eup %7805 }
0x19eb   :  { %v4298_v20 = vsel %vm499_vm4, %v7806_v19, 0.0 }
0x19ec   :  { %4299 = vadd.xlane.f32.xlu1 %v4298_v20 }
0x19ee   :  { %v7808_v21 = vpop.eup %7807 }
0x19ef   :  { %v4301_v22 = vsel %vm499_vm4, %v7808_v21, 0.0 }
0x19f0   :  { %4302 = vadd.xlane.f32.xlu0 %v4301_v22 }
0x1a75   :  { %v4300_v24 = vpop.xlane.xlu1 %4299 }
0x1a76   :  { %7809 = vrcp.f32 %v4300_v24 }
0x1a79   :  { %v4303_v25 = vpop.xlane.xlu0 %4302 }
0x1a7a   :  { %7811 = vrcp.f32 %v4303_v25 }
0x1a83   :  { %v7810_v5 = vpop.eup %7809 }
0x1a84   :  { %v4305_v30 = vmul.f32 %v7810_v5, %v7806_v19 }
0x1a86   :  { %7524 = vmatmul.mubr.msk.f32.vlgmr.msra.gmra.mxu0 %vm499_vm4, %v4305_v30 }
0x1a87   :  { %v7812_v27 = vpop.eup %7811  ;;  %7532 = vmatpush3.msra.mxu0 %v6673_v35 }
0x1a88   :  { %v4307_v28 = vmul.f32 %v7812_v27, %v7808_v21  ;;  %7541 = vmatprep.subr.mxu0 %v6681_v36 }
0x1a8a   :  { %7529 = vmatmul.mubr.msk.f32.vlgmr.msra.gmra.mxu1 %vm499_vm4, %v4307_v28  ;;  %v6714_v28 = vld [vmem:[%s9168_s2 + $0xf8] sm:$0xff] }
0x1a8b   :  { %7538 = vmatprep.mubr.msk.f32.mxu1 %vm499_vm4, %v8706_v39  ;;  %7537 = vmatpush3.msra.mxu1 %v6642_v31  ;;  %v6678_v39 = vld [vmem:[%s9168_s2 + $0xc0] sm:$0xff] }
0x1a8c   :  { %7552 = vmatprep.subr.mxu1 %v6689_v29 }
0x1a8e   :  { %7539 = vmatmul.mubr.msk.f32.vlgmr.msra.gmra.mxu1 %vm499_vm4, %v8704_v38  ;;  %v6679_v38 = vld [vmem:[%s9168_s2 + $0xc8] sm:$0xff] }
0x1a8f   :  { %7553 = vmatpush3.msra.mxu1 %v6689_v29  ;;  %7560 = vmatprep.mubr.msk.f32.mxu1 %vm191_vm2, %v8581_v8 }
0x1a90   :  { %7554 = vmatprep.subr.mxu1 %v6688_v32 }
0x1a91   :  { %7555 = vmatpush3.msra.mxu1 %v6688_v32 }
0x1a92   :  { %7556 = vmatprep.subr.mxu1 %v6687_v33 }
0x1a93   :  { %7557 = vmatpush3.msra.mxu1 %v6687_v33 }
0x1a94   :  { %7558 = vmatprep.subr.mxu1 %v6686_v34 }
0x1a95   :  { %7559 = vmatpush3.msra.mxu1 %v6686_v34 }
0x1a96   :  { %7561 = vmatmul.mubr.msk.f32.vlgmr.msra.gmra.mxu1 %vm191_vm2, %v8583_v18  ;;  %7574 = vmatprep.subr.mxu1 %v7868_v9 }
0x1a97   :  { %7576 = vmatprep.mubr.msk.f32.mxu1 %vm7869_vm3, %v7868_v9 }
0x1b46   :  { %v4377_v4 = vpop.f32.mrf.mxu0 }
0x1b47   :  { %7533 = vmatprep.mubr.msk.f32.mxu0 %vm499_vm4, %v4377_v4  ;;  %v6713_v4 = vld [vmem:[%s9168_s2 + $0xf0] sm:$0xff] }
0x1b48   :  { %v7525_v17 = vpop.f32.mrf.mxu0 }
0x1b49   :  { %v6712_v17 = vld [vmem:[%s9168_s2 + $0xe8] sm:$0xff] }
0x1b4a   :  { %v4450_v37 = vpop.f32.mrf.mxu1 }
0x1b4b   :  { %7534 = vmatmul.mubr.msk.f32.vlgmr.msra.gmra.mxu0 %vm499_vm4, %v4450_v37  ;;  %v6711_v37 = vld [vmem:[%s9168_s2 + $0xe0] sm:$0xff] }
0x1b4c   :  { %7542 = vmatpush3.msra.mxu0 %v6681_v36  ;;  %v7530_v23 = vpop.f32.mrf.mxu1  ;;  %7549 = vmatprep.mubr.msk.f32.mxu0 %vm191_vm2, %v8581_v8 }
0x1b4d   :  { %7543 = vmatprep.subr.mxu0 %v6680_v3  ;;  %v6729_v23 = vld [vmem:[%s9142_s9 + $0xf0] sm:$0xff] }
0x1b4e   :  { %7544 = vmatpush3.msra.mxu0 %v6680_v3  ;;  %v8782_v40 = vpop.f32.mrf.mxu1  ;;  %v6730_v3 = vld [vmem:[%s9142_s9 + $0xf8] sm:$0xff] }
0x1b4f   :  { %7545 = vmatprep.subr.mxu0 %v6679_v38 }
0x1b50   :  { %7546 = vmatpush3.msra.mxu0 %v6679_v38  ;;  %v8792_v43 = vpop.f32.mrf.mxu1  ;;  %v6728_v38 = vld [vmem:[%s9142_s9 + $0xe8] sm:$0xff] }
0x1b51   :  { %7547 = vmatprep.subr.mxu0 %v6678_v39 }
0x1b52   :  { %7548 = vmatpush3.msra.mxu0 %v6678_v39  ;;  %v6727_v39 = vld [vmem:[%s9142_s9 + $0xe0] sm:$0xff] }
0x1b53   :  { %7550 = vmatmul.mubr.msk.f32.vlgmr.msra.gmra.mxu0 %vm191_vm2, %v8583_v18  ;;  %7563 = vmatprep.subr.mxu0 %v6697_v41 }
0x1b54   :  { %7564 = vmatpush3.msra.mxu0 %v6697_v41  ;;  %7571 = vmatprep.mubr.msk.f32.mxu0 %vm191_vm2, %v8581_v8  ;;  %v6708_v41 = vld [vmem:[%s9144_s11 + $0x30] sm:$0xff] }
0x1b55   :  { %7565 = vmatprep.subr.mxu0 %v6696_v42 }
0x1b56   :  { %v7562_v47 = vpop.f32.mrf.mxu1  ;;  %7566 = vmatpush3.msra.mxu0 %v6696_v42  ;;  %v6722_v42 = vld [vmem:[%s9140_s7 + $0xf8] sm:$0xff] }
0x1b57   :  { %v4791_v49 = vadd.f32 %v7562_v47, %v6691_v45  ;;  %7567 = vmatprep.subr.mxu0 %v6695_v46 }
0x1b58   :  { %v4785_v50 = vpop.f32.mrf.mxu1  ;;  %7568 = vmatpush3.msra.mxu0 %v6695_v46 }
0x1b59   :  { %v4786_v51 = vadd.f32 %v6691_v45, %v4785_v50  ;;  %7569 = vmatprep.subr.mxu0 %v6694_v48  ;;  %v6720_v50 = vld [vmem:[%s9140_s7 + $0xe8] sm:$0xff] }
0x1b5a   :  { %7570 = vmatpush3.msra.mxu0 %v6694_v48  ;;  %v6721_v48 = vld [vmem:[%s9140_s7 + $0xf0] sm:$0xff] }
0x1b5b   :  { %7572 = vmatmul.mubr.msk.f32.vlgmr.msra.gmra.mxu0 %vm191_vm2, %v8583_v18  ;;  %7575 = vmatpush3.xpose.msk.msra.mxu1 %vm499_vm4, %v4786_v51  ;;  %v6719_v51 = vld [vmem:[%s9140_s7 + $0xe0] sm:$0xff] }
0x1b5c   :  { %7579 = vmatprep.subr.mxu1 %v7868_v9  ;;  %7584 = vmatprep.subr.mxu0 %v7868_v9 }
0x1b5d   :  { %7586 = vmatprep.mubr.msk.f32.mxu0 %vm7869_vm3, %v7868_v9 }
0x1c0b   :  { %v8812_v52 = vpop.f32.mrf.mxu0 }
0x1c0d   :  { %v8814_v53 = vpop.f32.mrf.mxu0 }
0x1c13   :  { %v7551_v54 = vpop.f32.mrf.mxu0 }
0x1c14   :  { %v4703_v59 = vadd.f32 %v7551_v54, %v6683_v55 }
0x1c15   :  { %v4697_v56 = vpop.f32.mrf.mxu0 }
0x1c16   :  { %v4698_v57 = vadd.f32 %v6683_v55, %v4697_v56  ;;  %v6732_v55 = vld [vmem:[%s9143_s10 + $0x7] ss:$0 sm:$0xff] }
0x1c18   :  { %7577 = vmatmul.mubr.msk.f32.vlgmr.msra.gmra.mxu1 %vm499_vm4, %v4698_v57 }
0x1c19   :  { %7580 = vmatpush3.xpose.msk.msra.mxu1 %vm499_vm4, %v4791_v49  ;;  %7581 = vmatprep.mubr.msk.f32.mxu1 %vm7869_vm3, %v7868_v9 }
0x1c1a   :  { %7589 = vmatprep.subr.mxu1 %v7868_v9 }
0x1c1b   :  { %v7573_v60 = vpop.f32.mrf.mxu0 }
0x1c1c   :  { %v4879_v62 = vadd.f32 %v7573_v60, %v6699_v58  ;;  %7582 = vmatmul.mubr.msk.f32.vlgmr.msra.gmra.mxu1 %vm499_vm4, %v4703_v59  ;;  %v4615_v60 = vadd.f32 %v8782_v40, %v8812_v52  ;;  %v6716_v40 = vld [vmem:[%s9139_s6 + $0x7] ss:$0 sm:$0xff] }
0x1c1d   :  { %v4873_v0 = vpop.f32.mrf.mxu0  ;;  %7591 = vmatprep.mubr.msk.f32.mxu1 %vm7869_vm3, %v7868_v9 }
0x1c1e   :  { %v4874_v2 = vadd.f32 %v6699_v58, %v4873_v0  ;;  %7590 = vmatpush3.msra.mxu1 %v4879_v62  ;;  %v4610_v62 = vadd.f32 %v8792_v43, %v8814_v53 }
0x1c1f   :  { %7599 = vmatprep.subr.mxu1 %v6714_v28 }
0x1c20   :  { %7585 = vmatpush3.msra.mxu0 %v4874_v2 }
0x1c21   :  { %7594 = vmatprep.subr.mxu0 %v6708_v41 }
0x1cd8   :  { %v4954_v6 = vpop.f32.mrf.mxu1 }
0x1cd9   :  { %v5034_v7 = vmul.f32 0.35355338, %v4954_v6 }
0x1cda   :  { %v7578_v10 = vpop.f32.mrf.mxu1 }
0x1cdb   :  { %v5036_v11 = vsel %vm8143_vm5, %v5034_v7, -1e+30  ;;  %v6724_v10 = vld [vmem:[%s9141_s8 + $0x7] ss:$0 sm:$0xff] }
0x1cdc   :  { %v5030_v12 = vpop.f32.mrf.mxu1  ;;  %v5038_v14 = vsel %vm499_vm4, %v5036_v11, -inf }
0x1cdd   :  { %v5035_v13 = vmul.f32 0.35355338, %v5030_v12  ;;  %5039 = vmax.xlane.f32.xlu1 %v5038_v14 }
0x1cde   :  { %v7583_v1 = vpop.f32.mrf.mxu1 }
0x1cdf   :  { %v5037_v15 = vsel %vm8143_vm5, %v5035_v13, -1e+30 }
0x1ce0   :  { %v5041_v16 = vsel %vm499_vm4, %v5037_v15, -inf }
0x1ce1   :  { %5042 = vmax.xlane.f32.xlu0 %v5041_v16 }
0x1d66   :  { %v5040_v19 = vpop.xlane.xlu1 %5039 }
0x1d67   :  { %v5044_v20 = vsub.f32 %v5036_v11, %v5040_v19 }
0x1d69   :  { %v5046_v21 = vmul.f32 1.442695, %v5044_v20 }
0x1d6a   :  { %v5043_v22 = vpop.xlane.xlu0 %5042 }
0x1d6b   :  { %7813 = vpow2.f32 %v5046_v21  ;;  %v5045_v31 = vsub.f32 %v5037_v15, %v5043_v22 }
0x1d6d   :  { %v5048_v24 = vmul.f32 1.442695, %v5045_v31 }
0x1d6f   :  { %7815 = vpow2.f32 %v5048_v24 }
0x1d78   :  { %v7814_v25 = vpop.eup %7813 }
0x1d79   :  { %v5050_v5 = vsel %vm499_vm4, %v7814_v25, 0.0 }
0x1d7a   :  { %5051 = vadd.xlane.f32.xlu1 %v5050_v5 }
0x1d7c   :  { %v7816_v30 = vpop.eup %7815 }
0x1d7d   :  { %v5053_v27 = vsel %vm499_vm4, %v7816_v30, 0.0 }
0x1d7e   :  { %5054 = vadd.xlane.f32.xlu0 %v5053_v27 }
0x1e03   :  { %v5052_v29 = vpop.xlane.xlu1 %5051 }
0x1e04   :  { %7817 = vrcp.f32 %v5052_v29 }
0x1e07   :  { %v5055_v32 = vpop.xlane.xlu0 %5054 }
0x1e08   :  { %7819 = vrcp.f32 %v5055_v32 }
0x1e11   :  { %v7818_v33 = vpop.eup %7817 }
0x1e12   :  { %v5057_v34 = vmul.f32 %v7818_v33, %v7814_v25 }
0x1e14   :  { %7587 = vmatmul.mubr.msk.f32.vlgmr.msra.gmra.mxu0 %vm499_vm4, %v5057_v34 }
0x1e15   :  { %v7820_v35 = vpop.eup %7819  ;;  %7595 = vmatpush3.msra.mxu0 %v6708_v41 }
0x1e16   :  { %v5059_v36 = vmul.f32 %v7820_v35, %v7816_v30  ;;  %7610 = vmatprep.subr.mxu0 %v6722_v42 }
0x1e18   :  { %7592 = vmatmul.mubr.msk.f32.vlgmr.msra.gmra.mxu1 %vm499_vm4, %v5059_v36 }
0x1e19   :  { %7600 = vmatpush3.msra.mxu1 %v6714_v28  ;;  %7607 = vmatprep.mubr.msk.f32.mxu1 %vm191_vm2, %v8581_v8 }
0x1e1a   :  { %7601 = vmatprep.subr.mxu1 %v6713_v4 }
0x1e1b   :  { %7602 = vmatpush3.msra.mxu1 %v6713_v4 }
0x1e1c   :  { %7603 = vmatprep.subr.mxu1 %v6712_v17 }
0x1e1d   :  { %7604 = vmatpush3.msra.mxu1 %v6712_v17 }
0x1e1e   :  { %7605 = vmatprep.subr.mxu1 %v6711_v37 }
0x1e1f   :  { %7606 = vmatpush3.msra.mxu1 %v6711_v37  ;;  %v6741_v37 = vld [vmem:[%s9144_s11 + $0x38] sm:$0xff] }
0x1e20   :  { %7608 = vmatmul.mubr.msk.f32.vlgmr.msra.gmra.mxu1 %vm191_vm2, %v8583_v18  ;;  %7621 = vmatprep.subr.mxu1 %v6730_v3 }
0x1e21   :  { %7622 = vmatpush3.msra.mxu1 %v6730_v3  ;;  %7629 = vmatprep.mubr.msk.f32.mxu1 %vm191_vm2, %v8581_v8 }
0x1e22   :  { %7623 = vmatprep.subr.mxu1 %v6729_v23 }
0x1e23   :  { %7624 = vmatpush3.msra.mxu1 %v6729_v23 }
0x1e24   :  { %7625 = vmatprep.subr.mxu1 %v6728_v38 }
0x1e25   :  { %7626 = vmatpush3.msra.mxu1 %v6728_v38 }
0x1e26   :  { %7627 = vmatprep.subr.mxu1 %v6727_v39 }
0x1e27   :  { %7628 = vmatpush3.msra.mxu1 %v6727_v39 }
0x1e28   :  { %7630 = vmatmul.mubr.msk.f32.vlgmr.msra.gmra.mxu1 %vm191_vm2, %v8583_v18  ;;  %7642 = vmatprep.subr.mxu1 %v7868_v9 }
0x1e29   :  { %7644 = vmatprep.mubr.msk.f32.mxu1 %vm7869_vm3, %v7868_v9 }
0x1ed4   :  { %v5129_v45 = vpop.f32.mrf.mxu0 }
0x1ed5   :  { %7596 = vmatprep.mubr.msk.f32.mxu0 %vm499_vm4, %v5129_v45  ;;  %v6745_v45 = vld [vmem:[%s9145_s12 + $0x1] ss:$0 sm:$0xff] }
0x1ed6   :  { %v7588_v46 = vpop.f32.mrf.mxu0 }
0x1ed8   :  { %v5202_v47 = vpop.f32.mrf.mxu1 }
0x1ed9   :  { %7597 = vmatmul.mubr.msk.f32.vlgmr.msra.gmra.mxu0 %vm499_vm4, %v5202_v47 }
0x1eda   :  { %7611 = vmatpush3.msra.mxu0 %v6722_v42  ;;  %v7593_v49 = vpop.f32.mrf.mxu1  ;;  %7618 = vmatprep.mubr.msk.f32.mxu0 %vm191_vm2, %v8581_v8 }
0x1edb   :  { %7612 = vmatprep.subr.mxu0 %v6721_v48 }
0x1edc   :  { %7613 = vmatpush3.msra.mxu0 %v6721_v48 }
0x1edd   :  { %7614 = vmatprep.subr.mxu0 %v6720_v50 }
0x1ede   :  { %7615 = vmatpush3.msra.mxu0 %v6720_v50 }
0x1edf   :  { %7616 = vmatprep.subr.mxu0 %v6719_v51 }
0x1ee0   :  { %7617 = vmatpush3.msra.mxu0 %v6719_v51  ;;  %v7609_v8 = vpop.f32.mrf.mxu1 }
0x1ee1   :  { %7619 = vmatmul.mubr.msk.f32.vlgmr.msra.gmra.mxu0 %vm191_vm2, %v8583_v18  ;;  %7632 = vmatprep.subr.mxu0 %v7868_v9  ;;  %v5376_v53 = vadd.f32 %v7609_v8, %v6716_v40 }
0x1ee2   :  { %7634 = vmatprep.mubr.msk.f32.mxu0 %vm7869_vm3, %v7868_v9  ;;  %v5370_v54 = vpop.f32.mrf.mxu1 }
0x1ee3   :  { %v5371_v52 = vadd.f32 %v6716_v40, %v5370_v54 }
0x1ee8   :  { %v7631_v56 = vpop.f32.mrf.mxu1 }
0x1ee9   :  { %v5552_v57 = vadd.f32 %v7631_v56, %v6732_v55 }
0x1eea   :  { %v5546_v58 = vpop.f32.mrf.mxu1 }
0x1eeb   :  { %v5547_v59 = vadd.f32 %v6732_v55, %v5546_v58 }
0x1eed   :  { %7643 = vmatpush3.msra.mxu1 %v5547_v59 }
0x1eee   :  { %7652 = vmatprep.subr.mxu1 %v6741_v37 }
0x1f99   :  { %v7598_v18 = vpop.f32.mrf.mxu0 }
0x1f9a   :  { %v8906_v0 = vadd.f32 %v7598_v18, %v4615_v60 }
0x1f9b   :  { %v5280_v2 = vpop.f32.mrf.mxu0 }
0x1f9c   :  { %v8908_v6 = vadd.f32 %v5280_v2, %v4610_v62  ;;  %v6752_v2 = vld [vmem:[%s9148_s15 + $0x30] sm:$0xff] }
0x1fa1   :  { %v7620_v7 = vpop.f32.mrf.mxu0 }
0x1fa2   :  { %v5464_v43 = vadd.f32 %v7620_v7, %v6724_v10  ;;  %v6750_v7 = vld [vmem:[%s9148_s15 + $0x20] sm:$0xff] }
0x1fa3   :  { %v5458_v11 = vpop.f32.mrf.mxu0 }
0x1fa4   :  { %v5459_v12 = vadd.f32 %v6724_v10, %v5458_v11 }
0x1fa6   :  { %7633 = vmatpush3.xpose.msk.msra.mxu0 %vm499_vm4, %v5459_v12 }
0x1fa7   :  { %7637 = vmatprep.subr.mxu0 %v7868_v9 }
0x1fa9   :  { %7635 = vmatmul.mubr.msk.f32.vlgmr.msra.gmra.mxu0 %vm499_vm4, %v5371_v52 }
0x1faa   :  { %7638 = vmatpush3.xpose.msk.msra.mxu0 %vm499_vm4, %v5464_v43  ;;  %7639 = vmatprep.mubr.msk.f32.mxu0 %vm7869_vm3, %v7868_v9 }
0x1fab   :  { %7647 = vmatprep.subr.mxu0 %v7868_v9 }
0x1fad   :  { %7640 = vmatmul.mubr.msk.f32.vlgmr.msra.gmra.mxu0 %vm499_vm4, %v5376_v53 }
0x1fae   :  { %7648 = vmatpush3.msra.mxu0 %v5552_v57  ;;  %7649 = vmatprep.mubr.msk.f32.mxu0 %vm7869_vm3, %v7868_v9 }
0x2069   :  { %v5627_v14 = vpop.f32.mrf.mxu0 }
0x206a   :  { %v5707_v13 = vmul.f32 0.35355338, %v5627_v14  ;;  %v6748_v14 = vld [vmem:[%s9146_s13 + $0x1] ss:$0 sm:$0xff] }
0x206b   :  { %v7636_v1 = vpop.f32.mrf.mxu0 }
0x206c   :  { %v5709_v15 = vsel %vm8143_vm5, %v5707_v13, -1e+30 }
0x206d   :  { %v5703_v16 = vpop.f32.mrf.mxu0  ;;  %v5711_v19 = vsel %vm499_vm4, %v5709_v15, -inf }
0x206e   :  { %v5708_v20 = vmul.f32 0.35355338, %v5703_v16  ;;  %5712 = vmax.xlane.f32.xlu1 %v5711_v19  ;;  %v6749_v19 = vld [vmem:[%s9147_s14 + $0x1] ss:$0 sm:$0xff] }
0x206f   :  { %v7641_v21 = vpop.f32.mrf.mxu0 }
0x2070   :  { %v5710_v22 = vsel %vm8143_vm5, %v5708_v20, -1e+30 }
0x2071   :  { %v5714_v31 = vsel %vm499_vm4, %v5710_v22, -inf }
0x2072   :  { %5715 = vmax.xlane.f32.xlu0 %v5714_v31  ;;  %v6773_v31 = vld [vmem:[%s9150_s17 + $0xf8] sm:$0xff] }
0x20f7   :  { %v5713_v24 = vpop.xlane.xlu1 %5712 }
0x20f8   :  { %v5717_v9 = vsub.f32 %v5709_v15, %v5713_v24  ;;  %v6772_v24 = vld [vmem:[%s9150_s17 + $0xf0] sm:$0xff] }
0x20fa   :  { %v5719_v25 = vmul.f32 1.442695, %v5717_v9  ;;  %v6771_v9 = vld [vmem:[%s9150_s17 + $0xe8] sm:$0xff] }
0x20fb   :  { %v5716_v5 = vpop.xlane.xlu0 %5715 }
0x20fc   :  { %7821 = vpow2.f32 %v5719_v25  ;;  %v5718_v30 = vsub.f32 %v5710_v22, %v5716_v5  ;;  %v6770_v25 = vld [vmem:[%s9150_s17 + $0xe0] sm:$0xff]  ;;  %v6769_v5 = vld [vmem:[%s9150_s17 + $0xd8] sm:$0xff] }
0x20fe   :  { %v5721_v27 = vmul.f32 1.442695, %v5718_v30  ;;  %v6768_v30 = vld [vmem:[%s9150_s17 + $0xd0] sm:$0xff] }
0x2100   :  { %7823 = vpow2.f32 %v5721_v27  ;;  %v6767_v27 = vld [vmem:[%s9150_s17 + $0xc8] sm:$0xff] }
0x2109   :  { %v7822_v28 = vpop.eup %7821 }
0x210a   :  { %v5723_v29 = vsel %vm499_vm4, %v7822_v28, 0.0 }
0x210b   :  { %5724 = vadd.xlane.f32.xlu1 %v5723_v29  ;;  %v6765_v29 = vld [vmem:[%s9150_s17 + $0xb8] sm:$0xff] }
0x210d   :  { %v7824_v32 = vpop.eup %7823 }
0x210e   :  { %v5726_v33 = vsel %vm499_vm4, %v7824_v32, 0.0 }
0x210f   :  { %5727 = vadd.xlane.f32.xlu0 %v5726_v33  ;;  %v6763_v33 = vld [vmem:[%s9150_s17 + $0xa8] sm:$0xff] }
0x2194   :  { %v5725_v26 = vpop.xlane.xlu1 %5724 }
0x2195   :  { %7825 = vrcp.f32 %v5725_v26  ;;  %v6762_v26 = vld [vmem:[%s9150_s17 + $0xa0] sm:$0xff] }
0x2198   :  { %v5728_v34 = vpop.xlane.xlu0 %5727 }
0x2199   :  { %7827 = vrcp.f32 %v5728_v34  ;;  %v6761_v34 = vld [vmem:[%s9150_s17 + $0x98] sm:$0xff] }
0x21a2   :  { %v7826_v35 = vpop.eup %7825 }
0x21a3   :  { %v5730_v36 = vmul.f32 %v7826_v35, %v7822_v28  ;;  %v6766_v28 = vld [vmem:[%s9150_s17 + $0xc0] sm:$0xff]  ;;  %v6760_v35 = vld [vmem:[%s9150_s17 + $0x90] sm:$0xff] }
0x21a5   :  { %7645 = vmatmul.mubr.msk.f32.vlgmr.msra.gmra.mxu1 %vm499_vm4, %v5730_v36  ;;  %v6759_v36 = vld [vmem:[%s9150_s17 + $0x88] sm:$0xff] }
0x21a6   :  { %v7828_v4 = vpop.eup %7827  ;;  %7653 = vmatpush3.msra.mxu1 %v6741_v37 }
0x21a7   :  { %v5732_v17 = vmul.f32 %v7828_v4, %v7824_v32  ;;  %7668 = vmatprep.subr.mxu1 %v6773_v31  ;;  %v6764_v32 = vld [vmem:[%s9150_s17 + $0xb0] sm:$0xff]  ;;  %v6758_v4 = vld [vmem:[%s9150_s17 + $0x80] sm:$0xff] }
0x21a9   :  { %7650 = vmatmul.mubr.msk.f32.vlgmr.msra.gmra.mxu0 %vm499_vm4, %v5732_v17  ;;  %v6755_v17 = vld [vmem:[%s9149_s16 + $0x1] ss:$0 sm:$0xff] }
0x2265   :  { %v5802_v3 = vpop.f32.mrf.mxu1 }
0x2266   :  { %7654 = vmatprep.mubr.msk.f32.mxu1 %vm499_vm4, %v5802_v3 }
0x2267   :  { %v7646_v23 = vpop.f32.mrf.mxu1 }
0x2269   :  { %v5875_v38 = vpop.f32.mrf.mxu0 }
0x226a   :  { %7655 = vmatmul.mubr.msk.f32.vlgmr.msra.gmra.mxu1 %vm499_vm4, %v5875_v38 }
0x226b   :  { %v7651_v39 = vpop.f32.mrf.mxu0  ;;  %7669 = vmatpush3.msra.mxu1 %v6773_v31 }
0x226c   :  { %7670 = vmatprep.subr.mxu1 %v6772_v24 }
0x226d   :  { %7671 = vmatpush3.msra.mxu1 %v6772_v24 }
0x226e   :  { %7672 = vmatprep.subr.mxu1 %v6771_v9 }
0x226f   :  { %7673 = vmatpush3.msra.mxu1 %v6771_v9 }
0x2270   :  { %7674 = vmatprep.subr.mxu1 %v6770_v25 }
0x2271   :  { %7675 = vmatpush3.msra.mxu1 %v6770_v25 }
0x2272   :  { %7676 = vmatprep.subr.mxu1 %v6769_v5 }
0x2273   :  { %7677 = vmatpush3.msra.mxu1 %v6769_v5 }
0x2274   :  { %7678 = vmatprep.subr.mxu1 %v6768_v30 }
0x2275   :  { %7679 = vmatpush3.msra.mxu1 %v6768_v30 }
0x2276   :  { %7680 = vmatprep.subr.mxu1 %v6767_v27 }
0x2277   :  { %7681 = vmatpush3.msra.mxu1 %v6767_v27 }
0x2278   :  { %7682 = vmatprep.subr.mxu1 %v6766_v28 }
0x2279   :  { %7683 = vmatpush3.msra.mxu1 %v6766_v28 }
0x227a   :  { %7684 = vmatprep.subr.mxu1 %v6765_v29 }
0x227b   :  { %7685 = vmatpush3.msra.mxu1 %v6765_v29 }
0x227c   :  { %7686 = vmatprep.subr.mxu1 %v6764_v32 }
0x227d   :  { %7687 = vmatpush3.msra.mxu1 %v6764_v32 }
0x227e   :  { %7688 = vmatprep.subr.mxu1 %v6763_v33 }
0x227f   :  { %7689 = vmatpush3.msra.mxu1 %v6763_v33  ;;  %v6775_v33 = vld [vmem:[%s9151_s18 + $0x1] ss:$0 sm:$0xff] }
0x2280   :  { %7690 = vmatprep.subr.mxu1 %v6762_v26 }
0x2281   :  { %7691 = vmatpush3.msra.mxu1 %v6762_v26 }
0x2282   :  { %7692 = vmatprep.subr.mxu1 %v6761_v34 }
0x2283   :  { %7693 = vmatpush3.msra.mxu1 %v6761_v34 }
0x2284   :  { %7694 = vmatprep.subr.mxu1 %v6760_v35 }
0x2285   :  { %7695 = vmatpush3.msra.mxu1 %v6760_v35 }
0x2286   :  { %7696 = vmatprep.subr.mxu1 %v6759_v36 }
0x2287   :  { %7697 = vmatpush3.msra.mxu1 %v6759_v36 }
0x2288   :  { %7698 = vmatprep.subr.mxu1 %v6758_v4 }
0x2289   :  { %7699 = vmatpush3.msra.mxu1 %v6758_v4 }
0x232a   :  { %v7656_v41 = vpop.f32.mrf.mxu1 }
0x232b   :  { %v5963_v42 = vadd.f32 %v7656_v41, %v8906_v0  ;;  %v6753_v0 = vld [vmem:[%s9148_s15 + $0x38] sm:$0xff] }
0x232c   :  { %v5953_v46 = vpop.f32.mrf.mxu1  ;;  %7657 = vmatprep.subr.mxu0 %v6753_v0 }
0x232d   :  { %v5965_v47 = vadd.f32 %v5963_v42, %v8547_v61  ;;  %v5962_v48 = vadd.f32 %v5953_v46, %v8908_v6  ;;  %7658 = vmatpush3.msra.mxu0 %v6753_v0  ;;  %v6751_v6 = vld [vmem:[%s9148_s15 + $0x28] sm:$0xff] }
0x232e   :  { %7659 = vmatprep.subr.mxu0 %v6752_v2 }
0x232f   :  { %v8947_v49 = vadd.f32 %v6745_v45, %v5965_v47  ;;  %v5964_v50 = vadd.f32 %v5962_v48, %v8550_v63  ;;  %7660 = vmatpush3.msra.mxu0 %v6752_v2 }
0x2330   :  { %7661 = vmatprep.subr.mxu0 %v6751_v6 }
0x2331   :  { %v8950_v51 = vadd.f32 %v6745_v45, %v5964_v50  ;;  %v5983_v8 = vsel %vm191_vm2, %v8947_v49, 0.0  ;;  %7662 = vmatpush3.msra.mxu0 %v6751_v6 }
0x2332   :  { %5984 = vadd.xlane.f32.xlu0 %v5983_v8  ;;  %7663 = vmatprep.subr.mxu0 %v6750_v7 }
0x2333   :  { %v5980_v54 = vsel %vm191_vm2, %v8950_v51, 0.0  ;;  %7664 = vmatpush3.msra.mxu0 %v6750_v7 }
0x2334   :  { %5981 = vadd.xlane.f32.xlu1 %v5980_v54 }
0x23bb   :  { %v5985_v55 = vpop.xlane.xlu0 %5984 }
0x23bc   :  { %v5987_v56 = vmul.f32 0.03125, %v5985_v55 }
0x23bd   :  { %v5982_v57 = vpop.xlane.xlu1 %5981 }
0x23be   :  { %v5989_v61 = vsub.f32 %v8947_v49, %v5987_v56  ;;  %v5986_v58 = vmul.f32 0.03125, %v5982_v57 }
0x23c0   :  { %v5988_v59 = vsub.f32 %v8950_v51, %v5986_v58  ;;  %v5991_v60 = vmul.f32 %v5989_v61, %v5989_v61 }
0x23c2   :  { %v5995_v63 = vsel %vm191_vm2, %v5991_v60, 0.0  ;;  %v5990_v18 = vmul.f32 %v5988_v59, %v5988_v59 }
0x23c3   :  { %5996 = vadd.xlane.f32.xlu0 %v5995_v63 }
0x23c4   :  { %v5992_v62 = vsel %vm191_vm2, %v5990_v18, 0.0 }
0x23c5   :  { %5993 = vadd.xlane.f32.xlu1 %v5992_v62 }
0x244c   :  { %v5997_v10 = vpop.xlane.xlu0 %5996 }
0x244d   :  { %v5999_v11 = vmul.f32 0.03125, %v5997_v10 }
0x244e   :  { %v5994_v12 = vpop.xlane.xlu1 %5993 }
0x244f   :  { %v6001_v40 = vadd.f32 1e-05, %v5999_v11  ;;  %v5998_v52 = vmul.f32 0.03125, %v5994_v12 }
0x2451   :  { %7829 = vrsqrt.f32 %v6001_v40  ;;  %v6000_v43 = vadd.f32 1e-05, %v5998_v52 }
0x2453   :  { %7831 = vrsqrt.f32 %v6000_v43 }
0x245e   :  { %v7830_v53 = vpop.eup %7829 }
0x245f   :  { %v6005_v13 = vmul.f32 %v7830_v53, %v5989_v61 }
0x2460   :  { %v7832_v1 = vpop.eup %7831 }
0x2461   :  { %v6004_v15 = vmul.f32 %v7832_v1, %v5988_v59  ;;  %v6013_v16 = vmul.f32 %v6748_v14, %v6005_v13 }
0x2463   :  { %v6012_v20 = vmul.f32 %v6748_v14, %v6004_v15  ;;  %v6021_v22 = vadd.f32 %v6749_v19, %v6013_v16 }
0x2465   :  { %v6020_v21 = vadd.f32 %v6749_v19, %v6012_v20 }
0x2467   :  { %7665 = vmatprep.mubr.msk.f32.mxu0 %vm191_vm2, %v6020_v21 }
0x2468   :  { %7666 = vmatmul.mubr.msk.f32.vlgmr.msra.gmra.mxu0 %vm191_vm2, %v6021_v22 }
0x2528   :  { %v7667_v37 = vpop.f32.mrf.mxu0 }
0x2529   :  { %v6113_v3 = vadd.f32 %v7667_v37, %v6755_v17 }
0x252a   :  { %v6107_v23 = vpop.f32.mrf.mxu0 }
0x252b   :  { %v6119_v38 = vmul.f32 0.70710677, %v6113_v3  ;;  %v6108_v39 = vadd.f32 %v6755_v17, %v6107_v23  ;;  %v6117_v28 = vmul.f32 0.5, %v6113_v3  ;;  %v6331_v3 = vld [vmem:[%s9165_s26 + $0x78] sm:$0xff]  ;;  %v6330_v23 = vld [vmem:[%s9165_s26 + $0x70] sm:$0xff] }
0x252c   :  { %7703 = vmatprep.subr.msk.mxu0 %vm191_vm2, %v6331_v3 }
0x252d   :  { %v6125_v41 = vand.u32 2147483647, %v6119_v38  ;;  %v6118_v42 = vmul.f32 0.70710677, %v6108_v39  ;;  %vm6121_vm8 = vcmp.ge.f32.partialorder %v6119_v38, 0.0  ;;  %v6116_v30 = vmul.f32 0.5, %v6108_v39  ;;  %7704 = vmatpush3.xpose.msk.msra.mxu0 %vm191_vm2, %v6331_v3 }
0x252e   :  { %v6123_v21 = vsel %vm6121_vm8, 1.0, %v7870_v44  ;;  %7705 = vmatprep.subr.msk.mxu0 %vm191_vm2, %v6330_v23  ;;  %v6327_v38 = vld [vmem:[%s9165_s26 + $0x58] sm:$0xff]  ;;  %v6326_v39 = vld [vmem:[%s9165_s26 + $0x50] sm:$0xff] }
0x252f   :  { %v6127_v45 = vmul.f32 0.3275911, %v6125_v41  ;;  %v6124_v46 = vand.u32 2147483647, %v6118_v42  ;;  %v6153_v8 = vsub.f32 0.0, %v6125_v41  ;;  %vm6120_vm9 = vcmp.ge.f32.partialorder %v6118_v42, 0.0 }
0x2530   :  { %v6122_v9 = vsel %vm6120_vm9, 1.0, %v7870_v44  ;;  %v6324_v42 = vld [vmem:[%s9165_s26 + $0x40] sm:$0xff] }
0x2531   :  { %v6129_v47 = vadd.f32 1.0, %v6127_v45  ;;  %v6126_v48 = vmul.f32 0.3275911, %v6124_v46  ;;  %v6152_v54 = vsub.f32 0.0, %v6124_v46  ;;  %v6155_v55 = vmul.f32 %v6153_v8, %v6125_v41  ;;  %7706 = vmatpush3.xpose.msk.msra.mxu0 %vm191_vm2, %v6330_v23  ;;  %v6325_v41 = vld [vmem:[%s9165_s26 + $0x48] sm:$0xff]  ;;  %v6323_v45 = vld [vmem:[%s9165_s26 + $0x38] sm:$0xff] }
0x2533   :  { %7833 = vrcp.f32 %v6129_v47  ;;  %v6128_v50 = vadd.f32 1.0, %v6126_v48  ;;  %v6154_v57 = vmul.f32 %v6152_v54, %v6124_v46  ;;  %v6158_v58 = vmul.f32 1.442695, %v6155_v55  ;;  %v6322_v46 = vld [vmem:[%s9165_s26 + $0x30] sm:$0xff] }
0x2535   :  { %7835 = vrcp.f32 %v6128_v50  ;;  %v6156_v63 = vmul.f32 1.442695, %v6154_v57 }
0x2536   :  { %7837 = vpow2.f32 %v6158_v58 }
0x2537   :  { %7839 = vpow2.f32 %v6156_v63  ;;  %v6319_v63 = vld [vmem:[%s9165_s26 + $0x18] sm:$0xff] }
0x2540   :  { %v7834_v56 = vpop.eup %7833 }
0x2541   :  { %v6135_v61 = vmul.f32 1.0614054, %v7834_v56 }
0x2542   :  { %v7836_v59 = vpop.eup %7835 }
0x2543   :  { %v6137_v60 = vadd.f32 -1.4531521, %v6135_v61  ;;  %v6134_v18 = vmul.f32 1.0614054, %v7836_v59  ;;  %v7838_v13 = vpop.eup %7837 }
0x2544   :  { %v7840_v19 = vpop.eup %7839 }
0x2545   :  { %v6139_v62 = vmul.f32 %v7834_v56, %v6137_v60  ;;  %v6136_v0 = vadd.f32 -1.4531521, %v6134_v18  ;;  %v6320_v60 = vld [vmem:[%s9165_s26 + $0x20] sm:$0xff]  ;;  %v6318_v18 = vld [vmem:[%s9165_s26 + $0x10] sm:$0xff] }
0x2547   :  { %v6141_v2 = vadd.f32 1.4214138, %v6139_v62  ;;  %v6138_v6 = vmul.f32 %v7836_v59, %v6136_v0  ;;  %v6317_v62 = vld [vmem:[%s9165_s26 + $0x8] sm:$0xff]  ;;  %v6316_v0 = vld [vmem:[%s9165_s26] sm:$0xff] }
0x2549   :  { %v6143_v7 = vmul.f32 %v7834_v56, %v6141_v2  ;;  %v6140_v10 = vadd.f32 1.4214138, %v6138_v6 }
0x254b   :  { %v6145_v11 = vadd.f32 -0.28449672, %v6143_v7  ;;  %v6142_v12 = vmul.f32 %v7836_v59, %v6140_v10 }
0x254d   :  { %v6147_v40 = vmul.f32 %v7834_v56, %v6145_v11  ;;  %v6144_v52 = vadd.f32 -0.28449672, %v6142_v12 }
0x254f   :  { %v6149_v43 = vadd.f32 0.2548296, %v6147_v40  ;;  %v6146_v53 = vmul.f32 %v7836_v59, %v6144_v52  ;;  %v6776_v52 = vld [vmem:[%s9152_s19] ss:$0 sm:$0xff]  ;;  %s7845_s19 = scalar_lea.vmem %s6469_s3, 256 }
0x2550   :  { %p7846_p0 = scmp.ne.s32.totalorder %s6469_s3, %s7845_s19  ;;  %p7851_p2 = scmp.lt.s32.totalorder %s7845_s19, %s7845_s19 }
0x2551   :  { %v6151_v14 = vmul.f32 %v7834_v56, %v6149_v43  ;;  %v6148_v1 = vadd.f32 0.2548296, %v6146_v53 }
0x2552   :  { %p7852_p3 = por %p7851_p2, %p7850_p1 }
0x2553   :  { %v6161_v15 = vmul.f32 %v7838_v13, %v6151_v14  ;;  %v6150_v16 = vmul.f32 %v7836_v59, %v6148_v1  ;;  %v6321_v59 = vld [vmem:[%s9165_s26 + $0x28] sm:$0xff]  ;;  %v6777_v1 = vld [vmem:[%s9153_s20] ss:$0 sm:$0xff] }
0x2554   :  { %p7853_p4 = pnand %p7852_p3, %p7846_p0 }
0x2555   :  { %v6163_v20 = vsub.f32 1.0, %v6161_v15  ;;  %v6160_v22 = vmul.f32 %v7840_v19, %v6150_v16 }
0x2557   :  { %v6165_v31 = vmul.f32 %v6163_v20, %v6123_v21  ;;  %v6162_v24 = vsub.f32 1.0, %v6160_v22 }
0x2559   :  { %v6164_v25 = vmul.f32 %v6162_v24, %v6122_v9  ;;  %v6167_v5 = vadd.f32 1.0, %v6165_v31 }
0x255b   :  { %v6166_v27 = vadd.f32 1.0, %v6164_v25  ;;  %v6169_v32 = vmul.f32 %v6167_v5, %v6117_v28 }
0x255d   :  { %v6168_v29 = vmul.f32 %v6166_v27, %v6116_v30 }
0x255f   :  { %7700 = vmatprep.mubr.f32.mxu1 %v6168_v29 }
0x2560   :  { %7701 = vmatmul.mubr.f32.vlgmr.msra.gmra.mxu1 %v6169_v32 }
0x2620   :  { %v7702_v26 = vpop.f32.mrf.mxu1 }
0x2621   :  { %v6267_v34 = vadd.f32 %v7702_v26, %v6775_v33 }
0x2622   :  { %v6261_v35 = vpop.f32.mrf.mxu1 }
0x2623   :  { %v6262_v36 = vadd.f32 %v6775_v33, %v6261_v35  ;;  %v6271_v4 = vadd.f32 %v6267_v34, %v8947_v49  ;;  %v6329_v49 = vld [vmem:[%s9165_s26 + $0x68] sm:$0xff] }
0x2624   :  { %7707 = vmatprep.subr.msk.mxu0 %vm191_vm2, %v6329_v49 }
0x2625   :  { %v6277_v44 = vsel %vm191_vm2, %v6271_v4, 0.0  ;;  %v6270_v17 = vadd.f32 %v6262_v36, %v8950_v51  ;;  %v6328_v51 = vld [vmem:[%s9165_s26 + $0x60] sm:$0xff]  ;;  %7708 = vmatpush3.xpose.msk.msra.mxu0 %vm191_vm2, %v6329_v49 }
0x2626   :  { %6278 = vadd.xlane.f32.xlu0 %v6277_v44  ;;  %7709 = vmatprep.subr.msk.mxu0 %vm191_vm2, %v6328_v51 }
0x2627   :  { %v6274_v37 = vsel %vm191_vm2, %v6270_v17, 0.0 }
0x2628   :  { %6275 = vadd.xlane.f32.xlu1 %v6274_v37 }
0x2629   :  { %7710 = vmatpush3.xpose.msk.msra.mxu0 %vm191_vm2, %v6328_v51 }
0x262a   :  { %7711 = vmatprep.subr.msk.mxu0 %vm191_vm2, %v6327_v38 }
0x262d   :  { %7712 = vmatpush3.xpose.msk.msra.mxu0 %vm191_vm2, %v6327_v38 }
0x262e   :  { %7713 = vmatprep.subr.msk.mxu0 %vm191_vm2, %v6326_v39 }
0x2631   :  { %7714 = vmatpush3.xpose.msk.msra.mxu0 %vm191_vm2, %v6326_v39 }
0x2632   :  { %7715 = vmatprep.subr.msk.mxu0 %vm191_vm2, %v6325_v41 }
0x2635   :  { %7716 = vmatpush3.xpose.msk.msra.mxu0 %vm191_vm2, %v6325_v41 }
0x2636   :  { %7717 = vmatprep.subr.msk.mxu0 %vm191_vm2, %v6324_v42 }
0x2639   :  { %7718 = vmatpush3.xpose.msk.msra.mxu0 %vm191_vm2, %v6324_v42 }
0x263a   :  { %7719 = vmatprep.subr.msk.mxu0 %vm191_vm2, %v6323_v45 }
0x263d   :  { %7720 = vmatpush3.xpose.msk.msra.mxu0 %vm191_vm2, %v6323_v45 }
0x263e   :  { %7721 = vmatprep.subr.msk.mxu0 %vm191_vm2, %v6322_v46 }
0x2641   :  { %7722 = vmatpush3.xpose.msk.msra.mxu0 %vm191_vm2, %v6322_v46 }
0x2642   :  { %7723 = vmatprep.subr.msk.mxu0 %vm191_vm2, %v6321_v59 }
0x2645   :  { %7724 = vmatpush3.xpose.msk.msra.mxu0 %vm191_vm2, %v6321_v59 }
0x2646   :  { %7725 = vmatprep.subr.msk.mxu0 %vm191_vm2, %v6320_v60 }
0x2649   :  { %7726 = vmatpush3.xpose.msk.msra.mxu0 %vm191_vm2, %v6320_v60 }
0x264a   :  { %7727 = vmatprep.subr.msk.mxu0 %vm191_vm2, %v6319_v63 }
0x264d   :  { %7728 = vmatpush3.xpose.msk.msra.mxu0 %vm191_vm2, %v6319_v63 }
0x264e   :  { %7729 = vmatprep.subr.msk.mxu0 %vm191_vm2, %v6318_v18 }
0x2651   :  { %7730 = vmatpush3.xpose.msk.msra.mxu0 %vm191_vm2, %v6318_v18 }
0x2652   :  { %7731 = vmatprep.subr.msk.mxu0 %vm191_vm2, %v6317_v62 }
0x2655   :  { %7732 = vmatpush3.xpose.msk.msra.mxu0 %vm191_vm2, %v6317_v62 }
0x2656   :  { %7733 = vmatprep.subr.msk.mxu0 %vm191_vm2, %v6316_v0 }
0x2659   :  { %7734 = vmatpush3.xpose.msk.msra.mxu0 %vm191_vm2, %v6316_v0 }
0x26af   :  { %v6279_v47 = vpop.xlane.xlu0 %6278 }
0x26b0   :  { %v6281_v48 = vmul.f32 0.03125, %v6279_v47 }
0x26b1   :  { %v6276_v50 = vpop.xlane.xlu1 %6275 }
0x26b2   :  { %v6283_v8 = vsub.f32 %v6271_v4, %v6281_v48  ;;  %v6280_v54 = vmul.f32 0.03125, %v6276_v50 }
0x26b4   :  { %v6282_v55 = vsub.f32 %v6270_v17, %v6280_v54  ;;  %v6285_v56 = vmul.f32 %v6283_v8, %v6283_v8 }
0x26b6   :  { %v6289_v57 = vsel %vm191_vm2, %v6285_v56, 0.0  ;;  %v6284_v61 = vmul.f32 %v6282_v55, %v6282_v55 }
0x26b7   :  { %6290 = vadd.xlane.f32.xlu0 %v6289_v57 }
0x26b8   :  { %v6286_v58 = vsel %vm191_vm2, %v6284_v61, 0.0 }
0x26b9   :  { %6287 = vadd.xlane.f32.xlu1 %v6286_v58 }
0x2740   :  { %v6291_v2 = vpop.xlane.xlu0 %6290 }
0x2741   :  { %v6293_v6 = vmul.f32 0.03125, %v6291_v2 }
0x2742   :  { %v6288_v7 = vpop.xlane.xlu1 %6287 }
0x2743   :  { %v6295_v10 = vadd.f32 1e-05, %v6293_v6  ;;  %v6292_v11 = vmul.f32 0.03125, %v6288_v7 }
0x2745   :  { %7841 = vrsqrt.f32 %v6295_v10  ;;  %v6294_v12 = vadd.f32 1e-05, %v6292_v11 }
0x2747   :  { %7843 = vrsqrt.f32 %v6294_v12 }
0x2752   :  { %v7842_v40 = vpop.eup %7841 }
0x2753   :  { %v6299_v43 = vmul.f32 %v7842_v40, %v6283_v8 }
0x2754   :  { %v7844_v53 = vpop.eup %7843 }
0x2755   :  { %v6298_v14 = vmul.f32 %v7844_v53, %v6282_v55  ;;  %v6307_v13 = vmul.f32 %v6776_v52, %v6299_v43 }
0x2757   :  { %v6306_v15 = vmul.f32 %v6776_v52, %v6298_v14  ;;  %v6315_v19 = vadd.f32 %v6777_v1, %v6307_v13 }
0x2759   :  { %v6314_v16 = vadd.f32 %v6777_v1, %v6306_v15 }
0x275b   :  { %7735 = vmatprep.mubr.msk.f32.mxu0 %vm191_vm2, %v6314_v16 }
0x275c   :  { %7736 = vmatmul.mubr.msk.f32.vlgmr.msra.gmra.mxu0 %vm191_vm2, %v6315_v19 }
0x281c   :  { %v7737_v20 = vpop.f32.mrf.mxu0 }
0x281d   :  { %6462 = vst [vmem:[#allocation2 + $0x8] sm:$0xff] %v7737_v20 }
0x281e   :  { %v6452_v21 = vpop.f32.mrf.mxu0 }
0x281f   :  { %6461 = vst [vmem:[#allocation2] sm:$0xff] %v6452_v21 }
0x2820   :  { %7856 = shalt.err (!%p7853_p4)
}
0x2821   :  { %s7872_s20 = smov 128   ;;  %s7873_s29 = smov 8  }
0x2822   :  { %6474 = dma.vmem_to_hbm [thread:$0]  %s6469_s3, 256, %s9154_s21, [#allocation3], %s7872_s20, %s7872_s20, %s7873_s29  }
0x2823   :  { %7865 = dma.done.wait [#allocation3], 256  }
0x2824   :  { %7866 = vsyncadd [#allocation3], 4294967040 }
0x2825   :  { %6478 = vsyncpa [#allocation3], 1 }

</bundles_post_ra>
